<compile_context>
chip_gen: v7x
topology: tpu7x:2x2x1
jax: 0.10.0
libtpu: 0.0.40
codegen_flags: <defaults>
</compile_context>

<pallas_src>
import functools

import numpy as np
import jax
import jax.numpy as jnp
from jax.experimental import pallas as pl
from jax.experimental.pallas import tpu as pltpu


def coupled_attn_kernel(
    lens_ref,     # (1, TB) int32            per-sequence lengths (lane vector)
    h_ref,        # (TB, S, H)               encoder states
    m_ref,        # (TB, H, 4K)              u-contracted bilinear weights
    wih_t_ref,    # (gate_w, 4K)             fused GRU input weights, transposed
    bih_ref,      # (gate_w, 1)
    whh_t_ref,    # (gate_w, 4K)             fused GRU hidden weights, transposed
    bhh_ref,      # (gate_w, 1)
    r_ref,        # out (S, 4K, TB)          packed [h_a | h_p], time-major, batch on lanes
    gi_scr,       # VMEM (S, gate_w, TB)     hoisted input projection, time-major
    *, chunk, unroll):
    TB, S, H = h_ref.shape
    gate_w, four_k = whh_t_ref.shape

    # ---------------- phase 1 (throughput): bilinear features + input projection ----
    # f_c = tanh(h_c @ M)  (batch-leading, MXU batched matmul), then per time step
    # gi_t = wih^T @ f_t^T + bih  stored lane-dense & time-major: gi_scr[t] = (gate_w, TB).
    n_chunks = S // chunk

    def chunk_body(c, carry):
        c0 = pl.multiple_of(c * chunk, chunk)
        h_c = h_ref[:, pl.ds(c0, chunk), :]                               # (TB, C, H)
        f_c = jnp.tanh(
            jnp.einsum("bch,bhk->bck", h_c, m_ref[...],
                       preferred_element_type=jnp.float32))               # (TB, C, 4K)
        for t in range(chunk):                                            # static, small
            gi_t = jnp.einsum("gk,bk->gb", wih_t_ref[...], f_c[:, t, :],
                              preferred_element_type=jnp.float32) + bih_ref[...]
            gi_scr[c0 + t] = gi_t                                         # (gate_w, TB)
        return carry

    jax.lax.fori_loop(0, n_chunks, chunk_body, 0)

    # ---------------- phase 2 (latency): fused block-diagonal GRU recurrence --------
    # State = [h_a | h_p] carried as (four_k, TB); gates sliced along sublanes.
    def cell(t, h_prev):
        gi_t = gi_scr[t]                                                  # (gate_w, TB)
        gh = jnp.dot(whh_t_ref[...], h_prev,
                     preferred_element_type=jnp.float32) + bhh_ref[...]   # (gate_w, TB)
        r = jax.nn.sigmoid(gi_t[:four_k] + gh[:four_k])
        z = jax.nn.sigmoid(gi_t[four_k:2 * four_k] + gh[four_k:2 * four_k])
        n = jnp.tanh(gi_t[2 * four_k:] + r * gh[2 * four_k:])
        h_new = (1.0 - z) * n + z * h_prev
        # pad_packed_sequence zero padding: per-step select, direct store to output.
        r_ref[t] = jnp.where(t < lens_ref[...], h_new, 0.0)
        return h_new

    def unrolled(i, h_prev):
        t0 = pl.multiple_of(i * unroll, unroll)
        h = h_prev
        for u in range(unroll):                                           # manual unroll
            h = cell(t0 + u, h)
        return h

    h0 = jnp.zeros((four_k, TB), jnp.float32)
    jax.lax.fori_loop(0, S // unroll, unrolled, h0)


def _pick_divisor(n, candidates):
    for c in candidates:
        if n % c == 0:
            return c
    return 1


def coupled_attn_pallas(h, h_len, u_a, u_p, params, *, block_b=None):
    B, S, H = h.shape
    K = params["K"]
    two_k = 2 * K
    four_k = 4 * K
    gate_w = 3 * four_k

    # ---- batch tile = lane axis of the recurrence. Must divide B and be either B
    #      itself or a multiple of 128 (BlockSpec last-dim rule). Prefer >= 2 tiles
    #      so BlockSpec pipelining / megacore sharding have work.
    if block_b is not None:
        TB = block_b
    elif B % 128 == 0 and B >= 256:
        TB = 128
    else:
        TB = B
    assert B % TB == 0 and (TB == B or TB % 128 == 0)

    chunk = _pick_divisor(S, (32, 16, 8, 4, 2, 1))
    unroll = _pick_divisor(S, (4, 2, 1))

    # ---------------- host-side weight plumbing (pure algebra / layout) ----------------
    def u_contract(W, u):
        # W: (K*H, H) torch Linear weight; u: (B, H).
        # M[b, i, k] = sum_j W[k*H + j, i] * u[b, j]  so  (h @ M)[b,s,k] == bilinear.
        return jnp.einsum("kji,bj->bik", W.reshape(K, H, H), u)

    m_all = jnp.concatenate(
        [
            u_contract(params["W_Ga"], u_a),   # -> fa[:, :K]   (G_a . u_a)
            u_contract(params["W_Da"], u_p),   # -> fa[:, K:2K] (D_a . u_p)
            u_contract(params["W_Gp"], u_p),   # -> fp[:, :K]   (G_p . u_p)
            u_contract(params["W_Dp"], u_a),   # -> fp[:, K:2K] (D_p . u_a)
        ],
        axis=-1,
    )                                          # (B, H, 4K)

    def combine_gru_w(wa, wp):
        # wa, wp: (3*2K, D) torch layout (gate order r, z, n) -> (D*2, 3*4K)
        d = wa.shape[1]
        z = jnp.zeros((d, two_k), wa.dtype)
        cols = []
        for g in range(3):
            wa_g = wa[g * two_k:(g + 1) * two_k, :].T     # (D, 2K)
            wp_g = wp[g * two_k:(g + 1) * two_k, :].T     # (D, 2K)
            top = jnp.concatenate([wa_g, z], axis=1)      # (D, 4K)
            bot = jnp.concatenate([z, wp_g], axis=1)      # (D, 4K)
            cols.append(jnp.concatenate([top, bot], axis=0))
        return jnp.concatenate(cols, axis=1)              # (4K, gate_w)

    def combine_gru_b(ba, bp):
        parts = []
        for g in range(3):
            parts.append(ba[:, g * two_k:(g + 1) * two_k])
            parts.append(bp[:, g * two_k:(g + 1) * two_k])
        return jnp.concatenate(parts, axis=1)             # (1, gate_w)

    wih_t = combine_gru_w(params["wih_a"], params["wih_p"]).T        # (gate_w, 4K)
    whh_t = combine_gru_w(params["whh_a"], params["whh_p"]).T        # (gate_w, 4K)
    bih_c = combine_gru_b(params["bih_a"], params["bih_p"]).reshape(gate_w, 1)
    bhh_c = combine_gru_b(params["bhh_a"], params["bhh_p"]).reshape(gate_w, 1)

    lens = h_len.astype(jnp.int32).reshape(1, B)

    # ---------------- pallas_call ----------------
    grid = (B // TB,)
    fullw = lambda i: (0, 0)

    grid_spec = pltpu.PrefetchScalarGridSpec(
        num_scalar_prefetch=0,
        grid=grid,
        in_specs=[
            pl.BlockSpec((1, TB), lambda i: (0, i)),                 # lens
            pl.BlockSpec((TB, S, H), lambda i: (i, 0, 0)),           # h
            pl.BlockSpec((TB, H, four_k), lambda i: (i, 0, 0)),      # M
            pl.BlockSpec((gate_w, four_k), fullw),                   # wih^T (fused)
            pl.BlockSpec((gate_w, 1), fullw),                        # bih
            pl.BlockSpec((gate_w, four_k), fullw),                   # whh^T (fused)
            pl.BlockSpec((gate_w, 1), fullw),                        # bhh
        ],
        out_specs=pl.BlockSpec((S, four_k, TB), lambda i: (0, 0, i)),
        scratch_shapes=[pltpu.VMEM((S, gate_w, TB), jnp.float32)],
    )

    # VMEM budget: gi scratch + double-buffered blocks + weights, with headroom.
    vmem_need = 4 * (
        S * gate_w * TB
        + 2 * (TB * S * H + TB * H * four_k + S * four_k * TB + TB)
        + 4 * (gate_w * four_k + gate_w)
    )
    vmem_limit = int(min(64 * 1024 * 1024, max(16 * 1024 * 1024, 2 * vmem_need)))

    fn = pl.pallas_call(
        functools.partial(coupled_attn_kernel, chunk=chunk, unroll=unroll),
        grid_spec=grid_spec,
        out_shape=jax.ShapeDtypeStruct((S, four_k, B), jnp.float32),
        compiler_params=pltpu.CompilerParams(
            dimension_semantics=("parallel",),   # batch tiles independent; on v7x use
                                                 # CORE_PARALLEL when grid >= 2 cores
            vmem_limit_bytes=vmem_limit),
    )
    r_t = fn(lens, h, m_all, wih_t, bih_c, whh_t, bhh_c)   # (S, 4K, B)

    # Layout plumbing + width-1 projections: trivial throughput work, done by XLA
    # (lane-dense kernel output instead of masked 2-lane stores).
    r = jnp.transpose(r_t, (2, 0, 1))                      # (B, S, 4K) = [ra | rp]
    ra = r[..., :two_k]
    rp = r[..., two_k:]
    ea = ra @ params["wva"].T
    ep = rp @ params["wvp"].T
    return (ra, rp), (ea, ep)


def coupled_attn_ref(h, h_len, u_a, u_p, p):
    """Pure-JAX reference matching the PyTorch forward."""
    B, S, H = h.shape
    K = p["K"]
    two_k = 2 * K

    def bil(W, u):
        hw = jnp.einsum("bsi,mi->bsm", h, W).reshape(B, S, K, H)
        return jnp.einsum("bskj,bj->bsk", hw, u)

    h_G_ua = bil(p["W_Ga"], u_a)
    h_D_up = bil(p["W_Da"], u_p)
    h_G_up = bil(p["W_Gp"], u_p)
    h_D_ua = bil(p["W_Dp"], u_a)
    fa = jnp.tanh(jnp.concatenate([h_G_ua, h_D_up], -1))
    fp = jnp.tanh(jnp.concatenate([h_G_up, h_D_ua], -1))

    def gru(f, wih, whh, bih, bhh):
        def step(hprev, x_t):
            gi = x_t @ wih.T + bih
            gh = hprev @ whh.T + bhh
            r = jax.nn.sigmoid(gi[:, :two_k] + gh[:, :two_k])
            z = jax.nn.sigmoid(gi[:, two_k:2 * two_k] + gh[:, two_k:2 * two_k])
            n = jnp.tanh(gi[:, 2 * two_k:] + r * gh[:, 2 * two_k:])
            hn = (1.0 - z) * n + z * hprev
            return hn, hn

        h0 = jnp.zeros((B, two_k), f.dtype)
        _, outs = jax.lax.scan(step, h0, jnp.swapaxes(f, 0, 1))
        outs = jnp.swapaxes(outs, 0, 1)
        mask = jnp.arange(S)[None, :, None] < h_len[:, None, None]
        return jnp.where(mask, outs, 0.0)

    ra = gru(fa, p["wih_a"], p["whh_a"], p["bih_a"], p["bhh_a"])
    rp = gru(fp, p["wih_p"], p["whh_p"], p["bih_p"], p["bhh_p"])
    ea = ra @ p["wva"].T
    ep = rp @ p["wvp"].T
    return (ra, rp), (ea, ep)


if __name__ == "__main__":
    # Small shapes consistent with the module: K=8, hidden_dim=32, B=2, S=8.
    B, S, H, K = 2, 8, 32, 8
    two_k = 2 * K

    key = jax.random.PRNGKey(0)
    keys = jax.random.split(key, 17)

    def w(k, shape, scale=0.1):
        return (scale * jax.random.normal(k, shape)).astype(jnp.float32)

    params = {
        "K": K,
        "W_Ga": w(keys[0], (K * H, H)),
        "W_Gp": w(keys[1], (K * H, H)),
        "W_Da": w(keys[2], (K * H, H)),
        "W_Dp": w(keys[3], (K * H, H)),
        "wih_a": w(keys[4], (3 * two_k, two_k)),
        "whh_a": w(keys[5], (3 * two_k, two_k)),
        "bih_a": w(keys[6], (1, 3 * two_k)),
        "bhh_a": w(keys[7], (1, 3 * two_k)),
        "wih_p": w(keys[8], (3 * two_k, two_k)),
        "whh_p": w(keys[9], (3 * two_k, two_k)),
        "bih_p": w(keys[10], (1, 3 * two_k)),
        "bhh_p": w(keys[11], (1, 3 * two_k)),
        "wva": w(keys[12], (1, two_k)),
        "wvp": w(keys[13], (1, two_k)),
    }

    h = jax.random.normal(keys[14], (B, S, H), dtype=jnp.float32)
    u_a = jax.random.normal(keys[15], (B, H), dtype=jnp.float32)
    u_p = jax.random.normal(keys[16], (B, H), dtype=jnp.float32)
    h_len = jnp.array([S, S - 3], dtype=jnp.int32)

    (ra, rp), (ea, ep) = coupled_attn_pallas(h, h_len, u_a, u_p, params)
    jax.block_until_ready((ra, rp, ea, ep))

    (ra_r, rp_r), (ea_r, ep_r) = coupled_attn_ref(h, h_len, u_a, u_p, params)
    np.testing.assert_allclose(np.asarray(ra), np.asarray(ra_r), rtol=1e-4, atol=1e-4)
    np.testing.assert_allclose(np.asarray(rp), np.asarray(rp_r), rtol=1e-4, atol=1e-4)
    np.testing.assert_allclose(np.asarray(ea), np.asarray(ea_r), rtol=1e-4, atol=1e-4)
    np.testing.assert_allclose(np.asarray(ep), np.asarray(ep_r), rtol=1e-4, atol=1e-4)

    print("KERNEL_OK")
</pallas_src>

<mosaic_0001>
module attributes {stable_mosaic.version = 11 : i64} {
  func.func @coupled_attn_kernel(%arg0: i32, %arg1: memref<1x2xi32, #tpu.memory_space<vmem>>, %arg2: memref<2x8x32xf32, #tpu.memory_space<vmem>>, %arg3: memref<2x32x32xf32, #tpu.memory_space<vmem>>, %arg4: memref<96x32xf32, #tpu.memory_space<vmem>>, %arg5: memref<96x1xf32, #tpu.memory_space<vmem>>, %arg6: memref<96x32xf32, #tpu.memory_space<vmem>>, %arg7: memref<96x1xf32, #tpu.memory_space<vmem>>, %arg8: memref<8x32x2xf32, #tpu.memory_space<vmem>>, %arg9: memref<8x96x2xf32, #tpu.memory_space<vmem>>) attributes {dimension_semantics = [#tpu.dimension_semantics<parallel>], iteration_bounds = array<i64: 1>, scalar_prefetch = 0 : i64, scratch_operands = 1 : i64, tpu.core_type = #tpu.core_type<tc>, window_params = [{transform_indices = @transform_0, window_bounds = array<i64: 1, 2>}, {transform_indices = @transform_1, window_bounds = array<i64: 2, 8, 32>}, {transform_indices = @transform_2, window_bounds = array<i64: 2, 32, 32>}, {pipeline_mode = #tpu.pipeline_mode<synchronous>, transform_indices = @transform_3, window_bounds = array<i64: 96, 32>}, {pipeline_mode = #tpu.pipeline_mode<synchronous>, transform_indices = @transform_4, window_bounds = array<i64: 96, 1>}, {pipeline_mode = #tpu.pipeline_mode<synchronous>, transform_indices = @transform_5, window_bounds = array<i64: 96, 32>}, {pipeline_mode = #tpu.pipeline_mode<synchronous>, transform_indices = @transform_6, window_bounds = array<i64: 96, 1>}, {transform_indices = @transform_7, window_bounds = array<i64: 8, 32, 2>}]} {
    %c0_i32 = arith.constant 0 : i32
    %c8_i32 = arith.constant 8 : i32
    %0 = arith.muli %c0_i32, %c8_i32 : i32
    %1 = tpu.assume_multiple %0, 8 : i32
    %c0 = arith.constant 0 : index
    %2 = arith.index_cast %1 : i32 to index
    %c0_0 = arith.constant 0 : index
    %3 = vector.load %arg2[%c0, %2, %c0_0] : memref<2x8x32xf32, #tpu.memory_space<vmem>>, vector<2x8x32xf32>
    %c0_1 = arith.constant 0 : index
    %c0_2 = arith.constant 0 : index
    %c0_3 = arith.constant 0 : index
    %4 = vector.load %arg3[%c0_1, %c0_2, %c0_3] : memref<2x32x32xf32, #tpu.memory_space<vmem>>, vector<2x32x32xf32>
    "tpu.trace_start"() <{level = 10 : i32, message = "bch,bhk->bck"}> : () -> ()
    %cst = arith.constant dense<0.000000e+00> : vector<2x8x32xf32>
    %5 = tpu.matmul %3, %4, %cst {dimension_numbers = #tpu.dot_dimension_numbers<[2], [1], [1], [2], [0, 0, 0, 1, 1, 2], [0], [0]>} : vector<2x8x32xf32>, vector<2x32x32xf32>, vector<2x8x32xf32> -> vector<2x8x32xf32>
    "tpu.trace_stop"() : () -> ()
    %6 = math.tanh %5 : vector<2x8x32xf32>
    %c0_4 = arith.constant 0 : index
    %c0_5 = arith.constant 0 : index
    %7 = vector.load %arg4[%c0_4, %c0_5] : memref<96x32xf32, #tpu.memory_space<vmem>>, vector<96x32xf32>
    %8 = vector.extract_strided_slice %6 {offsets = [0, 0, 0], sizes = [2, 1, 32], strides = [1, 1, 1]} : vector<2x8x32xf32> to vector<2x1x32xf32>
    %9 = vector.shape_cast %8 : vector<2x1x32xf32> to vector<2x32xf32>
    "tpu.trace_start"() <{level = 10 : i32, message = "gk,bk->gb"}> : () -> ()
    %cst_6 = arith.constant dense<0.000000e+00> : vector<96x2xf32>
    %10 = tpu.matmul %7, %9, %cst_6 {dimension_numbers = #tpu.dot_dimension_numbers<[1], [1], [0], [0], [0, 0, 1, 0], [], []>} : vector<96x32xf32>, vector<2x32xf32>, vector<96x2xf32> -> vector<96x2xf32>
    "tpu.trace_stop"() : () -> ()
    %c0_7 = arith.constant 0 : index
    %c0_8 = arith.constant 0 : index
    %11 = vector.load %arg5[%c0_7, %c0_8] : memref<96x1xf32, #tpu.memory_space<vmem>>, vector<96x1xf32>
    %12 = vector.broadcast %11 : vector<96x1xf32> to vector<96x2xf32>
    %13 = arith.addf %10, %12 : vector<96x2xf32>
    %c0_i32_9 = arith.constant 0 : i32
    %14 = arith.addi %1, %c0_i32_9 : i32
    %15 = arith.index_cast %14 : i32 to index
    %c0_10 = arith.constant 0 : index
    %c0_11 = arith.constant 0 : index
    %16 = vector.load %arg9[%15, %c0_10, %c0_11] : memref<8x96x2xf32, #tpu.memory_space<vmem>>, vector<1x96x2xf32>
    %17 = vector.shape_cast %16 : vector<1x96x2xf32> to vector<96x2xf32>
    %18 = vector.shape_cast %13 : vector<96x2xf32> to vector<1x96x2xf32>
    tpu.vector_store %arg9[%15, %c0_10, %c0_11], %18 {strides = array<i32>} : memref<8x96x2xf32, #tpu.memory_space<vmem>>, vector<1x96x2xf32>,
    %c0_12 = arith.constant 0 : index
    %c0_13 = arith.constant 0 : index
    %19 = vector.load %arg4[%c0_12, %c0_13] : memref<96x32xf32, #tpu.memory_space<vmem>>, vector<96x32xf32>
    %20 = vector.extract_strided_slice %6 {offsets = [0, 1, 0], sizes = [2, 1, 32], strides = [1, 1, 1]} : vector<2x8x32xf32> to vector<2x1x32xf32>
    %21 = vector.shape_cast %20 : vector<2x1x32xf32> to vector<2x32xf32>
    "tpu.trace_start"() <{level = 10 : i32, message = "gk,bk->gb"}> : () -> ()
    %cst_14 = arith.constant dense<0.000000e+00> : vector<96x2xf32>
    %22 = tpu.matmul %19, %21, %cst_14 {dimension_numbers = #tpu.dot_dimension_numbers<[1], [1], [0], [0], [0, 0, 1, 0], [], []>} : vector<96x32xf32>, vector<2x32xf32>, vector<96x2xf32> -> vector<96x2xf32>
    "tpu.trace_stop"() : () -> ()
    %c0_15 = arith.constant 0 : index
    %c0_16 = arith.constant 0 : index
    %23 = vector.load %arg5[%c0_15, %c0_16] : memref<96x1xf32, #tpu.memory_space<vmem>>, vector<96x1xf32>
    %24 = vector.broadcast %23 : vector<96x1xf32> to vector<96x2xf32>
    %25 = arith.addf %22, %24 : vector<96x2xf32>
    %c1_i32 = arith.constant 1 : i32
    %26 = arith.addi %1, %c1_i32 : i32
    %27 = arith.index_cast %26 : i32 to index
    %c0_17 = arith.constant 0 : index
    %c0_18 = arith.constant 0 : index
    %28 = vector.load %arg9[%27, %c0_17, %c0_18] : memref<8x96x2xf32, #tpu.memory_space<vmem>>, vector<1x96x2xf32>
    %29 = vector.shape_cast %28 : vector<1x96x2xf32> to vector<96x2xf32>
    %30 = vector.shape_cast %25 : vector<96x2xf32> to vector<1x96x2xf32>
    tpu.vector_store %arg9[%27, %c0_17, %c0_18], %30 {strides = array<i32>} : memref<8x96x2xf32, #tpu.memory_space<vmem>>, vector<1x96x2xf32>,
    %c0_19 = arith.constant 0 : index
    %c0_20 = arith.constant 0 : index
    %31 = vector.load %arg4[%c0_19, %c0_20] : memref<96x32xf32, #tpu.memory_space<vmem>>, vector<96x32xf32>
    %32 = vector.extract_strided_slice %6 {offsets = [0, 2, 0], sizes = [2, 1, 32], strides = [1, 1, 1]} : vector<2x8x32xf32> to vector<2x1x32xf32>
    %33 = vector.shape_cast %32 : vector<2x1x32xf32> to vector<2x32xf32>
    "tpu.trace_start"() <{level = 10 : i32, message = "gk,bk->gb"}> : () -> ()
    %cst_21 = arith.constant dense<0.000000e+00> : vector<96x2xf32>
    %34 = tpu.matmul %31, %33, %cst_21 {dimension_numbers = #tpu.dot_dimension_numbers<[1], [1], [0], [0], [0, 0, 1, 0], [], []>} : vector<96x32xf32>, vector<2x32xf32>, vector<96x2xf32> -> vector<96x2xf32>
    "tpu.trace_stop"() : () -> ()
    %c0_22 = arith.constant 0 : index
    %c0_23 = arith.constant 0 : index
    %35 = vector.load %arg5[%c0_22, %c0_23] : memref<96x1xf32, #tpu.memory_space<vmem>>, vector<96x1xf32>
    %36 = vector.broadcast %35 : vector<96x1xf32> to vector<96x2xf32>
    %37 = arith.addf %34, %36 : vector<96x2xf32>
    %c2_i32 = arith.constant 2 : i32
    %38 = arith.addi %1, %c2_i32 : i32
    %39 = arith.index_cast %38 : i32 to index
    %c0_24 = arith.constant 0 : index
    %c0_25 = arith.constant 0 : index
    %40 = vector.load %arg9[%39, %c0_24, %c0_25] : memref<8x96x2xf32, #tpu.memory_space<vmem>>, vector<1x96x2xf32>
    %41 = vector.shape_cast %40 : vector<1x96x2xf32> to vector<96x2xf32>
    %42 = vector.shape_cast %37 : vector<96x2xf32> to vector<1x96x2xf32>
    tpu.vector_store %arg9[%39, %c0_24, %c0_25], %42 {strides = array<i32>} : memref<8x96x2xf32, #tpu.memory_space<vmem>>, vector<1x96x2xf32>,
    %c0_26 = arith.constant 0 : index
    %c0_27 = arith.constant 0 : index
    %43 = vector.load %arg4[%c0_26, %c0_27] : memref<96x32xf32, #tpu.memory_space<vmem>>, vector<96x32xf32>
    %44 = vector.extract_strided_slice %6 {offsets = [0, 3, 0], sizes = [2, 1, 32], strides = [1, 1, 1]} : vector<2x8x32xf32> to vector<2x1x32xf32>
    %45 = vector.shape_cast %44 : vector<2x1x32xf32> to vector<2x32xf32>
    "tpu.trace_start"() <{level = 10 : i32, message = "gk,bk->gb"}> : () -> ()
    %cst_28 = arith.constant dense<0.000000e+00> : vector<96x2xf32>
    %46 = tpu.matmul %43, %45, %cst_28 {dimension_numbers = #tpu.dot_dimension_numbers<[1], [1], [0], [0], [0, 0, 1, 0], [], []>} : vector<96x32xf32>, vector<2x32xf32>, vector<96x2xf32> -> vector<96x2xf32>
    "tpu.trace_stop"() : () -> ()
    %c0_29 = arith.constant 0 : index
    %c0_30 = arith.constant 0 : index
    %47 = vector.load %arg5[%c0_29, %c0_30] : memref<96x1xf32, #tpu.memory_space<vmem>>, vector<96x1xf32>
    %48 = vector.broadcast %47 : vector<96x1xf32> to vector<96x2xf32>
    %49 = arith.addf %46, %48 : vector<96x2xf32>
    %c3_i32 = arith.constant 3 : i32
    %50 = arith.addi %1, %c3_i32 : i32
    %51 = arith.index_cast %50 : i32 to index
    %c0_31 = arith.constant 0 : index
    %c0_32 = arith.constant 0 : index
    %52 = vector.load %arg9[%51, %c0_31, %c0_32] : memref<8x96x2xf32, #tpu.memory_space<vmem>>, vector<1x96x2xf32>
    %53 = vector.shape_cast %52 : vector<1x96x2xf32> to vector<96x2xf32>
    %54 = vector.shape_cast %49 : vector<96x2xf32> to vector<1x96x2xf32>
    tpu.vector_store %arg9[%51, %c0_31, %c0_32], %54 {strides = array<i32>} : memref<8x96x2xf32, #tpu.memory_space<vmem>>, vector<1x96x2xf32>,
    %c0_33 = arith.constant 0 : index
    %c0_34 = arith.constant 0 : index
    %55 = vector.load %arg4[%c0_33, %c0_34] : memref<96x32xf32, #tpu.memory_space<vmem>>, vector<96x32xf32>
    %56 = vector.extract_strided_slice %6 {offsets = [0, 4, 0], sizes = [2, 1, 32], strides = [1, 1, 1]} : vector<2x8x32xf32> to vector<2x1x32xf32>
    %57 = vector.shape_cast %56 : vector<2x1x32xf32> to vector<2x32xf32>
    "tpu.trace_start"() <{level = 10 : i32, message = "gk,bk->gb"}> : () -> ()
    %cst_35 = arith.constant dense<0.000000e+00> : vector<96x2xf32>
    %58 = tpu.matmul %55, %57, %cst_35 {dimension_numbers = #tpu.dot_dimension_numbers<[1], [1], [0], [0], [0, 0, 1, 0], [], []>} : vector<96x32xf32>, vector<2x32xf32>, vector<96x2xf32> -> vector<96x2xf32>
    "tpu.trace_stop"() : () -> ()
    %c0_36 = arith.constant 0 : index
    %c0_37 = arith.constant 0 : index
    %59 = vector.load %arg5[%c0_36, %c0_37] : memref<96x1xf32, #tpu.memory_space<vmem>>, vector<96x1xf32>
    %60 = vector.broadcast %59 : vector<96x1xf32> to vector<96x2xf32>
    %61 = arith.addf %58, %60 : vector<96x2xf32>
    %c4_i32 = arith.constant 4 : i32
    %62 = arith.addi %1, %c4_i32 : i32
    %63 = arith.index_cast %62 : i32 to index
    %c0_38 = arith.constant 0 : index
    %c0_39 = arith.constant 0 : index
    %64 = vector.load %arg9[%63, %c0_38, %c0_39] : memref<8x96x2xf32, #tpu.memory_space<vmem>>, vector<1x96x2xf32>
    %65 = vector.shape_cast %64 : vector<1x96x2xf32> to vector<96x2xf32>
    %66 = vector.shape_cast %61 : vector<96x2xf32> to vector<1x96x2xf32>
    tpu.vector_store %arg9[%63, %c0_38, %c0_39], %66 {strides = array<i32>} : memref<8x96x2xf32, #tpu.memory_space<vmem>>, vector<1x96x2xf32>,
    %c0_40 = arith.constant 0 : index
    %c0_41 = arith.constant 0 : index
    %67 = vector.load %arg4[%c0_40, %c0_41] : memref<96x32xf32, #tpu.memory_space<vmem>>, vector<96x32xf32>
    %68 = vector.extract_strided_slice %6 {offsets = [0, 5, 0], sizes = [2, 1, 32], strides = [1, 1, 1]} : vector<2x8x32xf32> to vector<2x1x32xf32>
    %69 = vector.shape_cast %68 : vector<2x1x32xf32> to vector<2x32xf32>
    "tpu.trace_start"() <{level = 10 : i32, message = "gk,bk->gb"}> : () -> ()
    %cst_42 = arith.constant dense<0.000000e+00> : vector<96x2xf32>
    %70 = tpu.matmul %67, %69, %cst_42 {dimension_numbers = #tpu.dot_dimension_numbers<[1], [1], [0], [0], [0, 0, 1, 0], [], []>} : vector<96x32xf32>, vector<2x32xf32>, vector<96x2xf32> -> vector<96x2xf32>
    "tpu.trace_stop"() : () -> ()
    %c0_43 = arith.constant 0 : index
    %c0_44 = arith.constant 0 : index
    %71 = vector.load %arg5[%c0_43, %c0_44] : memref<96x1xf32, #tpu.memory_space<vmem>>, vector<96x1xf32>
    %72 = vector.broadcast %71 : vector<96x1xf32> to vector<96x2xf32>
    %73 = arith.addf %70, %72 : vector<96x2xf32>
    %c5_i32 = arith.constant 5 : i32
    %74 = arith.addi %1, %c5_i32 : i32
    %75 = arith.index_cast %74 : i32 to index
    %c0_45 = arith.constant 0 : index
    %c0_46 = arith.constant 0 : index
    %76 = vector.load %arg9[%75, %c0_45, %c0_46] : memref<8x96x2xf32, #tpu.memory_space<vmem>>, vector<1x96x2xf32>
    %77 = vector.shape_cast %76 : vector<1x96x2xf32> to vector<96x2xf32>
    %78 = vector.shape_cast %73 : vector<96x2xf32> to vector<1x96x2xf32>
    tpu.vector_store %arg9[%75, %c0_45, %c0_46], %78 {strides = array<i32>} : memref<8x96x2xf32, #tpu.memory_space<vmem>>, vector<1x96x2xf32>,
    %c0_47 = arith.constant 0 : index
    %c0_48 = arith.constant 0 : index
    %79 = vector.load %arg4[%c0_47, %c0_48] : memref<96x32xf32, #tpu.memory_space<vmem>>, vector<96x32xf32>
    %80 = vector.extract_strided_slice %6 {offsets = [0, 6, 0], sizes = [2, 1, 32], strides = [1, 1, 1]} : vector<2x8x32xf32> to vector<2x1x32xf32>
    %81 = vector.shape_cast %80 : vector<2x1x32xf32> to vector<2x32xf32>
    "tpu.trace_start"() <{level = 10 : i32, message = "gk,bk->gb"}> : () -> ()
    %cst_49 = arith.constant dense<0.000000e+00> : vector<96x2xf32>
    %82 = tpu.matmul %79, %81, %cst_49 {dimension_numbers = #tpu.dot_dimension_numbers<[1], [1], [0], [0], [0, 0, 1, 0], [], []>} : vector<96x32xf32>, vector<2x32xf32>, vector<96x2xf32> -> vector<96x2xf32>
    "tpu.trace_stop"() : () -> ()
    %c0_50 = arith.constant 0 : index
    %c0_51 = arith.constant 0 : index
    %83 = vector.load %arg5[%c0_50, %c0_51] : memref<96x1xf32, #tpu.memory_space<vmem>>, vector<96x1xf32>
    %84 = vector.broadcast %83 : vector<96x1xf32> to vector<96x2xf32>
    %85 = arith.addf %82, %84 : vector<96x2xf32>
    %c6_i32 = arith.constant 6 : i32
    %86 = arith.addi %1, %c6_i32 : i32
    %87 = arith.index_cast %86 : i32 to index
    %c0_52 = arith.constant 0 : index
    %c0_53 = arith.constant 0 : index
    %88 = vector.load %arg9[%87, %c0_52, %c0_53] : memref<8x96x2xf32, #tpu.memory_space<vmem>>, vector<1x96x2xf32>
    %89 = vector.shape_cast %88 : vector<1x96x2xf32> to vector<96x2xf32>
    %90 = vector.shape_cast %85 : vector<96x2xf32> to vector<1x96x2xf32>
    tpu.vector_store %arg9[%87, %c0_52, %c0_53], %90 {strides = array<i32>} : memref<8x96x2xf32, #tpu.memory_space<vmem>>, vector<1x96x2xf32>,
    %c0_54 = arith.constant 0 : index
    %c0_55 = arith.constant 0 : index
    %91 = vector.load %arg4[%c0_54, %c0_55] : memref<96x32xf32, #tpu.memory_space<vmem>>, vector<96x32xf32>
    %92 = vector.extract_strided_slice %6 {offsets = [0, 7, 0], sizes = [2, 1, 32], strides = [1, 1, 1]} : vector<2x8x32xf32> to vector<2x1x32xf32>
    %93 = vector.shape_cast %92 : vector<2x1x32xf32> to vector<2x32xf32>
    "tpu.trace_start"() <{level = 10 : i32, message = "gk,bk->gb"}> : () -> ()
    %cst_56 = arith.constant dense<0.000000e+00> : vector<96x2xf32>
    %94 = tpu.matmul %91, %93, %cst_56 {dimension_numbers = #tpu.dot_dimension_numbers<[1], [1], [0], [0], [0, 0, 1, 0], [], []>} : vector<96x32xf32>, vector<2x32xf32>, vector<96x2xf32> -> vector<96x2xf32>
    "tpu.trace_stop"() : () -> ()
    %c0_57 = arith.constant 0 : index
    %c0_58 = arith.constant 0 : index
    %95 = vector.load %arg5[%c0_57, %c0_58] : memref<96x1xf32, #tpu.memory_space<vmem>>, vector<96x1xf32>
    %96 = vector.broadcast %95 : vector<96x1xf32> to vector<96x2xf32>
    %97 = arith.addf %94, %96 : vector<96x2xf32>
    %c7_i32 = arith.constant 7 : i32
    %98 = arith.addi %1, %c7_i32 : i32
    %99 = arith.index_cast %98 : i32 to index
    %c0_59 = arith.constant 0 : index
    %c0_60 = arith.constant 0 : index
    %100 = vector.load %arg9[%99, %c0_59, %c0_60] : memref<8x96x2xf32, #tpu.memory_space<vmem>>, vector<1x96x2xf32>
    %101 = vector.shape_cast %100 : vector<1x96x2xf32> to vector<96x2xf32>
    %102 = vector.shape_cast %97 : vector<96x2xf32> to vector<1x96x2xf32>
    tpu.vector_store %arg9[%99, %c0_59, %c0_60], %102 {strides = array<i32>} : memref<8x96x2xf32, #tpu.memory_space<vmem>>, vector<1x96x2xf32>,
    %c1_i32_61 = arith.constant 1 : i32
    %cst_62 = arith.constant 0.000000e+00 : f32
    %103 = vector.broadcast %cst_62 : f32 to vector<32x2xf32>
    %c0_i32_63 = arith.constant 0 : i32
    %c2_i32_64 = arith.constant 2 : i32
    %104 = arith.addi %c0_i32_63, %c2_i32_64 : i32
    %c1_i32_65 = arith.constant 1 : i32
    %105 = scf.for %arg10 = %c0_i32_63 to %104 step %c1_i32_65 iter_args(%arg11 = %103) -> (vector<32x2xf32>)  : i32 {
      %c4_i32_67 = arith.constant 4 : i32
      %106 = arith.muli %arg10, %c4_i32_67 : i32
      %107 = tpu.assume_multiple %106, 4 : i32
      %c0_i32_68 = arith.constant 0 : i32
      %108 = arith.addi %107, %c0_i32_68 : i32
      %109 = arith.index_cast %108 : i32 to index
      %c0_69 = arith.constant 0 : index
      %c0_70 = arith.constant 0 : index
      %110 = vector.load %arg9[%109, %c0_69, %c0_70] : memref<8x96x2xf32, #tpu.memory_space<vmem>>, vector<1x96x2xf32>
      %111 = vector.shape_cast %110 : vector<1x96x2xf32> to vector<96x2xf32>
      %c0_71 = arith.constant 0 : index
      %c0_72 = arith.constant 0 : index
      %112 = vector.load %arg6[%c0_71, %c0_72] : memref<96x32xf32, #tpu.memory_space<vmem>>, vector<96x32xf32>
      %cst_73 = arith.constant dense<0.000000e+00> : vector<96x2xf32>
      %113 = tpu.matmul %112, %arg11, %cst_73 {dimension_numbers = #tpu.dot_dimension_numbers<[1], [0], [0], [1], [0, 0, 1, 1], [], []>} : vector<96x32xf32>, vector<32x2xf32>, vector<96x2xf32> -> vector<96x2xf32>
      %c0_74 = arith.constant 0 : index
      %c0_75 = arith.constant 0 : index
      %114 = vector.load %arg7[%c0_74, %c0_75] : memref<96x1xf32, #tpu.memory_space<vmem>>, vector<96x1xf32>
      %115 = vector.broadcast %114 : vector<96x1xf32> to vector<96x2xf32>
      %116 = arith.addf %113, %115 : vector<96x2xf32>
      %117 = vector.extract_strided_slice %111 {offsets = [0, 0], sizes = [32, 2], strides = [1, 1]} : vector<96x2xf32> to vector<32x2xf32>
      %118 = vector.extract_strided_slice %116 {offsets = [0, 0], sizes = [32, 2], strides = [1, 1]} : vector<96x2xf32> to vector<32x2xf32>
      %119 = arith.addf %117, %118 : vector<32x2xf32>
      %120 = arith.negf %119 : vector<32x2xf32>
      %121 = math.exp %120 : vector<32x2xf32>
      %cst_76 = arith.constant 1.000000e+00 : f32
      %122 = vector.broadcast %cst_76 : f32 to vector<32x2xf32>
      %123 = arith.addf %122, %121 : vector<32x2xf32>
      %124 = arith.divf %122, %123 : vector<32x2xf32>
      %125 = vector.extract_strided_slice %111 {offsets = [32, 0], sizes = [32, 2], strides = [1, 1]} : vector<96x2xf32> to vector<32x2xf32>
      %126 = vector.extract_strided_slice %116 {offsets = [32, 0], sizes = [32, 2], strides = [1, 1]} : vector<96x2xf32> to vector<32x2xf32>
      %127 = arith.addf %125, %126 : vector<32x2xf32>
      %128 = arith.negf %127 : vector<32x2xf32>
      %129 = math.exp %128 : vector<32x2xf32>
      %cst_77 = arith.constant 1.000000e+00 : f32
      %130 = vector.broadcast %cst_77 : f32 to vector<32x2xf32>
      %131 = arith.addf %130, %129 : vector<32x2xf32>
      %132 = arith.divf %130, %131 : vector<32x2xf32>
      %133 = vector.extract_strided_slice %111 {offsets = [64, 0], sizes = [32, 2], strides = [1, 1]} : vector<96x2xf32> to vector<32x2xf32>
      %134 = vector.extract_strided_slice %116 {offsets = [64, 0], sizes = [32, 2], strides = [1, 1]} : vector<96x2xf32> to vector<32x2xf32>
      %135 = arith.mulf %124, %134 : vector<32x2xf32>
      %136 = arith.addf %133, %135 : vector<32x2xf32>
      %137 = math.tanh %136 : vector<32x2xf32>
      %cst_78 = arith.constant 1.000000e+00 : f32
      %138 = vector.broadcast %cst_78 : f32 to vector<32x2xf32>
      %139 = arith.subf %138, %132 : vector<32x2xf32>
      %140 = arith.mulf %139, %137 : vector<32x2xf32>
      %141 = arith.mulf %132, %arg11 : vector<32x2xf32>
      %142 = arith.addf %140, %141 : vector<32x2xf32>
      %c0_79 = arith.constant 0 : index
      %c0_80 = arith.constant 0 : index
      %143 = vector.load %arg1[%c0_79, %c0_80] : memref<1x2xi32, #tpu.memory_space<vmem>>, vector<1x2xi32>
      %144 = vector.broadcast %108 : i32 to vector<1x2xi32>
      %145 = arith.cmpi slt, %144, %143 : vector<1x2xi32>
      %cst_81 = arith.constant 0.000000e+00 : f32
      %146 = vector.shape_cast %145 : vector<1x2xi1> to vector<1x2xi1>
      %147 = vector.broadcast %146 : vector<1x2xi1> to vector<32x2xi1>
      %148 = vector.broadcast %cst_81 : f32 to vector<32x2xf32>
      %149 = arith.select %147, %142, %148 : vector<32x2xi1>, vector<32x2xf32>
      %150 = arith.index_cast %108 : i32 to index
      %c0_82 = arith.constant 0 : index
      %c0_83 = arith.constant 0 : index
      %151 = vector.load %arg8[%150, %c0_82, %c0_83] : memref<8x32x2xf32, #tpu.memory_space<vmem>>, vector<1x32x2xf32>
      %152 = vector.shape_cast %151 : vector<1x32x2xf32> to vector<32x2xf32>
      %153 = vector.shape_cast %149 : vector<32x2xf32> to vector<1x32x2xf32>
      tpu.vector_store %arg8[%150, %c0_82, %c0_83], %153 {strides = array<i32>} : memref<8x32x2xf32, #tpu.memory_space<vmem>>, vector<1x32x2xf32>,
      %c1_i32_84 = arith.constant 1 : i32
      %154 = arith.addi %107, %c1_i32_84 : i32
      %155 = arith.index_cast %154 : i32 to index
      %c0_85 = arith.constant 0 : index
      %c0_86 = arith.constant 0 : index
      %156 = vector.load %arg9[%155, %c0_85, %c0_86] : memref<8x96x2xf32, #tpu.memory_space<vmem>>, vector<1x96x2xf32>
      %157 = vector.shape_cast %156 : vector<1x96x2xf32> to vector<96x2xf32>
      %c0_87 = arith.constant 0 : index
      %c0_88 = arith.constant 0 : index
      %158 = vector.load %arg6[%c0_87, %c0_88] : memref<96x32xf32, #tpu.memory_space<vmem>>, vector<96x32xf32>
      %cst_89 = arith.constant dense<0.000000e+00> : vector<96x2xf32>
      %159 = tpu.matmul %158, %142, %cst_89 {dimension_numbers = #tpu.dot_dimension_numbers<[1], [0], [0], [1], [0, 0, 1, 1], [], []>} : vector<96x32xf32>, vector<32x2xf32>, vector<96x2xf32> -> vector<96x2xf32>
      %c0_90 = arith.constant 0 : index
      %c0_91 = arith.constant 0 : index
      %160 = vector.load %arg7[%c0_90, %c0_91] : memref<96x1xf32, #tpu.memory_space<vmem>>, vector<96x1xf32>
      %161 = vector.broadcast %160 : vector<96x1xf32> to vector<96x2xf32>
      %162 = arith.addf %159, %161 : vector<96x2xf32>
      %163 = vector.extract_strided_slice %157 {offsets = [0, 0], sizes = [32, 2], strides = [1, 1]} : vector<96x2xf32> to vector<32x2xf32>
      %164 = vector.extract_strided_slice %162 {offsets = [0, 0], sizes = [32, 2], strides = [1, 1]} : vector<96x2xf32> to vector<32x2xf32>
      %165 = arith.addf %163, %164 : vector<32x2xf32>
      %166 = arith.negf %165 : vector<32x2xf32>
      %167 = math.exp %166 : vector<32x2xf32>
      %cst_92 = arith.constant 1.000000e+00 : f32
      %168 = vector.broadcast %cst_92 : f32 to vector<32x2xf32>
      %169 = arith.addf %168, %167 : vector<32x2xf32>
      %170 = arith.divf %168, %169 : vector<32x2xf32>
      %171 = vector.extract_strided_slice %157 {offsets = [32, 0], sizes = [32, 2], strides = [1, 1]} : vector<96x2xf32> to vector<32x2xf32>
      %172 = vector.extract_strided_slice %162 {offsets = [32, 0], sizes = [32, 2], strides = [1, 1]} : vector<96x2xf32> to vector<32x2xf32>
      %173 = arith.addf %171, %172 : vector<32x2xf32>
      %174 = arith.negf %173 : vector<32x2xf32>
      %175 = math.exp %174 : vector<32x2xf32>
      %cst_93 = arith.constant 1.000000e+00 : f32
      %176 = vector.broadcast %cst_93 : f32 to vector<32x2xf32>
      %177 = arith.addf %176, %175 : vector<32x2xf32>
      %178 = arith.divf %176, %177 : vector<32x2xf32>
      %179 = vector.extract_strided_slice %157 {offsets = [64, 0], sizes = [32, 2], strides = [1, 1]} : vector<96x2xf32> to vector<32x2xf32>
      %180 = vector.extract_strided_slice %162 {offsets = [64, 0], sizes = [32, 2], strides = [1, 1]} : vector<96x2xf32> to vector<32x2xf32>
      %181 = arith.mulf %170, %180 : vector<32x2xf32>
      %182 = arith.addf %179, %181 : vector<32x2xf32>
      %183 = math.tanh %182 : vector<32x2xf32>
      %cst_94 = arith.constant 1.000000e+00 : f32
      %184 = vector.broadcast %cst_94 : f32 to vector<32x2xf32>
      %185 = arith.subf %184, %178 : vector<32x2xf32>
      %186 = arith.mulf %185, %183 : vector<32x2xf32>
      %187 = arith.mulf %178, %142 : vector<32x2xf32>
      %188 = arith.addf %186, %187 : vector<32x2xf32>
      %c0_95 = arith.constant 0 : index
      %c0_96 = arith.constant 0 : index
      %189 = vector.load %arg1[%c0_95, %c0_96] : memref<1x2xi32, #tpu.memory_space<vmem>>, vector<1x2xi32>
      %190 = vector.broadcast %154 : i32 to vector<1x2xi32>
      %191 = arith.cmpi slt, %190, %189 : vector<1x2xi32>
      %cst_97 = arith.constant 0.000000e+00 : f32
      %192 = vector.shape_cast %191 : vector<1x2xi1> to vector<1x2xi1>
      %193 = vector.broadcast %192 : vector<1x2xi1> to vector<32x2xi1>
      %194 = vector.broadcast %cst_97 : f32 to vector<32x2xf32>
      %195 = arith.select %193, %188, %194 : vector<32x2xi1>, vector<32x2xf32>
      %196 = arith.index_cast %154 : i32 to index
      %c0_98 = arith.constant 0 : index
      %c0_99 = arith.constant 0 : index
      %197 = vector.load %arg8[%196, %c0_98, %c0_99] : memref<8x32x2xf32, #tpu.memory_space<vmem>>, vector<1x32x2xf32>
      %198 = vector.shape_cast %197 : vector<1x32x2xf32> to vector<32x2xf32>
      %199 = vector.shape_cast %195 : vector<32x2xf32> to vector<1x32x2xf32>
      tpu.vector_store %arg8[%196, %c0_98, %c0_99], %199 {strides = array<i32>} : memref<8x32x2xf32, #tpu.memory_space<vmem>>, vector<1x32x2xf32>,
      %c2_i32_100 = arith.constant 2 : i32
      %200 = arith.addi %107, %c2_i32_100 : i32
      %201 = arith.index_cast %200 : i32 to index
      %c0_101 = arith.constant 0 : index
      %c0_102 = arith.constant 0 : index
      %202 = vector.load %arg9[%201, %c0_101, %c0_102] : memref<8x96x2xf32, #tpu.memory_space<vmem>>, vector<1x96x2xf32>
      %203 = vector.shape_cast %202 : vector<1x96x2xf32> to vector<96x2xf32>
      %c0_103 = arith.constant 0 : index
      %c0_104 = arith.constant 0 : index
      %204 = vector.load %arg6[%c0_103, %c0_104] : memref<96x32xf32, #tpu.memory_space<vmem>>, vector<96x32xf32>
      %cst_105 = arith.constant dense<0.000000e+00> : vector<96x2xf32>
      %205 = tpu.matmul %204, %188, %cst_105 {dimension_numbers = #tpu.dot_dimension_numbers<[1], [0], [0], [1], [0, 0, 1, 1], [], []>} : vector<96x32xf32>, vector<32x2xf32>, vector<96x2xf32> -> vector<96x2xf32>
      %c0_106 = arith.constant 0 : index
      %c0_107 = arith.constant 0 : index
      %206 = vector.load %arg7[%c0_106, %c0_107] : memref<96x1xf32, #tpu.memory_space<vmem>>, vector<96x1xf32>
      %207 = vector.broadcast %206 : vector<96x1xf32> to vector<96x2xf32>
      %208 = arith.addf %205, %207 : vector<96x2xf32>
      %209 = vector.extract_strided_slice %203 {offsets = [0, 0], sizes = [32, 2], strides = [1, 1]} : vector<96x2xf32> to vector<32x2xf32>
      %210 = vector.extract_strided_slice %208 {offsets = [0, 0], sizes = [32, 2], strides = [1, 1]} : vector<96x2xf32> to vector<32x2xf32>
      %211 = arith.addf %209, %210 : vector<32x2xf32>
      %212 = arith.negf %211 : vector<32x2xf32>
      %213 = math.exp %212 : vector<32x2xf32>
      %cst_108 = arith.constant 1.000000e+00 : f32
      %214 = vector.broadcast %cst_108 : f32 to vector<32x2xf32>
      %215 = arith.addf %214, %213 : vector<32x2xf32>
      %216 = arith.divf %214, %215 : vector<32x2xf32>
      %217 = vector.extract_strided_slice %203 {offsets = [32, 0], sizes = [32, 2], strides = [1, 1]} : vector<96x2xf32> to vector<32x2xf32>
      %218 = vector.extract_strided_slice %208 {offsets = [32, 0], sizes = [32, 2], strides = [1, 1]} : vector<96x2xf32> to vector<32x2xf32>
      %219 = arith.addf %217, %218 : vector<32x2xf32>
      %220 = arith.negf %219 : vector<32x2xf32>
      %221 = math.exp %220 : vector<32x2xf32>
      %cst_109 = arith.constant 1.000000e+00 : f32
      %222 = vector.broadcast %cst_109 : f32 to vector<32x2xf32>
      %223 = arith.addf %222, %221 : vector<32x2xf32>
      %224 = arith.divf %222, %223 : vector<32x2xf32>
      %225 = vector.extract_strided_slice %203 {offsets = [64, 0], sizes = [32, 2], strides = [1, 1]} : vector<96x2xf32> to vector<32x2xf32>
      %226 = vector.extract_strided_slice %208 {offsets = [64, 0], sizes = [32, 2], strides = [1, 1]} : vector<96x2xf32> to vector<32x2xf32>
      %227 = arith.mulf %216, %226 : vector<32x2xf32>
      %228 = arith.addf %225, %227 : vector<32x2xf32>
      %229 = math.tanh %228 : vector<32x2xf32>
      %cst_110 = arith.constant 1.000000e+00 : f32
      %230 = vector.broadcast %cst_110 : f32 to vector<32x2xf32>
      %231 = arith.subf %230, %224 : vector<32x2xf32>
      %232 = arith.mulf %231, %229 : vector<32x2xf32>
      %233 = arith.mulf %224, %188 : vector<32x2xf32>
      %234 = arith.addf %232, %233 : vector<32x2xf32>
      %c0_111 = arith.constant 0 : index
      %c0_112 = arith.constant 0 : index
      %235 = vector.load %arg1[%c0_111, %c0_112] : memref<1x2xi32, #tpu.memory_space<vmem>>, vector<1x2xi32>
      %236 = vector.broadcast %200 : i32 to vector<1x2xi32>
      %237 = arith.cmpi slt, %236, %235 : vector<1x2xi32>
      %cst_113 = arith.constant 0.000000e+00 : f32
      %238 = vector.shape_cast %237 : vector<1x2xi1> to vector<1x2xi1>
      %239 = vector.broadcast %238 : vector<1x2xi1> to vector<32x2xi1>
      %240 = vector.broadcast %cst_113 : f32 to vector<32x2xf32>
      %241 = arith.select %239, %234, %240 : vector<32x2xi1>, vector<32x2xf32>
      %242 = arith.index_cast %200 : i32 to index
      %c0_114 = arith.constant 0 : index
      %c0_115 = arith.constant 0 : index
      %243 = vector.load %arg8[%242, %c0_114, %c0_115] : memref<8x32x2xf32, #tpu.memory_space<vmem>>, vector<1x32x2xf32>
      %244 = vector.shape_cast %243 : vector<1x32x2xf32> to vector<32x2xf32>
      %245 = vector.shape_cast %241 : vector<32x2xf32> to vector<1x32x2xf32>
      tpu.vector_store %arg8[%242, %c0_114, %c0_115], %245 {strides = array<i32>} : memref<8x32x2xf32, #tpu.memory_space<vmem>>, vector<1x32x2xf32>,
      %c3_i32_116 = arith.constant 3 : i32
      %246 = arith.addi %107, %c3_i32_116 : i32
      %247 = arith.index_cast %246 : i32 to index
      %c0_117 = arith.constant 0 : index
      %c0_118 = arith.constant 0 : index
      %248 = vector.load %arg9[%247, %c0_117, %c0_118] : memref<8x96x2xf32, #tpu.memory_space<vmem>>, vector<1x96x2xf32>
      %249 = vector.shape_cast %248 : vector<1x96x2xf32> to vector<96x2xf32>
      %c0_119 = arith.constant 0 : index
      %c0_120 = arith.constant 0 : index
      %250 = vector.load %arg6[%c0_119, %c0_120] : memref<96x32xf32, #tpu.memory_space<vmem>>, vector<96x32xf32>
      %cst_121 = arith.constant dense<0.000000e+00> : vector<96x2xf32>
      %251 = tpu.matmul %250, %234, %cst_121 {dimension_numbers = #tpu.dot_dimension_numbers<[1], [0], [0], [1], [0, 0, 1, 1], [], []>} : vector<96x32xf32>, vector<32x2xf32>, vector<96x2xf32> -> vector<96x2xf32>
      %c0_122 = arith.constant 0 : index
      %c0_123 = arith.constant 0 : index
      %252 = vector.load %arg7[%c0_122, %c0_123] : memref<96x1xf32, #tpu.memory_space<vmem>>, vector<96x1xf32>
      %253 = vector.broadcast %252 : vector<96x1xf32> to vector<96x2xf32>
      %254 = arith.addf %251, %253 : vector<96x2xf32>
      %255 = vector.extract_strided_slice %249 {offsets = [0, 0], sizes = [32, 2], strides = [1, 1]} : vector<96x2xf32> to vector<32x2xf32>
      %256 = vector.extract_strided_slice %254 {offsets = [0, 0], sizes = [32, 2], strides = [1, 1]} : vector<96x2xf32> to vector<32x2xf32>
      %257 = arith.addf %255, %256 : vector<32x2xf32>
      %258 = arith.negf %257 : vector<32x2xf32>
      %259 = math.exp %258 : vector<32x2xf32>
      %cst_124 = arith.constant 1.000000e+00 : f32
      %260 = vector.broadcast %cst_124 : f32 to vector<32x2xf32>
      %261 = arith.addf %260, %259 : vector<32x2xf32>
      %262 = arith.divf %260, %261 : vector<32x2xf32>
      %263 = vector.extract_strided_slice %249 {offsets = [32, 0], sizes = [32, 2], strides = [1, 1]} : vector<96x2xf32> to vector<32x2xf32>
      %264 = vector.extract_strided_slice %254 {offsets = [32, 0], sizes = [32, 2], strides = [1, 1]} : vector<96x2xf32> to vector<32x2xf32>
      %265 = arith.addf %263, %264 : vector<32x2xf32>
      %266 = arith.negf %265 : vector<32x2xf32>
      %267 = math.exp %266 : vector<32x2xf32>
      %cst_125 = arith.constant 1.000000e+00 : f32
      %268 = vector.broadcast %cst_125 : f32 to vector<32x2xf32>
      %269 = arith.addf %268, %267 : vector<32x2xf32>
      %270 = arith.divf %268, %269 : vector<32x2xf32>
      %271 = vector.extract_strided_slice %249 {offsets = [64, 0], sizes = [32, 2], strides = [1, 1]} : vector<96x2xf32> to vector<32x2xf32>
      %272 = vector.extract_strided_slice %254 {offsets = [64, 0], sizes = [32, 2], strides = [1, 1]} : vector<96x2xf32> to vector<32x2xf32>
      %273 = arith.mulf %262, %272 : vector<32x2xf32>
      %274 = arith.addf %271, %273 : vector<32x2xf32>
      %275 = math.tanh %274 : vector<32x2xf32>
      %cst_126 = arith.constant 1.000000e+00 : f32
      %276 = vector.broadcast %cst_126 : f32 to vector<32x2xf32>
      %277 = arith.subf %276, %270 : vector<32x2xf32>
      %278 = arith.mulf %277, %275 : vector<32x2xf32>
      %279 = arith.mulf %270, %234 : vector<32x2xf32>
      %280 = arith.addf %278, %279 : vector<32x2xf32>
      %c0_127 = arith.constant 0 : index
      %c0_128 = arith.constant 0 : index
      %281 = vector.load %arg1[%c0_127, %c0_128] : memref<1x2xi32, #tpu.memory_space<vmem>>, vector<1x2xi32>
      %282 = vector.broadcast %246 : i32 to vector<1x2xi32>
      %283 = arith.cmpi slt, %282, %281 : vector<1x2xi32>
      %cst_129 = arith.constant 0.000000e+00 : f32
      %284 = vector.shape_cast %283 : vector<1x2xi1> to vector<1x2xi1>
      %285 = vector.broadcast %284 : vector<1x2xi1> to vector<32x2xi1>
      %286 = vector.broadcast %cst_129 : f32 to vector<32x2xf32>
      %287 = arith.select %285, %280, %286 : vector<32x2xi1>, vector<32x2xf32>
      %288 = arith.index_cast %246 : i32 to index
      %c0_130 = arith.constant 0 : index
      %c0_131 = arith.constant 0 : index
      %289 = vector.load %arg8[%288, %c0_130, %c0_131] : memref<8x32x2xf32, #tpu.memory_space<vmem>>, vector<1x32x2xf32>
      %290 = vector.shape_cast %289 : vector<1x32x2xf32> to vector<32x2xf32>
      %291 = vector.shape_cast %287 : vector<32x2xf32> to vector<1x32x2xf32>
      tpu.vector_store %arg8[%288, %c0_130, %c0_131], %291 {strides = array<i32>} : memref<8x32x2xf32, #tpu.memory_space<vmem>>, vector<1x32x2xf32>,
      scf.yield %280 : vector<32x2xf32>
    }
    %c2_i32_66 = arith.constant 2 : i32
    return
  }
  func.func @transform_0(%arg0: i32) -> (i32, i32) {
    %c0_i32 = arith.constant 0 : i32
    %c0_i32_0 = arith.constant 0 : i32
    return %c0_i32, %arg0 : i32, i32
  }
  func.func @transform_1(%arg0: i32) -> (i32, i32, i32) {
    %c0_i32 = arith.constant 0 : i32
    %c0_i32_0 = arith.constant 0 : i32
    %c0_i32_1 = arith.constant 0 : i32
    return %arg0, %c0_i32, %c0_i32_0 : i32, i32, i32
  }
  func.func @transform_2(%arg0: i32) -> (i32, i32, i32) {
    %c0_i32 = arith.constant 0 : i32
    %c0_i32_0 = arith.constant 0 : i32
    %c0_i32_1 = arith.constant 0 : i32
    return %arg0, %c0_i32, %c0_i32_0 : i32, i32, i32
  }
  func.func @transform_3(%arg0: i32) -> (i32, i32) {
    %c0_i32 = arith.constant 0 : i32
    %c0_i32_0 = arith.constant 0 : i32
    %c0_i32_1 = arith.constant 0 : i32
    return %c0_i32, %c0_i32_0 : i32, i32
  }
  func.func @transform_4(%arg0: i32) -> (i32, i32) {
    %c0_i32 = arith.constant 0 : i32
    %c0_i32_0 = arith.constant 0 : i32
    %c0_i32_1 = arith.constant 0 : i32
    return %c0_i32, %c0_i32_0 : i32, i32
  }
  func.func @transform_5(%arg0: i32) -> (i32, i32) {
    %c0_i32 = arith.constant 0 : i32
    %c0_i32_0 = arith.constant 0 : i32
    %c0_i32_1 = arith.constant 0 : i32
    return %c0_i32, %c0_i32_0 : i32, i32
  }
  func.func @transform_6(%arg0: i32) -> (i32, i32) {
    %c0_i32 = arith.constant 0 : i32
    %c0_i32_0 = arith.constant 0 : i32
    %c0_i32_1 = arith.constant 0 : i32
    return %c0_i32, %c0_i32_0 : i32, i32
  }
  func.func @transform_7(%arg0: i32) -> (i32, i32, i32) {
    %c0_i32 = arith.constant 0 : i32
    %c0_i32_0 = arith.constant 0 : i32
    %c0_i32_1 = arith.constant 0 : i32
    return %c0_i32, %c0_i32_0, %arg0 : i32, i32, i32
  }
}

</mosaic_0001>

<bundles_post_ra>
// kernel: tpu_custom_call.1
= control target key start
LH: loop header
LB: loop body
LE: loop exit
PB: predicated region body
PF: predicated region fallthrough
CT: control target
= control target key end

     0   :  { %v4838_v0 = vmov 0.0|0.0   ;;  %vm4839_vm0 = vmmov 0   ;;  %v4840_v8 = vmov 0.0   ;;  %v4841_v12 = vmov 0   ;;  %s6235_s0 = inlined_call_operand.vmem [shape: s32[1,2], index: 0, kind: input, shape index: {}]   ;;  %s6236_s5 = inlined_call_operand.vmem [shape: f32[96,32], index: 5, kind: input, shape index: {}]   ;;  %s6237_s6 = inlined_call_operand.vmem [shape: f32[96,1], index: 6, kind: input, shape index: {}]   ;;  %s6238_s7 = inlined_call_operand.vmem [shape: f32[8,32,2], index: 7, kind: output, shape index: {}]   ;;  %s6239_s2 = inlined_call_operand.vmem [shape: f32[2,32,32], index: 2, kind: input, shape index: {}]   ;;  %s6240_s4 = inlined_call_operand.vmem [shape: f32[96,1], index: 4, kind: input, shape index: {}]   ;;  %s6241_s1 = inlined_call_operand.vmem [shape: f32[2,8,32], index: 1, kind: input, shape index: {}]   ;;  %s6242_s3 = inlined_call_operand.vmem [shape: f32[96,32], index: 3, kind: input, shape index: {}]  }
   0x1   :  { %4541 = vmatprep.subr.bf16.mxu0 %v4838_v0  ;;  %4547 = vmatprep.subr.bf16.mxu1 %v4838_v0  ;;  %v28_v1 = vld [vmem:[%s6239_s2] sm:$0xff]  ;;  %v29_v2 = vld [vmem:[%s6239_s2 + $0x8] sm:$0xff]  ;;  %v30_v6 = vld [vmem:[%s6239_s2 + $0x10] sm:$0xff]  ;;  %vm36_vm1 = vcmask 261120   ;;  %vm272_vm2 = vcmask 1041409   ;;  %vm439_vm3 = vcmask 15360  }
   0x2   :  { %v32_v3 = vld [vmem:[%s6239_s2 + $0x20] sm:$0xff]  ;;  %v4542_v4 = vpack.c.bf16 %v29_v2, %v28_v1  ;;  %v33_v5 = vld [vmem:[%s6239_s2 + $0x28] sm:$0xff]  ;;  %v31_v7 = vld [vmem:[%s6239_s2 + $0x18] sm:$0xff]  ;;  %4263 = vmatprep.mubr.msk.f32.mxu0 %vm4839_vm0, %v4840_v8  ;;  %4274 = vmatprep.mubr.msk.f32.mxu1 %vm4839_vm0, %v4840_v8 }
   0x3   :  { %v4548_v9 = vpack.c.bf16 %v33_v5, %v32_v3  ;;  %v34_v10 = vld [vmem:[%s6239_s2 + $0x30] sm:$0xff]  ;;  %v35_v11 = vld [vmem:[%s6239_s2 + $0x38] sm:$0xff]  ;;  %4631 = vset.pattern.permute.xlu1 %v4841_v12  ;;  %4630 = vset.pattern.permute.xlu0 %v4841_v12  ;;  %v4545_v13 = vpack.c.bf16 %v31_v7, %v30_v6  ;;  %v4915_v15 = vld [vmem:[%s6240_s4] sm:$0xff] }
   0x4   :  { %4543 = vmatpush3.bf16.msra.mxu0 %v4542_v4  ;;  %v4910_v14 = vld [vmem:[%s6240_s4 + $0x10] sm:$0xff]  ;;  %v4551_v16 = vpack.c.bf16 %v35_v11, %v34_v10  ;;  %211 = vperm.xlu0 %4630, %v4915_v15   ;;  %v4922_v17 = vld [vmem:[%s6240_s4 + $0x18] sm:$0xff]  ;;  %v26_v18 = vld [vmem:[%s6241_s1] sm:$0xff] }
   0x5   :  { %4549 = vmatpush3.bf16.msra.mxu1 %v4548_v9  ;;  %4544 = vmatprep.subr.bf16.mxu0 %v4838_v0  ;;  %v4930_v19 = vld [vmem:[%s6240_s4 + $0x8] sm:$0xff]  ;;  %v4947_v22 = vld [vmem:[%s6240_s4 + $0x20] sm:$0xff]  ;;  %v4954_v23 = vld [vmem:[%s6240_s4 + $0x38] sm:$0xff] }
   0x6   :  { %4550 = vmatprep.subr.bf16.mxu1 %v4838_v0  ;;  %221 = vperm.xlu1 %4631, %v4910_v14   ;;  %v27_v20 = vld [vmem:[%s6241_s1 + $0x8] sm:$0xff]  ;;  %v4959_v24 = vld [vmem:[%s6240_s4 + $0x30] sm:$0xff]  ;;  %v4971_v26 = vld [vmem:[%s6240_s4 + $0x40] sm:$0xff] }
   0x7   :  { %v4941_v21 = vld [vmem:[%s6240_s4 + $0x28] sm:$0xff]  ;;  %v4978_v27 = vld [vmem:[%s6240_s4 + $0x58] sm:$0xff]  ;;  %v4983_v28 = vld [vmem:[%s6240_s4 + $0x50] sm:$0xff] }
   0x8   :  { %4546 = vmatpush3.bf16.msra.mxu0 %v4545_v13  ;;  %216 = vperm.xlu0 %4630, %v4930_v19   ;;  %v4966_v25 = vld [vmem:[%s6240_s4 + $0x48] sm:$0xff]  ;;  %v5032_v29 = vld [vmem:[%s6242_s3] sm:$0xff]  ;;  %v5114_v61 = vld [vmem:[%s6242_s3 + $0x10] sm:$0xff] }
   0x9   :  { %4552 = vmatpush3.bf16.msra.mxu1 %v4551_v16  ;;  %v5093_v52 = vld [vmem:[%s6242_s3 + $0x8] sm:$0xff]  ;;  %v5124_v62 = vld [vmem:[%s6242_s3 + $0x18] sm:$0xff]  ;;  %v5133_v63 = vld [vmem:[%s6242_s3 + $0x20] sm:$0xff] }
   0xa   :  { %226 = vperm.xlu1 %4631, %v4922_v17   ;;  %v5152_v2 = vld [vmem:[%s6242_s3 + $0x28] sm:$0xff]  ;;  %v5157_v3 = vld [vmem:[%s6242_s3 + $0x30] sm:$0xff]  ;;  %v5170_v4 = vld [vmem:[%s6242_s3 + $0x38] sm:$0xff] }
   0xb   :  { %4264 = vmatmul.mubr.msk.f32.vlgmr.msra.gmra.mrb[0].mxu0 %vm36_vm1, %v26_v18  ;;  %v5179_v7 = vld [vmem:[%s6242_s3 + $0x40] sm:$0xff]  ;;  %v5192_v8 = vld [vmem:[%s6242_s3 + $0x48] sm:$0xff]  ;;  %v5197_v9 = vld [vmem:[%s6242_s3 + $0x50] sm:$0xff] }
   0xc   :  { %4275 = vmatmul.mubr.msk.f32.vlgmr.msra.gmra.mrb[0].mxu1 %vm36_vm1, %v27_v20  ;;  %231 = vperm.xlu0 %4630, %v4947_v22   ;;  %v5214_v12 = vld [vmem:[%s6242_s3 + $0x58] sm:$0xff]  ;;  %s5724_s3 = smov 0  }
   0xd   :  { %4279 = vmatprep.mubr.msk.f32.mxu0 %vm36_vm1, %v5032_v29  ;;  %4299 = vmatprep.mubr.msk.f32.mxu1 %vm36_vm1, %v5032_v29 }
   0xe   :  { %236 = vperm.xlu1 %4631, %v4941_v21  }
  0x10   :  { %241 = vperm.xlu0 %4630, %v4959_v24  }
  0x12   :  { %246 = vperm.xlu1 %4631, %v4954_v23  }
  0x14   :  { %251 = vperm.xlu0 %4630, %v4971_v26  }
  0x16   :  { %256 = vperm.xlu1 %4631, %v4966_v25  }
  0x18   :  { %261 = vperm.xlu0 %4630, %v4983_v28  }
  0x1a   :  { %266 = vperm.xlu1 %4631, %v4978_v27  }
  0x1c   :  { %478 = vperm.xlu0 %4630, %v4915_v15  }
  0x1e   :  { %483 = vperm.xlu1 %4631, %v4930_v19  }
  0x20   :  { %488 = vperm.xlu0 %4630, %v4910_v14  }
  0x22   :  { %493 = vperm.xlu1 %4631, %v4922_v17  }
  0x24   :  { %498 = vperm.xlu0 %4630, %v4947_v22  }
  0x26   :  { %503 = vperm.xlu1 %4631, %v4941_v21  }
  0x28   :  { %508 = vperm.xlu0 %4630, %v4959_v24  }
  0x2a   :  { %513 = vperm.xlu1 %4631, %v4954_v23  }
  0x2c   :  { %518 = vperm.xlu0 %4630, %v4971_v26  }
  0x2e   :  { %523 = vperm.xlu1 %4631, %v4966_v25  }
  0x30   :  { %528 = vperm.xlu0 %4630, %v4983_v28  }
  0x32   :  { %533 = vperm.xlu1 %4631, %v4978_v27  }
  0x34   :  { %742 = vperm.xlu0 %4630, %v4915_v15  }
  0x36   :  { %747 = vperm.xlu1 %4631, %v4930_v19  }
  0x38   :  { %752 = vperm.xlu0 %4630, %v4910_v14  }
  0x3a   :  { %757 = vperm.xlu1 %4631, %v4922_v17  }
  0x3c   :  { %762 = vperm.xlu0 %4630, %v4947_v22  }
  0x3e   :  { %767 = vperm.xlu1 %4631, %v4941_v21  }
  0x40   :  { %772 = vperm.xlu0 %4630, %v4959_v24  }
  0x42   :  { %777 = vperm.xlu1 %4631, %v4954_v23  }
  0x44   :  { %782 = vperm.xlu0 %4630, %v4971_v26  }
  0x46   :  { %787 = vperm.xlu1 %4631, %v4966_v25  }
  0x48   :  { %792 = vperm.xlu0 %4630, %v4983_v28  }
  0x4a   :  { %797 = vperm.xlu1 %4631, %v4978_v27  }
  0x4c   :  { %1007 = vperm.xlu0 %4630, %v4915_v15  }
  0x4e   :  { %1012 = vperm.xlu1 %4631, %v4930_v19  }
  0x50   :  { %1017 = vperm.xlu0 %4630, %v4910_v14  }
  0x52   :  { %1022 = vperm.xlu1 %4631, %v4922_v17  }
  0x54   :  { %1027 = vperm.xlu0 %4630, %v4947_v22  }
  0x56   :  { %1032 = vperm.xlu1 %4631, %v4941_v21  }
  0x58   :  { %1037 = vperm.xlu0 %4630, %v4959_v24  }
  0x5a   :  { %1042 = vperm.xlu1 %4631, %v4954_v23  }
  0x5c   :  { %1047 = vperm.xlu0 %4630, %v4971_v26  }
  0x5e   :  { %1052 = vperm.xlu1 %4631, %v4966_v25  }
  0x60   :  { %1057 = vperm.xlu0 %4630, %v4983_v28  }
  0x62   :  { %1062 = vperm.xlu1 %4631, %v4978_v27  }
  0x64   :  { %1272 = vperm.xlu0 %4630, %v4915_v15  }
  0x66   :  { %1277 = vperm.xlu1 %4631, %v4930_v19  }
  0x68   :  { %1282 = vperm.xlu0 %4630, %v4910_v14  }
  0x6a   :  { %1287 = vperm.xlu1 %4631, %v4922_v17  }
  0x6c   :  { %1292 = vperm.xlu0 %4630, %v4947_v22  }
  0x6e   :  { %1297 = vperm.xlu1 %4631, %v4941_v21  }
  0x70   :  { %1302 = vperm.xlu0 %4630, %v4959_v24  }
  0x72   :  { %1307 = vperm.xlu1 %4631, %v4954_v23  }
  0x74   :  { %1312 = vperm.xlu0 %4630, %v4971_v26  }
  0x76   :  { %1317 = vperm.xlu1 %4631, %v4966_v25  }
  0x78   :  { %1322 = vperm.xlu0 %4630, %v4983_v28  }
  0x7a   :  { %1327 = vperm.xlu1 %4631, %v4978_v27  }
  0x7c   :  { %1537 = vperm.xlu0 %4630, %v4915_v15  }
  0x7e   :  { %1542 = vperm.xlu1 %4631, %v4930_v19  }
  0x80   :  { %1547 = vperm.xlu0 %4630, %v4910_v14  }
  0x82   :  { %1552 = vperm.xlu1 %4631, %v4922_v17  }
  0x83   :  { %v5100_v58 = vpop.permute.xlu0 %211 }
  0x84   :  { %1557 = vperm.xlu0 %4630, %v4947_v22  }
  0x85   :  { %v5098_v57 = vpop.permute.xlu1 %221 }
  0x86   :  { %1562 = vperm.xlu1 %4631, %v4941_v21  }
  0x87   :  { %v5139_v1 = vpop.permute.xlu0 %216 }
  0x88   :  { %1567 = vperm.xlu0 %4630, %v4959_v24  }
  0x89   :  { %v5137_v0 = vpop.permute.xlu1 %226 }
  0x8a   :  { %1572 = vperm.xlu1 %4631, %v4954_v23  }
  0x8b   :  { %v5174_v6 = vpop.permute.xlu0 %231 }
  0x8c   :  { %1577 = vperm.xlu0 %4630, %v4971_v26  }
  0x8d   :  { %v5172_v5 = vpop.permute.xlu1 %236 }
  0x8e   :  { %1582 = vperm.xlu1 %4631, %v4966_v25  }
  0x8f   :  { %v5201_v11 = vpop.permute.xlu0 %241 }
  0x90   :  { %1587 = vperm.xlu0 %4630, %v4983_v28  }
  0x91   :  { %v5199_v10 = vpop.permute.xlu1 %246 }
  0x92   :  { %1592 = vperm.xlu1 %4631, %v4978_v27  }
  0x94   :  { %1802 = vperm.xlu0 %4630, %v4915_v15  }
  0x95   :  { %v5224_v13 = vpop.permute.xlu1 %256 }
  0x96   :  { %1807 = vperm.xlu1 %4631, %v4930_v19  }
  0x98   :  { %1812 = vperm.xlu0 %4630, %v4910_v14  }
  0x9a   :  { %1817 = vperm.xlu1 %4631, %v4922_v17  }
  0x9c   :  { %1822 = vperm.xlu0 %4630, %v4947_v22  }
  0x9e   :  { %1827 = vperm.xlu1 %4631, %v4941_v21  }
  0xa0   :  { %1832 = vperm.xlu0 %4630, %v4959_v24  }
  0xa2   :  { %1837 = vperm.xlu1 %4631, %v4954_v23  }
  0xa4   :  { %1842 = vperm.xlu0 %4630, %v4971_v26  }
  0xa6   :  { %1847 = vperm.xlu1 %4631, %v4966_v25  }
  0xa8   :  { %1852 = vperm.xlu0 %4630, %v4983_v28  }
  0xaa   :  { %1857 = vperm.xlu1 %4631, %v4978_v27  }
  0xac   :  { %2067 = vperm.xlu0 %4630, %v4915_v15   ;;  %v5243_v15 = vpop.permute.xlu1 %266 }
  0xae   :  { %2072 = vperm.xlu1 %4631, %v4930_v19  }
  0xb0   :  { %2077 = vperm.xlu0 %4630, %v4910_v14   ;;  %v5226_v14 = vpop.permute.xlu0 %251 }
  0xb2   :  { %2082 = vperm.xlu1 %4631, %v4922_v17   ;;  %v5263_v17 = vpop.permute.xlu1 %483 }
  0xb4   :  { %2087 = vperm.xlu0 %4630, %v4947_v22   ;;  %v5245_v16 = vpop.permute.xlu0 %261 }
  0xb6   :  { %2092 = vperm.xlu1 %4631, %v4941_v21   ;;  %v5275_v19 = vpop.permute.xlu1 %493 }
  0xb8   :  { %2097 = vperm.xlu0 %4630, %v4959_v24   ;;  %v5265_v18 = vpop.permute.xlu0 %478 }
  0xba   :  { %2102 = vperm.xlu1 %4631, %v4954_v23   ;;  %v5295_v21 = vpop.permute.xlu1 %503 }
  0xbc   :  { %2107 = vperm.xlu0 %4630, %v4971_v26   ;;  %v5277_v20 = vpop.permute.xlu0 %488 }
  0xbe   :  { %2112 = vperm.xlu1 %4631, %v4966_v25   ;;  %v5311_v23 = vpop.permute.xlu1 %513 }
  0xc0   :  { %2117 = vperm.xlu0 %4630, %v4983_v28   ;;  %v5297_v22 = vpop.permute.xlu0 %498 }
  0xc2   :  { %2122 = vperm.xlu1 %4631, %v4978_v27   ;;  %v5331_v25 = vpop.permute.xlu1 %523 }
  0xc4   :  { %v5313_v24 = vpop.permute.xlu0 %508 }
  0xc6   :  { %v5343_v27 = vpop.permute.xlu1 %533 }
  0xc8   :  { %v5333_v26 = vpop.permute.xlu0 %518 }
  0xcc   :  { %v5345_v28 = vpop.permute.xlu0 %528 }
  0xde   :  { %v106_v30 = vpop.f32.mrb[0].mxu0 }
  0xdf   :  { %4632 = vtanh.f32 %v106_v30  ;;  %v179_v31 = vpop.f32.mrb[0].mxu1  ;;  %v4265_v32 = vpop.f32.mrb[1].mxu0 }
  0xe0   :  { %4634 = vtanh.f32 %v179_v31  ;;  %v4276_v33 = vpop.f32.mrb[1].mxu1  ;;  %v5363_v30 = vpop.permute.xlu1 %747 }
  0xe1   :  { %v5365_v31 = vpop.permute.xlu0 %742 }
  0xe4   :  { %v5375_v32 = vpop.permute.xlu1 %757 }
  0xe5   :  { %v5377_v33 = vpop.permute.xlu0 %752 }
  0xe9   :  { %v4633_v34 = vpop.eup %4632 }
  0xea   :  { %v4635_v35 = vpop.eup %4634  ;;  %v536_v36 = vrot.slane %v4633_v34, 1  ;;  %v800_v37 = vrot.slane %v4633_v34, 2  ;;  %v1065_v38 = vrot.slane %v4633_v34, 3  ;;  %v1330_v39 = vrot.slane %v4633_v34, 4 }
  0xeb   :  { %v271_v40 = vrot.slane %v4635_v35, 7  ;;  %v801_v41 = vrot.slane %v4635_v35, 1  ;;  %v1066_v42 = vrot.slane %v4635_v35, 2  ;;  %v1331_v43 = vrot.slane %v4635_v35, 3 }
  0xec   :  { %v537_v44 = vsel %vm272_vm2, %v4635_v35, %v536_v36  ;;  %v1595_v45 = vrot.slane %v4633_v34, 5  ;;  %v1596_v46 = vrot.slane %v4635_v35, 4  ;;  %v1860_v47 = vrot.slane %v4633_v34, 6 }
  0xed   :  { %v273_v48 = vsel %vm272_vm2, %v271_v40, %v4633_v34  ;;  %4297 = vmatprep.subr.msk.mxu1 %vm36_vm1, %v537_v44  ;;  %v802_v49 = vsel %vm272_vm2, %v801_v41, %v800_v37  ;;  %v1067_v50 = vsel %vm272_vm2, %v1066_v42, %v1065_v38  ;;  %v5086_v51 = vsel %vm272_vm2, %v1331_v43, %v1330_v39 }
  0xee   :  { %4277 = vmatprep.subr.msk.mxu0 %vm36_vm1, %v273_v48  ;;  %4298 = vmatpush3.xpose.msk.msra.mxu1 %vm36_vm1, %v537_v44  ;;  %v1597_v53 = vsel %vm272_vm2, %v1596_v46, %v1595_v45  ;;  %v1861_v54 = vrot.slane %v4635_v35, 5  ;;  %v2125_v55 = vrot.slane %v4633_v34, 7  ;;  %v2126_v56 = vrot.slane %v4635_v35, 6  ;;  %v5397_v34 = vpop.permute.xlu0 %762 }
  0xef   :  { %4278 = vmatpush3.xpose.msk.msra.mxu0 %vm36_vm1, %v273_v48  ;;  %4337 = vmatprep.subr.msk.mxu1 %vm36_vm1, %v1067_v50 }
  0xf0   :  { %4317 = vmatprep.subr.msk.mxu0 %vm36_vm1, %v802_v49  ;;  %v5104_v59 = vsel %vm272_vm2, %v1861_v54, %v1860_v47  ;;  %v5107_v60 = vsel %vm272_vm2, %v2126_v56, %v2125_v55 }
  0xf1   :  { %4300 = vmatmul.mubr.msk.f32.vlgmr.msra.gmra.mrb[2].mxu1 %vm36_vm1, %v5093_v52 }
  0xf2   :  { %4280 = vmatmul.mubr.msk.f32.vlgmr.msra.gmra.mrb[2].mxu0 %vm36_vm1, %v5093_v52  ;;  %4338 = vmatpush3.xpose.msk.msra.mxu1 %vm36_vm1, %v1067_v50  ;;  %v5409_v36 = vpop.permute.xlu0 %772 }
  0xf3   :  { %4318 = vmatpush3.xpose.msk.msra.mxu0 %vm36_vm1, %v802_v49  ;;  %4377 = vmatprep.subr.msk.mxu1 %vm36_vm1, %v1597_v53 }
  0xf4   :  { %4357 = vmatprep.subr.msk.mxu0 %vm36_vm1, %v5086_v51  ;;  %4282 = vmatprep.mubr.msk.f32.mxu0 %vm36_vm1, %v5114_v61 }
  0xf5   :  { %4302 = vmatprep.mubr.msk.f32.mxu1 %vm36_vm1, %v5114_v61 }
  0xf6   :  { %4283 = vmatmul.mubr.msk.f32.gmra.mrb[4].mxu0 %vm36_vm1, %v5124_v62  ;;  %4303 = vmatmul.mubr.msk.f32.gmra.mrb[4].mxu1 %vm36_vm1, %v5124_v62  ;;  %v5425_v38 = vpop.permute.xlu0 %782 }
  0xf7   :  { %4285 = vmatprep.mubr.msk.f32.mxu0 %vm36_vm1, %v5133_v63  ;;  %4305 = vmatprep.mubr.msk.f32.mxu1 %vm36_vm1, %v5133_v63 }
  0xfa   :  { %4286 = vmatmul.mubr.msk.f32.gmra.mrb[6].mxu0 %vm36_vm1, %v5152_v2  ;;  %4306 = vmatmul.mubr.msk.f32.gmra.mrb[6].mxu1 %vm36_vm1, %v5152_v2  ;;  %v5429_v40 = vpop.permute.xlu0 %792 }
  0xfb   :  { %4288 = vmatprep.mubr.msk.f32.mxu0 %vm36_vm1, %v5157_v3  ;;  %4308 = vmatprep.mubr.msk.f32.mxu1 %vm36_vm1, %v5157_v3 }
  0xfe   :  { %4289 = vmatmul.mubr.msk.f32.gmra.mrb[8].mxu0 %vm36_vm1, %v5170_v4  ;;  %4309 = vmatmul.mubr.msk.f32.gmra.mrb[8].mxu1 %vm36_vm1, %v5170_v4  ;;  %v5433_v42 = vpop.permute.xlu0 %1007 }
  0xff   :  { %4291 = vmatprep.mubr.msk.f32.mxu0 %vm36_vm1, %v5179_v7  ;;  %4311 = vmatprep.mubr.msk.f32.mxu1 %vm36_vm1, %v5179_v7 }
 0x102   :  { %4292 = vmatmul.mubr.msk.f32.gmra.mrb[10].mxu0 %vm36_vm1, %v5192_v8  ;;  %4312 = vmatmul.mubr.msk.f32.gmra.mrb[10].mxu1 %vm36_vm1, %v5192_v8  ;;  %v5437_v44 = vpop.permute.xlu0 %1017 }
 0x103   :  { %4294 = vmatprep.mubr.msk.f32.mxu0 %vm36_vm1, %v5197_v9  ;;  %4314 = vmatprep.mubr.msk.f32.mxu1 %vm36_vm1, %v5197_v9 }
 0x106   :  { %4295 = vmatmul.mubr.msk.f32.gmra.mrb[12].mxu0 %vm36_vm1, %v5214_v12  ;;  %4315 = vmatmul.mubr.msk.f32.gmra.mrb[12].mxu1 %vm36_vm1, %v5214_v12  ;;  %v5441_v46 = vpop.permute.xlu0 %1027 }
 0x107   :  { %4319 = vmatprep.mubr.msk.f32.mxu0 %vm36_vm1, %v5032_v29  ;;  %4339 = vmatprep.mubr.msk.f32.mxu1 %vm36_vm1, %v5032_v29 }
 0x10a   :  { %4320 = vmatmul.mubr.msk.f32.vlgmr.msra.gmra.mrb[14].mxu0 %vm36_vm1, %v5093_v52  ;;  %4340 = vmatmul.mubr.msk.f32.vlgmr.msra.gmra.mrb[14].mxu1 %vm36_vm1, %v5093_v52  ;;  %v5445_v48 = vpop.permute.xlu0 %1037 }
 0x10b   :  { %4358 = vmatpush3.xpose.msk.msra.mxu0 %vm36_vm1, %v5086_v51  ;;  %4378 = vmatpush3.xpose.msk.msra.mxu1 %vm36_vm1, %v1597_v53 }
 0x10c   :  { %4397 = vmatprep.subr.msk.mxu0 %vm36_vm1, %v5104_v59  ;;  %4417 = vmatprep.subr.msk.mxu1 %vm36_vm1, %v5107_v60 }
 0x10d   :  { %4322 = vmatprep.mubr.msk.f32.mxu0 %vm36_vm1, %v5114_v61  ;;  %4342 = vmatprep.mubr.msk.f32.mxu1 %vm36_vm1, %v5114_v61 }
 0x10e   :  { %4323 = vmatmul.mubr.msk.f32.gmra.mrb[16].mxu0 %vm36_vm1, %v5124_v62  ;;  %4343 = vmatmul.mubr.msk.f32.gmra.mrb[16].mxu1 %vm36_vm1, %v5124_v62  ;;  %v5449_v50 = vpop.permute.xlu0 %1047 }
 0x10f   :  { %4325 = vmatprep.mubr.msk.f32.mxu0 %vm36_vm1, %v5133_v63  ;;  %4345 = vmatprep.mubr.msk.f32.mxu1 %vm36_vm1, %v5133_v63 }
 0x112   :  { %4326 = vmatmul.mubr.msk.f32.gmra.mrb[18].mxu0 %vm36_vm1, %v5152_v2  ;;  %4346 = vmatmul.mubr.msk.f32.gmra.mrb[18].mxu1 %vm36_vm1, %v5152_v2 }
 0x113   :  { %4328 = vmatprep.mubr.msk.f32.mxu0 %vm36_vm1, %v5157_v3  ;;  %4348 = vmatprep.mubr.msk.f32.mxu1 %vm36_vm1, %v5157_v3 }
 0x116   :  { %4329 = vmatmul.mubr.msk.f32.gmra.mrb[20].mxu0 %vm36_vm1, %v5170_v4  ;;  %4349 = vmatmul.mubr.msk.f32.gmra.mrb[20].mxu1 %vm36_vm1, %v5170_v4 }
 0x117   :  { %4331 = vmatprep.mubr.msk.f32.mxu0 %vm36_vm1, %v5179_v7  ;;  %4351 = vmatprep.mubr.msk.f32.mxu1 %vm36_vm1, %v5179_v7 }
 0x11a   :  { %4332 = vmatmul.mubr.msk.f32.gmra.mrb[22].mxu0 %vm36_vm1, %v5192_v8  ;;  %4352 = vmatmul.mubr.msk.f32.gmra.mrb[22].mxu1 %vm36_vm1, %v5192_v8 }
 0x11b   :  { %4334 = vmatprep.mubr.msk.f32.mxu0 %vm36_vm1, %v5197_v9  ;;  %4354 = vmatprep.mubr.msk.f32.mxu1 %vm36_vm1, %v5197_v9 }
 0x11e   :  { %4335 = vmatmul.mubr.msk.f32.gmra.mrb[24].mxu0 %vm36_vm1, %v5214_v12  ;;  %4355 = vmatmul.mubr.msk.f32.gmra.mrb[24].mxu1 %vm36_vm1, %v5214_v12 }
 0x11f   :  { %4359 = vmatprep.mubr.msk.f32.mxu0 %vm36_vm1, %v5032_v29  ;;  %4379 = vmatprep.mubr.msk.f32.mxu1 %vm36_vm1, %v5032_v29 }
 0x122   :  { %4360 = vmatmul.mubr.msk.f32.vlgmr.msra.gmra.mrb[26].mxu0 %vm36_vm1, %v5093_v52  ;;  %4380 = vmatmul.mubr.msk.f32.vlgmr.msra.gmra.mrb[26].mxu1 %vm36_vm1, %v5093_v52 }
 0x123   :  { %4398 = vmatpush3.xpose.msk.msra.mxu0 %vm36_vm1, %v5104_v59  ;;  %4418 = vmatpush3.xpose.msk.msra.mxu1 %vm36_vm1, %v5107_v60 }
 0x124   :  { %4362 = vmatprep.mubr.msk.f32.mxu0 %vm36_vm1, %v5114_v61  ;;  %4382 = vmatprep.mubr.msk.f32.mxu1 %vm36_vm1, %v5114_v61 }
 0x126   :  { %4363 = vmatmul.mubr.msk.f32.gmra.mrb[28].mxu0 %vm36_vm1, %v5124_v62  ;;  %4383 = vmatmul.mubr.msk.f32.gmra.mrb[28].mxu1 %vm36_vm1, %v5124_v62 }
 0x127   :  { %4365 = vmatprep.mubr.msk.f32.mxu0 %vm36_vm1, %v5133_v63  ;;  %4385 = vmatprep.mubr.msk.f32.mxu1 %vm36_vm1, %v5133_v63 }
 0x12a   :  { %4366 = vmatmul.mubr.msk.f32.gmra.mrb[30].mxu0 %vm36_vm1, %v5152_v2  ;;  %4386 = vmatmul.mubr.msk.f32.gmra.mrb[30].mxu1 %vm36_vm1, %v5152_v2 }
 0x12b   :  { %4368 = vmatprep.mubr.msk.f32.mxu0 %vm36_vm1, %v5157_v3  ;;  %4388 = vmatprep.mubr.msk.f32.mxu1 %vm36_vm1, %v5157_v3 }
 0x12e   :  { %4369 = vmatmul.mubr.msk.f32.gmra.mrb[32].mxu0 %vm36_vm1, %v5170_v4  ;;  %4389 = vmatmul.mubr.msk.f32.gmra.mrb[32].mxu1 %vm36_vm1, %v5170_v4 }
 0x12f   :  { %4371 = vmatprep.mubr.msk.f32.mxu0 %vm36_vm1, %v5179_v7  ;;  %4391 = vmatprep.mubr.msk.f32.mxu1 %vm36_vm1, %v5179_v7 }
 0x132   :  { %4372 = vmatmul.mubr.msk.f32.gmra.mrb[34].mxu0 %vm36_vm1, %v5192_v8  ;;  %4392 = vmatmul.mubr.msk.f32.gmra.mrb[34].mxu1 %vm36_vm1, %v5192_v8 }
 0x133   :  { %4374 = vmatprep.mubr.msk.f32.mxu0 %vm36_vm1, %v5197_v9  ;;  %4394 = vmatprep.mubr.msk.f32.mxu1 %vm36_vm1, %v5197_v9 }
 0x136   :  { %4375 = vmatmul.mubr.msk.f32.gmra.mrb[36].mxu0 %vm36_vm1, %v5214_v12  ;;  %4395 = vmatmul.mubr.msk.f32.gmra.mrb[36].mxu1 %vm36_vm1, %v5214_v12 }
 0x137   :  { %4399 = vmatprep.mubr.msk.f32.mxu0 %vm36_vm1, %v5032_v29  ;;  %4419 = vmatprep.mubr.msk.f32.mxu1 %vm36_vm1, %v5032_v29  ;;  %v5395_v29 = vpop.permute.xlu1 %767 }
 0x13a   :  { %4400 = vmatmul.mubr.msk.f32.vlgmr.msra.gmra.mrb[38].mxu0 %vm36_vm1, %v5093_v52  ;;  %4420 = vmatmul.mubr.msk.f32.vlgmr.msra.gmra.mrb[38].mxu1 %vm36_vm1, %v5093_v52  ;;  %v5453_v52 = vpop.permute.xlu0 %1057 }
 0x13b   :  { %4402 = vmatprep.mubr.msk.f32.mxu0 %vm36_vm1, %v5114_v61  ;;  %4422 = vmatprep.mubr.msk.f32.mxu1 %vm36_vm1, %v5114_v61  ;;  %v5407_v35 = vpop.permute.xlu1 %777 }
 0x13e   :  { %4403 = vmatmul.mubr.msk.f32.gmra.mrb[40].mxu0 %vm36_vm1, %v5124_v62  ;;  %4423 = vmatmul.mubr.msk.f32.gmra.mrb[40].mxu1 %vm36_vm1, %v5124_v62  ;;  %v5457_v54 = vpop.permute.xlu0 %1272 }
 0x13f   :  { %4405 = vmatprep.mubr.msk.f32.mxu0 %vm36_vm1, %v5133_v63  ;;  %4425 = vmatprep.mubr.msk.f32.mxu1 %vm36_vm1, %v5133_v63  ;;  %v5423_v37 = vpop.permute.xlu1 %787 }
 0x142   :  { %4406 = vmatmul.mubr.msk.f32.gmra.mrb[42].mxu0 %vm36_vm1, %v5152_v2  ;;  %4426 = vmatmul.mubr.msk.f32.gmra.mrb[42].mxu1 %vm36_vm1, %v5152_v2  ;;  %v5461_v56 = vpop.permute.xlu0 %1282 }
 0x143   :  { %4408 = vmatprep.mubr.msk.f32.mxu0 %vm36_vm1, %v5157_v3  ;;  %4428 = vmatprep.mubr.msk.f32.mxu1 %vm36_vm1, %v5157_v3  ;;  %v5427_v39 = vpop.permute.xlu1 %797  ;;  %6244 = vst [vmem:[#allocation4_spill] sm:$0xff] %v5461_v56 }
 0x146   :  { %4409 = vmatmul.mubr.msk.f32.gmra.mrb[44].mxu0 %vm36_vm1, %v5170_v4  ;;  %4429 = vmatmul.mubr.msk.f32.gmra.mrb[44].mxu1 %vm36_vm1, %v5170_v4  ;;  %v5465_v60 = vpop.permute.xlu0 %1292 }
 0x147   :  { %4411 = vmatprep.mubr.msk.f32.mxu0 %vm36_vm1, %v5179_v7  ;;  %4431 = vmatprep.mubr.msk.f32.mxu1 %vm36_vm1, %v5179_v7  ;;  %v5431_v41 = vpop.permute.xlu1 %1012  ;;  %6246 = vst [vmem:[#allocation6_spill] sm:$0xff] %v5465_v60 }
 0x14a   :  { %4412 = vmatmul.mubr.msk.f32.gmra.mrb[46].mxu0 %vm36_vm1, %v5192_v8  ;;  %4432 = vmatmul.mubr.msk.f32.gmra.mrb[46].mxu1 %vm36_vm1, %v5192_v8  ;;  %v5469_v62 = vpop.permute.xlu0 %1302 }
 0x14b   :  { %4414 = vmatprep.mubr.msk.f32.mxu0 %vm36_vm1, %v5197_v9  ;;  %4434 = vmatprep.mubr.msk.f32.mxu1 %vm36_vm1, %v5197_v9  ;;  %v5435_v43 = vpop.permute.xlu1 %1022  ;;  %6248 = vst [vmem:[#allocation8_spill] sm:$0xff] %v5469_v62 }
 0x14e   :  { %4415 = vmatmul.mubr.msk.f32.gmra.mrb[48].mxu0 %vm36_vm1, %v5214_v12  ;;  %4435 = vmatmul.mubr.msk.f32.gmra.mrb[48].mxu1 %vm36_vm1, %v5214_v12  ;;  %v5473_v2 = vpop.permute.xlu0 %1312 }
 0x14f   :  { %v5439_v45 = vpop.permute.xlu1 %1032  ;;  %6250 = vst [vmem:[#allocation10_spill] sm:$0xff] %v5473_v2 }
 0x152   :  { %v5477_v4 = vpop.permute.xlu0 %1322 }
 0x153   :  { %v5443_v47 = vpop.permute.xlu1 %1042  ;;  %6252 = vst [vmem:[#allocation12_spill] sm:$0xff] %v5477_v4 }
 0x156   :  { %v5481_v8 = vpop.permute.xlu0 %1537 }
 0x157   :  { %v5447_v49 = vpop.permute.xlu1 %1052 }
 0x15a   :  { %v5485_v12 = vpop.permute.xlu0 %1547 }
 0x15b   :  { %v5451_v51 = vpop.permute.xlu1 %1062  ;;  %6254 = vst [vmem:[#allocation14_spill] sm:$0xff] %v5485_v12 }
 0x15f   :  { %v5455_v53 = vpop.permute.xlu1 %1277 }
 0x163   :  { %v5459_v55 = vpop.permute.xlu1 %1287 }
 0x164   :  { %6243 = vst [vmem:[#allocation3_spill] sm:$0xff] %v5459_v55 }
 0x167   :  { %v5463_v59 = vpop.permute.xlu1 %1297 }
 0x168   :  { %6245 = vst [vmem:[#allocation5_spill] sm:$0xff] %v5463_v59 }
 0x16b   :  { %v5467_v61 = vpop.permute.xlu1 %1307 }
 0x16c   :  { %6247 = vst [vmem:[#allocation7_spill] sm:$0xff] %v5467_v61  ;;  %v5489_v61 = vpop.permute.xlu0 %1557 }
 0x16d   :  { %6256 = vst [vmem:[#allocation16_spill] sm:$0xff] %v5489_v61 }
 0x16f   :  { %v5471_v63 = vpop.permute.xlu1 %1317 }
 0x170   :  { %6249 = vst [vmem:[#allocation9_spill] sm:$0xff] %v5471_v63  ;;  %v5493_v63 = vpop.permute.xlu0 %1567 }
 0x173   :  { %v5475_v3 = vpop.permute.xlu1 %1327 }
 0x174   :  { %6251 = vst [vmem:[#allocation11_spill] sm:$0xff] %v5475_v3  ;;  %v5497_v3 = vpop.permute.xlu0 %1577 }
 0x175   :  { %6259 = vst [vmem:[#allocation19_spill] sm:$0xff] %v5497_v3 }
 0x177   :  { %v5479_v7 = vpop.permute.xlu1 %1542 }
 0x178   :  { %v5501_v59 = vpop.permute.xlu0 %1587 }
 0x17b   :  { %v5483_v9 = vpop.permute.xlu1 %1552 }
 0x17c   :  { %6253 = vst [vmem:[#allocation13_spill] sm:$0xff] %v5483_v9 }
 0x17f   :  { %v5487_v60 = vpop.permute.xlu1 %1562 }
 0x180   :  { %6255 = vst [vmem:[#allocation15_spill] sm:$0xff] %v5487_v60 }
 0x183   :  { %v5491_v62 = vpop.permute.xlu1 %1572 }
 0x184   :  { %6257 = vst [vmem:[#allocation17_spill] sm:$0xff] %v5491_v62 }
 0x187   :  { %v5495_v2 = vpop.permute.xlu1 %1582 }
 0x188   :  { %6258 = vst [vmem:[#allocation18_spill] sm:$0xff] %v5495_v2 }
 0x18b   :  { %v5499_v4 = vpop.permute.xlu1 %1592 }
 0x18c   :  { %6260 = vst [vmem:[#allocation20_spill] sm:$0xff] %v5499_v4  ;;  %v5510_v4 = vpop.permute.xlu0 %1802 }
 0x18f   :  { %v5508_v3 = vpop.permute.xlu1 %1807 }
 0x1c4   :  { %v4301_v56 = vpop.f32.mrb[2].mxu1 }
 0x1c5   :  { %v4281_v9 = vpop.f32.mrb[2].mxu0  ;;  %v648_v12 = vadd.f32 %v4301_v56, %v5263_v17  ;;  %v642_v60 = vpop.f32.mrb[3].mxu1 }
 0x1c6   :  { %v384_v61 = vadd.f32 %v4281_v9, %v5139_v1  ;;  %v378_v55 = vpop.f32.mrb[3].mxu0  ;;  %v643_v62 = vadd.f32 %v642_v60, %v5265_v18 }
 0x1c7   :  { %705 = vst.msk [vmem:[#allocation2 + $0x68] sm:$0xff] %vm439_vm3, %v648_v12  ;;  %v379_v2 = vadd.f32 %v378_v55, %v5100_v58 }
 0x1c8   :  { %441 = vst.msk [vmem:[#allocation2 + $0x8] sm:$0xff] %vm439_vm3, %v384_v61  ;;  %704 = vst.msk [vmem:[#allocation2 + $0x60] sm:$0xff] %vm439_vm3, %v643_v62 }
 0x1c9   :  { %440 = vst.msk [vmem:[#allocation2] sm:$0xff] %vm439_vm3, %v379_v2  ;;  %v4284_v17 = vpop.f32.mrb[4].mxu0  ;;  %v4304_v56 = vpop.f32.mrb[4].mxu1 }
 0x1ca   :  { %v394_v1 = vadd.f32 %v4284_v17, %v5137_v0  ;;  %v658_v18 = vadd.f32 %v4304_v56, %v5275_v19  ;;  %v388_v60 = vpop.f32.mrb[5].mxu0  ;;  %v652_v9 = vpop.f32.mrb[5].mxu1 }
 0x1cb   :  { %v389_v58 = vadd.f32 %v388_v60, %v5098_v57  ;;  %v653_v55 = vadd.f32 %v652_v9, %v5277_v20  ;;  %v5527_v17 = vpop.permute.xlu1 %1817  ;;  %v5529_v56 = vpop.permute.xlu0 %1812 }
 0x1cc   :  { %443 = vst.msk [vmem:[#allocation2 + $0x18] sm:$0xff] %vm439_vm3, %v394_v1  ;;  %707 = vst.msk [vmem:[#allocation2 + $0x78] sm:$0xff] %vm439_vm3, %v658_v18 }
 0x1cd   :  { %442 = vst.msk [vmem:[#allocation2 + $0x10] sm:$0xff] %vm439_vm3, %v389_v58  ;;  %706 = vst.msk [vmem:[#allocation2 + $0x70] sm:$0xff] %vm439_vm3, %v653_v55  ;;  %v4287_v61 = vpop.f32.mrb[6].mxu0  ;;  %v4307_v62 = vpop.f32.mrb[6].mxu1 }
 0x1ce   :  { %v404_v0 = vadd.f32 %v4287_v61, %v5172_v5  ;;  %v668_v19 = vadd.f32 %v4307_v62, %v5295_v21  ;;  %v398_v2 = vpop.f32.mrb[7].mxu0  ;;  %v662_v12 = vpop.f32.mrb[7].mxu1 }
 0x1cf   :  { %v399_v57 = vadd.f32 %v398_v2, %v5174_v6  ;;  %v663_v20 = vadd.f32 %v662_v12, %v5297_v22 }
 0x1d0   :  { %445 = vst.msk [vmem:[#allocation2 + $0x28] sm:$0xff] %vm439_vm3, %v404_v0  ;;  %709 = vst.msk [vmem:[#allocation2 + $0x88] sm:$0xff] %vm439_vm3, %v668_v19  ;;  %v5547_v0 = vpop.permute.xlu1 %1827  ;;  %v5549_v19 = vpop.permute.xlu0 %1822 }
 0x1d1   :  { %444 = vst.msk [vmem:[#allocation2 + $0x20] sm:$0xff] %vm439_vm3, %v399_v57  ;;  %708 = vst.msk [vmem:[#allocation2 + $0x80] sm:$0xff] %vm439_vm3, %v663_v20  ;;  %v4290_v5 = vpop.f32.mrb[8].mxu0  ;;  %v4310_v21 = vpop.f32.mrb[8].mxu1 }
 0x1d2   :  { %v414_v1 = vadd.f32 %v4290_v5, %v5199_v10  ;;  %v678_v6 = vadd.f32 %v4310_v21, %v5311_v23  ;;  %v408_v18 = vpop.f32.mrb[9].mxu0  ;;  %v672_v22 = vpop.f32.mrb[9].mxu1 }
 0x1d3   :  { %v409_v60 = vadd.f32 %v408_v18, %v5201_v11  ;;  %v673_v9 = vadd.f32 %v672_v22, %v5313_v24 }
 0x1d4   :  { %447 = vst.msk [vmem:[#allocation2 + $0x38] sm:$0xff] %vm439_vm3, %v414_v1  ;;  %711 = vst.msk [vmem:[#allocation2 + $0x98] sm:$0xff] %vm439_vm3, %v678_v6  ;;  %v5567_v18 = vpop.permute.xlu1 %1837  ;;  %v5569_v22 = vpop.permute.xlu0 %1832 }
 0x1d5   :  { %446 = vst.msk [vmem:[#allocation2 + $0x30] sm:$0xff] %vm439_vm3, %v409_v60  ;;  %710 = vst.msk [vmem:[#allocation2 + $0x90] sm:$0xff] %vm439_vm3, %v673_v9  ;;  %v4293_v58 = vpop.f32.mrb[10].mxu0  ;;  %v4313_v55 = vpop.f32.mrb[10].mxu1 }
 0x1d6   :  { %v424_v10 = vadd.f32 %v4293_v58, %v5224_v13  ;;  %v688_v23 = vadd.f32 %v4313_v55, %v5331_v25  ;;  %v418_v61 = vpop.f32.mrb[11].mxu0  ;;  %v682_v62 = vpop.f32.mrb[11].mxu1 }
 0x1d7   :  { %v419_v11 = vadd.f32 %v418_v61, %v5226_v14  ;;  %v683_v24 = vadd.f32 %v682_v62, %v5333_v26 }
 0x1d8   :  { %449 = vst.msk [vmem:[#allocation2 + $0x48] sm:$0xff] %vm439_vm3, %v424_v10  ;;  %713 = vst.msk [vmem:[#allocation2 + $0xa8] sm:$0xff] %vm439_vm3, %v688_v23 }
 0x1d9   :  { %448 = vst.msk [vmem:[#allocation2 + $0x40] sm:$0xff] %vm439_vm3, %v419_v11  ;;  %712 = vst.msk [vmem:[#allocation2 + $0xa0] sm:$0xff] %vm439_vm3, %v683_v24  ;;  %v4296_v13 = vpop.f32.mrb[12].mxu0  ;;  %v4316_v25 = vpop.f32.mrb[12].mxu1 }
 0x1da   :  { %v434_v2 = vadd.f32 %v4296_v13, %v5243_v15  ;;  %v698_v14 = vadd.f32 %v4316_v25, %v5343_v27  ;;  %v428_v12 = vpop.f32.mrb[13].mxu0  ;;  %v692_v26 = vpop.f32.mrb[13].mxu1 }
 0x1db   :  { %v429_v57 = vadd.f32 %v428_v12, %v5245_v16  ;;  %v693_v20 = vadd.f32 %v692_v26, %v5345_v28  ;;  %v5587_v11 = vpop.permute.xlu1 %1847  ;;  %v5589_v24 = vpop.permute.xlu0 %1842 }
 0x1dc   :  { %451 = vst.msk [vmem:[#allocation2 + $0x58] sm:$0xff] %vm439_vm3, %v434_v2  ;;  %715 = vst.msk [vmem:[#allocation2 + $0xb8] sm:$0xff] %vm439_vm3, %v698_v14 }
 0x1dd   :  { %450 = vst.msk [vmem:[#allocation2 + $0x50] sm:$0xff] %vm439_vm3, %v429_v57  ;;  %714 = vst.msk [vmem:[#allocation2 + $0xb0] sm:$0xff] %vm439_vm3, %v693_v20  ;;  %v4321_v5 = vpop.f32.mrb[14].mxu0  ;;  %v4341_v21 = vpop.f32.mrb[14].mxu1 }
 0x1de   :  { %v913_v15 = vadd.f32 %v4321_v5, %v5363_v30  ;;  %v1178_v27 = vadd.f32 %v4341_v21, %v5431_v41  ;;  %v907_v1 = vpop.f32.mrb[15].mxu0  ;;  %v1172_v6 = vpop.f32.mrb[15].mxu1 }
 0x1df   :  { %v908_v16 = vadd.f32 %v907_v1, %v5365_v31  ;;  %v1173_v28 = vadd.f32 %v1172_v6, %v5433_v42  ;;  %v5607_v5 = vpop.permute.xlu1 %1857  ;;  %v5609_v21 = vpop.permute.xlu0 %1852 }
 0x1e0   :  { %970 = vst.msk [vmem:[#allocation2 + $0xc8] sm:$0xff] %vm439_vm3, %v913_v15  ;;  %1235 = vst.msk [vmem:[#allocation2 + $0x128] sm:$0xff] %vm439_vm3, %v1178_v27 }
 0x1e1   :  { %969 = vst.msk [vmem:[#allocation2 + $0xc0] sm:$0xff] %vm439_vm3, %v908_v16  ;;  %1234 = vst.msk [vmem:[#allocation2 + $0x120] sm:$0xff] %vm439_vm3, %v1173_v28  ;;  %v4324_v30 = vpop.f32.mrb[16].mxu0  ;;  %v4344_v41 = vpop.f32.mrb[16].mxu1 }
 0x1e2   :  { %v923_v60 = vadd.f32 %v4324_v30, %v5375_v32  ;;  %v1188_v31 = vadd.f32 %v4344_v41, %v5435_v43  ;;  %v917_v9 = vpop.f32.mrb[17].mxu0  ;;  %v1182_v42 = vpop.f32.mrb[17].mxu1 }
 0x1e3   :  { %v918_v58 = vadd.f32 %v917_v9, %v5377_v33  ;;  %v1183_v55 = vadd.f32 %v1182_v42, %v5437_v44  ;;  %v6261_v9 = vld [vmem:[#allocation3_spill] sm:$0xff] }
 0x1e4   :  { %972 = vst.msk [vmem:[#allocation2 + $0xd8] sm:$0xff] %vm439_vm3, %v923_v60  ;;  %1237 = vst.msk [vmem:[#allocation2 + $0x138] sm:$0xff] %vm439_vm3, %v1188_v31  ;;  %v5627_v60 = vpop.permute.xlu1 %2072  ;;  %v5629_v31 = vpop.permute.xlu0 %2067 }
 0x1e5   :  { %971 = vst.msk [vmem:[#allocation2 + $0xd0] sm:$0xff] %vm439_vm3, %v918_v58  ;;  %1236 = vst.msk [vmem:[#allocation2 + $0x130] sm:$0xff] %vm439_vm3, %v1183_v55  ;;  %v4327_v10 = vpop.f32.mrb[18].mxu0  ;;  %v4347_v23 = vpop.f32.mrb[18].mxu1  ;;  %v6262_v58 = vld [vmem:[#allocation13_spill] sm:$0xff] }
 0x1e6   :  { %v933_v32 = vadd.f32 %v4327_v10, %v5395_v29  ;;  %v1198_v43 = vadd.f32 %v4347_v23, %v5439_v45  ;;  %v927_v61 = vpop.f32.mrb[19].mxu0  ;;  %v1192_v62 = vpop.f32.mrb[19].mxu1  ;;  %v6263_v10 = vld [vmem:[#allocation4_spill] sm:$0xff] }
 0x1e7   :  { %v928_v33 = vadd.f32 %v927_v61, %v5397_v34  ;;  %v1193_v44 = vadd.f32 %v1192_v62, %v5441_v46 }
 0x1e8   :  { %974 = vst.msk [vmem:[#allocation2 + $0xe8] sm:$0xff] %vm439_vm3, %v933_v32  ;;  %1239 = vst.msk [vmem:[#allocation2 + $0x148] sm:$0xff] %vm439_vm3, %v1198_v43  ;;  %v6264_v32 = vld [vmem:[#allocation14_spill] sm:$0xff] }
 0x1e9   :  { %973 = vst.msk [vmem:[#allocation2 + $0xe0] sm:$0xff] %vm439_vm3, %v928_v33  ;;  %1238 = vst.msk [vmem:[#allocation2 + $0x140] sm:$0xff] %vm439_vm3, %v1193_v44  ;;  %v4330_v29 = vpop.f32.mrb[20].mxu0  ;;  %v4350_v45 = vpop.f32.mrb[20].mxu1  ;;  %v6265_v33 = vld [vmem:[#allocation5_spill] sm:$0xff] }
 0x1ea   :  { %v943_v13 = vadd.f32 %v4330_v29, %v5407_v35  ;;  %v1208_v34 = vadd.f32 %v4350_v45, %v5443_v47  ;;  %v937_v25 = vpop.f32.mrb[21].mxu0  ;;  %v1202_v46 = vpop.f32.mrb[21].mxu1  ;;  %v6266_v29 = vld [vmem:[#allocation15_spill] sm:$0xff] }
 0x1eb   :  { %v938_v2 = vadd.f32 %v937_v25, %v5409_v36  ;;  %v1203_v14 = vadd.f32 %v1202_v46, %v5445_v48  ;;  %v6267_v25 = vld [vmem:[#allocation6_spill] sm:$0xff] }
 0x1ec   :  { %976 = vst.msk [vmem:[#allocation2 + $0xf8] sm:$0xff] %vm439_vm3, %v943_v13  ;;  %1241 = vst.msk [vmem:[#allocation2 + $0x158] sm:$0xff] %vm439_vm3, %v1208_v34 }
 0x1ed   :  { %975 = vst.msk [vmem:[#allocation2 + $0xf0] sm:$0xff] %vm439_vm3, %v938_v2  ;;  %1240 = vst.msk [vmem:[#allocation2 + $0x150] sm:$0xff] %vm439_vm3, %v1203_v14  ;;  %v4333_v12 = vpop.f32.mrb[22].mxu0  ;;  %v4353_v26 = vpop.f32.mrb[22].mxu1  ;;  %v6268_v2 = vld [vmem:[#allocation16_spill] sm:$0xff] }
 0x1ee   :  { %v953_v35 = vadd.f32 %v4333_v12, %v5423_v37  ;;  %v1218_v47 = vadd.f32 %v4353_v26, %v5447_v49  ;;  %v947_v57 = vpop.f32.mrb[23].mxu0  ;;  %v1212_v20 = vpop.f32.mrb[23].mxu1 }
 0x1ef   :  { %v948_v36 = vadd.f32 %v947_v57, %v5425_v38  ;;  %v1213_v48 = vadd.f32 %v1212_v20, %v5449_v50  ;;  %v2083_v12 = vpop.permute.xlu1 %2082  ;;  %v5647_v26 = vpop.permute.xlu0 %2077  ;;  %v6269_v57 = vld [vmem:[#allocation7_spill] sm:$0xff] }
 0x1f0   :  { %978 = vst.msk [vmem:[#allocation2 + $0x108] sm:$0xff] %vm439_vm3, %v953_v35  ;;  %1243 = vst.msk [vmem:[#allocation2 + $0x168] sm:$0xff] %vm439_vm3, %v1218_v47 }
 0x1f1   :  { %977 = vst.msk [vmem:[#allocation2 + $0x100] sm:$0xff] %vm439_vm3, %v948_v36  ;;  %1242 = vst.msk [vmem:[#allocation2 + $0x160] sm:$0xff] %vm439_vm3, %v1213_v48  ;;  %v4336_v37 = vpop.f32.mrb[24].mxu0  ;;  %v4356_v49 = vpop.f32.mrb[24].mxu1  ;;  %v6270_v36 = vld [vmem:[#allocation17_spill] sm:$0xff] }
 0x1f2   :  { %v963_v15 = vadd.f32 %v4336_v37, %v5427_v39  ;;  %v1228_v38 = vadd.f32 %v4356_v49, %v5451_v51  ;;  %v957_v27 = vpop.f32.mrb[25].mxu0  ;;  %v1222_v50 = vpop.f32.mrb[25].mxu1 }
 0x1f3   :  { %v958_v1 = vadd.f32 %v957_v27, %v5429_v40  ;;  %v1223_v6 = vadd.f32 %v1222_v50, %v5453_v52 }
 0x1f4   :  { %980 = vst.msk [vmem:[#allocation2 + $0x118] sm:$0xff] %vm439_vm3, %v963_v15  ;;  %1245 = vst.msk [vmem:[#allocation2 + $0x178] sm:$0xff] %vm439_vm3, %v1228_v38  ;;  %v6271_v15 = vld [vmem:[#allocation8_spill] sm:$0xff] }
 0x1f5   :  { %979 = vst.msk [vmem:[#allocation2 + $0x110] sm:$0xff] %vm439_vm3, %v958_v1  ;;  %1244 = vst.msk [vmem:[#allocation2 + $0x170] sm:$0xff] %vm439_vm3, %v1223_v6  ;;  %v4361_v16 = vpop.f32.mrb[26].mxu0  ;;  %v4381_v28 = vpop.f32.mrb[26].mxu1  ;;  %v6272_v6 = vld [vmem:[#allocation9_spill] sm:$0xff] }
 0x1f6   :  { %v1443_v39 = vadd.f32 %v4361_v16, %v5455_v53  ;;  %v1708_v51 = vadd.f32 %v4381_v28, %v5479_v7  ;;  %v1437_v30 = vpop.f32.mrb[27].mxu0  ;;  %v1702_v41 = vpop.f32.mrb[27].mxu1  ;;  %v6273_v28 = vld [vmem:[#allocation18_spill] sm:$0xff] }
 0x1f7   :  { %v1438_v40 = vadd.f32 %v1437_v30, %v5457_v54  ;;  %v1703_v52 = vadd.f32 %v1702_v41, %v5481_v8  ;;  %v6274_v41 = vld [vmem:[#allocation10_spill] sm:$0xff] }
 0x1f8   :  { %1500 = vst.msk [vmem:[#allocation2 + $0x188] sm:$0xff] %vm439_vm3, %v1443_v39  ;;  %1765 = vst.msk [vmem:[#allocation2 + $0x1e8] sm:$0xff] %vm439_vm3, %v1708_v51 }
 0x1f9   :  { %1499 = vst.msk [vmem:[#allocation2 + $0x180] sm:$0xff] %vm439_vm3, %v1438_v40  ;;  %1764 = vst.msk [vmem:[#allocation2 + $0x1e0] sm:$0xff] %vm439_vm3, %v1703_v52  ;;  %v4364_v53 = vpop.f32.mrb[28].mxu0  ;;  %v4384_v7 = vpop.f32.mrb[28].mxu1  ;;  %v6275_v52 = vld [vmem:[#allocation19_spill] sm:$0xff] }
 0x1fa   :  { %v1453_v42 = vadd.f32 %v4364_v53, %v6261_v9  ;;  %v1718_v54 = vadd.f32 %v4384_v7, %v6262_v58  ;;  %v1447_v55 = vpop.f32.mrb[29].mxu0  ;;  %v1712_v8 = vpop.f32.mrb[29].mxu1  ;;  %v6276_v58 = vld [vmem:[#allocation11_spill] sm:$0xff] }
 0x1fb   :  { %v1448_v23 = vadd.f32 %v1447_v55, %v6263_v10  ;;  %v1713_v43 = vadd.f32 %v1712_v8, %v6264_v32  ;;  %v2093_v53 = vpop.permute.xlu1 %2092  ;;  %v2088_v7 = vpop.permute.xlu0 %2087  ;;  %v6277_v55 = vld [vmem:[#allocation20_spill] sm:$0xff] }
 0x1fc   :  { %1502 = vst.msk [vmem:[#allocation2 + $0x198] sm:$0xff] %vm439_vm3, %v1453_v42  ;;  %1767 = vst.msk [vmem:[#allocation2 + $0x1f8] sm:$0xff] %vm439_vm3, %v1718_v54  ;;  %v6278_v32 = vld [vmem:[#allocation12_spill] sm:$0xff] }
 0x1fd   :  { %1501 = vst.msk [vmem:[#allocation2 + $0x190] sm:$0xff] %vm439_vm3, %v1448_v23  ;;  %1766 = vst.msk [vmem:[#allocation2 + $0x1f0] sm:$0xff] %vm439_vm3, %v1713_v43  ;;  %v4367_v61 = vpop.f32.mrb[30].mxu0  ;;  %v4387_v62 = vpop.f32.mrb[30].mxu1 }
 0x1fe   :  { %v1463_v44 = vadd.f32 %v4367_v61, %v6265_v33  ;;  %v1728_v45 = vadd.f32 %v4387_v62, %v6266_v29  ;;  %v1457_v13 = vpop.f32.mrb[31].mxu0  ;;  %v1722_v34 = vpop.f32.mrb[31].mxu1 }
 0x1ff   :  { %v1458_v46 = vadd.f32 %v1457_v13, %v6267_v25  ;;  %v1723_v14 = vadd.f32 %v1722_v34, %v6268_v2  ;;  %v2103_v25 = vpop.permute.xlu1 %2102 }
 0x200   :  { %1504 = vst.msk [vmem:[#allocation2 + $0x1a8] sm:$0xff] %vm439_vm3, %v1463_v44  ;;  %1769 = vst.msk [vmem:[#allocation2 + $0x208] sm:$0xff] %vm439_vm3, %v1728_v45 }
 0x201   :  { %1503 = vst.msk [vmem:[#allocation2 + $0x1a0] sm:$0xff] %vm439_vm3, %v1458_v46  ;;  %1768 = vst.msk [vmem:[#allocation2 + $0x200] sm:$0xff] %vm439_vm3, %v1723_v14  ;;  %v4370_v35 = vpop.f32.mrb[32].mxu0  ;;  %v4390_v47 = vpop.f32.mrb[32].mxu1 }
 0x202   :  { %v1473_v20 = vadd.f32 %v4370_v35, %v6269_v57  ;;  %v1738_v48 = vadd.f32 %v4390_v47, %v6270_v36  ;;  %v1467_v37 = vpop.f32.mrb[33].mxu0  ;;  %v1732_v49 = vpop.f32.mrb[33].mxu1 }
 0x203   :  { %v1468_v38 = vadd.f32 %v1467_v37, %v6271_v15  ;;  %v1733_v27 = vadd.f32 %v1732_v49, %v5493_v63  ;;  %v2098_v46 = vpop.permute.xlu0 %2097  ;;  %v2113_v49 = vpop.permute.xlu1 %2112 }
 0x204   :  { %1506 = vst.msk [vmem:[#allocation2 + $0x1b8] sm:$0xff] %vm439_vm3, %v1473_v20  ;;  %1771 = vst.msk [vmem:[#allocation2 + $0x218] sm:$0xff] %vm439_vm3, %v1738_v48 }
 0x205   :  { %1505 = vst.msk [vmem:[#allocation2 + $0x1b0] sm:$0xff] %vm439_vm3, %v1468_v38  ;;  %1770 = vst.msk [vmem:[#allocation2 + $0x210] sm:$0xff] %vm439_vm3, %v1733_v27  ;;  %v4373_v50 = vpop.f32.mrb[34].mxu0  ;;  %v4393_v1 = vpop.f32.mrb[34].mxu1 }
 0x206   :  { %v1483_v16 = vadd.f32 %v4373_v50, %v6272_v6  ;;  %v1748_v39 = vadd.f32 %v4393_v1, %v6273_v28  ;;  %v1477_v51 = vpop.f32.mrb[35].mxu0  ;;  %v1742_v30 = vpop.f32.mrb[35].mxu1 }
 0x207   :  { %v1478_v40 = vadd.f32 %v1477_v51, %v6274_v41  ;;  %v1743_v63 = vadd.f32 %v1742_v30, %v6275_v52 }
 0x208   :  { %1508 = vst.msk [vmem:[#allocation2 + $0x1c8] sm:$0xff] %vm439_vm3, %v1483_v16  ;;  %1773 = vst.msk [vmem:[#allocation2 + $0x228] sm:$0xff] %vm439_vm3, %v1748_v39 }
 0x209   :  { %1507 = vst.msk [vmem:[#allocation2 + $0x1c0] sm:$0xff] %vm439_vm3, %v1478_v40  ;;  %1772 = vst.msk [vmem:[#allocation2 + $0x220] sm:$0xff] %vm439_vm3, %v1743_v63  ;;  %v4376_v9 = vpop.f32.mrb[36].mxu0  ;;  %v4396_v42 = vpop.f32.mrb[36].mxu1 }
 0x20a   :  { %v1493_v54 = vadd.f32 %v4376_v9, %v6276_v58  ;;  %v1758_v8 = vadd.f32 %v4396_v42, %v6277_v55  ;;  %v1487_v10 = vpop.f32.mrb[37].mxu0  ;;  %v1752_v23 = vpop.f32.mrb[37].mxu1  ;;  %v5718_v55 = vmov 0.0  }
 0x20b   :  { %v1488_v43 = vadd.f32 %v1487_v10, %v6278_v32  ;;  %v1753_v61 = vadd.f32 %v1752_v23, %v5501_v59 }
 0x20c   :  { %1510 = vst.msk [vmem:[#allocation2 + $0x1d8] sm:$0xff] %vm439_vm3, %v1493_v54  ;;  %1775 = vst.msk [vmem:[#allocation2 + $0x238] sm:$0xff] %vm439_vm3, %v1758_v8  ;;  %v5716_v54 = vmov 0.0   ;;  %v5720_v8 = vmov 0.0  }
 0x20d   :  { %1509 = vst.msk [vmem:[#allocation2 + $0x1d0] sm:$0xff] %vm439_vm3, %v1488_v43  ;;  %1774 = vst.msk [vmem:[#allocation2 + $0x230] sm:$0xff] %vm439_vm3, %v1753_v61  ;;  %v4401_v62 = vpop.f32.mrb[38].mxu0  ;;  %v4421_v33 = vpop.f32.mrb[38].mxu1 }
 0x20e   :  { %v1973_v44 = vadd.f32 %v4401_v62, %v5508_v3  ;;  %v2238_v29 = vadd.f32 %v4421_v33, %v5627_v60  ;;  %v1967_v45 = vpop.f32.mrb[39].mxu0  ;;  %v2232_v13 = vpop.f32.mrb[39].mxu1 }
 0x20f   :  { %v1968_v34 = vadd.f32 %v1967_v45, %v5510_v4  ;;  %v2233_v59 = vadd.f32 %v2232_v13, %v5629_v31 }
 0x210   :  { %2030 = vst.msk [vmem:[#allocation2 + $0x248] sm:$0xff] %vm439_vm3, %v1973_v44  ;;  %2295 = vst.msk [vmem:[#allocation2 + $0x2a8] sm:$0xff] %vm439_vm3, %v2238_v29 }
 0x211   :  { %2029 = vst.msk [vmem:[#allocation2 + $0x240] sm:$0xff] %vm439_vm3, %v1968_v34  ;;  %2294 = vst.msk [vmem:[#allocation2 + $0x2a0] sm:$0xff] %vm439_vm3, %v2233_v59  ;;  %v4404_v2 = vpop.f32.mrb[40].mxu0  ;;  %v4424_v3 = vpop.f32.mrb[40].mxu1 }
 0x212   :  { %v1983_v60 = vadd.f32 %v4404_v2, %v5527_v17  ;;  %v2248_v14 = vadd.f32 %v4424_v3, %v2083_v12  ;;  %v1977_v35 = vpop.f32.mrb[41].mxu0  ;;  %v2242_v47 = vpop.f32.mrb[41].mxu1 }
 0x213   :  { %v1978_v4 = vadd.f32 %v1977_v35, %v5529_v56  ;;  %v2243_v31 = vadd.f32 %v2242_v47, %v5647_v26  ;;  %v2108_v26 = vpop.permute.xlu0 %2107 }
 0x214   :  { %2032 = vst.msk [vmem:[#allocation2 + $0x258] sm:$0xff] %vm439_vm3, %v1983_v60  ;;  %2297 = vst.msk [vmem:[#allocation2 + $0x2b8] sm:$0xff] %vm439_vm3, %v2248_v14 }
 0x215   :  { %2031 = vst.msk [vmem:[#allocation2 + $0x250] sm:$0xff] %vm439_vm3, %v1978_v4  ;;  %2296 = vst.msk [vmem:[#allocation2 + $0x2b0] sm:$0xff] %vm439_vm3, %v2243_v31  ;;  %v4407_v57 = vpop.f32.mrb[42].mxu0  ;;  %v4427_v20 = vpop.f32.mrb[42].mxu1 }
 0x216   :  { %v1993_v36 = vadd.f32 %v4407_v57, %v5547_v0  ;;  %v2258_v17 = vadd.f32 %v4427_v20, %v2093_v53  ;;  %v1987_v12 = vpop.f32.mrb[43].mxu0  ;;  %v2252_v48 = vpop.f32.mrb[43].mxu1 }
 0x217   :  { %v1988_v37 = vadd.f32 %v1987_v12, %v5549_v19  ;;  %v2253_v56 = vadd.f32 %v2252_v48, %v2088_v7  ;;  %v2118_v52 = vpop.permute.xlu0 %2117 }
 0x218   :  { %2034 = vst.msk [vmem:[#allocation2 + $0x268] sm:$0xff] %vm439_vm3, %v1993_v36  ;;  %2299 = vst.msk [vmem:[#allocation2 + $0x2c8] sm:$0xff] %vm439_vm3, %v2258_v17 }
 0x219   :  { %2033 = vst.msk [vmem:[#allocation2 + $0x260] sm:$0xff] %vm439_vm3, %v1988_v37  ;;  %2298 = vst.msk [vmem:[#allocation2 + $0x2c0] sm:$0xff] %vm439_vm3, %v2253_v56  ;;  %v4410_v15 = vpop.f32.mrb[44].mxu0  ;;  %v4430_v38 = vpop.f32.mrb[44].mxu1 }
 0x21a   :  { %v2003_v0 = vadd.f32 %v4410_v15, %v5567_v18  ;;  %v2268_v27 = vadd.f32 %v4430_v38, %v2103_v25  ;;  %v1997_v50 = vpop.f32.mrb[45].mxu0  ;;  %v2262_v1 = vpop.f32.mrb[45].mxu1 }
 0x21b   :  { %v1998_v19 = vadd.f32 %v1997_v50, %v5569_v22  ;;  %v2263_v6 = vadd.f32 %v2262_v1, %v2098_v46  ;;  %v2123_v22 = vpop.permute.xlu1 %2122 }
 0x21c   :  { %2036 = vst.msk [vmem:[#allocation2 + $0x278] sm:$0xff] %vm439_vm3, %v2003_v0  ;;  %2301 = vst.msk [vmem:[#allocation2 + $0x2d8] sm:$0xff] %vm439_vm3, %v2268_v27 }
 0x21d   :  { %2035 = vst.msk [vmem:[#allocation2 + $0x270] sm:$0xff] %vm439_vm3, %v1998_v19  ;;  %2300 = vst.msk [vmem:[#allocation2 + $0x2d0] sm:$0xff] %vm439_vm3, %v2263_v6  ;;  %v4413_v16 = vpop.f32.mrb[46].mxu0  ;;  %v4433_v28 = vpop.f32.mrb[46].mxu1 }
 0x21e   :  { %v2013_v39 = vadd.f32 %v4413_v16, %v5587_v11  ;;  %v2278_v51 = vadd.f32 %v4433_v28, %v2113_v49  ;;  %v2007_v18 = vpop.f32.mrb[47].mxu0  ;;  %v2272_v30 = vpop.f32.mrb[47].mxu1 }
 0x21f   :  { %v2008_v41 = vadd.f32 %v2007_v18, %v5589_v24  ;;  %v2273_v40 = vadd.f32 %v2272_v30, %v2108_v26 }
 0x220   :  { %2038 = vst.msk [vmem:[#allocation2 + $0x288] sm:$0xff] %vm439_vm3, %v2013_v39  ;;  %2303 = vst.msk [vmem:[#allocation2 + $0x2e8] sm:$0xff] %vm439_vm3, %v2278_v51 }
 0x221   :  { %2037 = vst.msk [vmem:[#allocation2 + $0x280] sm:$0xff] %vm439_vm3, %v2008_v41  ;;  %2302 = vst.msk [vmem:[#allocation2 + $0x2e0] sm:$0xff] %vm439_vm3, %v2273_v40  ;;  %v4416_v63 = vpop.f32.mrb[48].mxu0  ;;  %v4436_v53 = vpop.f32.mrb[48].mxu1 }
 0x222   :  { %v2023_v11 = vadd.f32 %v4416_v63, %v5607_v5  ;;  %v2288_v7 = vadd.f32 %v4436_v53, %v2123_v22  ;;  %v2017_v9 = vpop.f32.mrb[49].mxu0  ;;  %v2282_v42 = vpop.f32.mrb[49].mxu1  ;;  %v5722_v5 = vmov 0.0  }
 0x223   :  { %v2018_v24 = vadd.f32 %v2017_v9, %v5609_v21  ;;  %v2283_v58 = vadd.f32 %v2282_v42, %v2118_v52 }
 0x224   :  { %2040 = vst.msk [vmem:[#allocation2 + $0x298] sm:$0xff] %vm439_vm3, %v2023_v11  ;;  %2305 = vst.msk [vmem:[#allocation2 + $0x2f8] sm:$0xff] %vm439_vm3, %v2288_v7 }
 0x225   :  { %2039 = vst.msk [vmem:[#allocation2 + $0x290] sm:$0xff] %vm439_vm3, %v2018_v24  ;;  %2304 = vst.msk [vmem:[#allocation2 + $0x2f0] sm:$0xff] %vm439_vm3, %v2283_v58 }
 0x226 LB: > { %v5744_v21 = vld [vmem:[%s6237_s6] sm:$0xff]  ;;  %v4842_v10 = vmov 0   ;;  %v5751_v23 = vld [vmem:[%s6237_s6 + $0x10] sm:$0xff]  ;;  %v4553_v32 = vpack.c.bf16 %v4828_v8, %v4832_v5  ;;  %v5763_v61 = vld [vmem:[%s6237_s6 + $0x8] sm:$0xff]  ;;  %v4557_v62 = vpack.c.bf16 %v4820_v54, %v4824_v55  ;;  %s3931_s14 = smul.u32 384, %s4836_s3  ;;  %s5916_s16 = sshll.u32 %s4836_s3, 2  ;;  %s4836_s3 = sphi %s5724_s3, %s2311_s3   ;;  %v4832_v5 = vphi %v5722_v5, %v3745_v5   ;;  %v4828_v8 = vphi %v5720_v8, %v3746_v8   ;;  %v4824_v55 = vphi %v5718_v55, %v3747_v55   ;;  %v4820_v54 = vphi %v5716_v54, %v3748_v54  }
 0x227   : > { %4636 = vset.pattern.permute.xlu0 %v4842_v10  ;;  %4637 = vset.pattern.permute.xlu1 %v4842_v10  ;;  %v2331_v43 = vld [vmem:[%s6236_s5] sm:$0xff]  ;;  %v5772_v33 = vld [vmem:[%s6237_s6 + $0x18] sm:$0xff]  ;;  %v5784_v29 = vld [vmem:[%s6237_s6 + $0x28] sm:$0xff]  ;;  %s4073_s19 = sshll.u32 %s4836_s3, 7  ;;  %s2679_s21 = sadd.s32 1, %s5916_s16 }
 0x228   : > { %2357 = vperm.xlu0 %4636, %v5744_v21   ;;  %2367 = vperm.xlu1 %4637, %v5751_v23   ;;  %v5779_v44 = vld [vmem:[%s6237_s6 + $0x20] sm:$0xff]  ;;  %v5789_v45 = vld [vmem:[%s6236_s5 + $0x8] sm:$0xff]  ;;  %v5795_v13 = vld [vmem:[%s6236_s5 + $0x10] sm:$0xff]  ;;  %s5903_s15 = scalar_lea.vmem [#allocation2], %s3931_s14  ;;  %s5938_s2 = scalar_lea.vmem %s6238_s7, %s4073_s19 }
 0x229   : > { %4445 = vmatprep.mubr.msk.f32.mxu0 %vm36_vm1, %v2331_v43  ;;  %4471 = vmatprep.mubr.msk.f32.mxu1 %vm36_vm1, %v2331_v43  ;;  %v2349_v34 = vld [vmem:[%s6237_s6 + $0x30] sm:$0xff]  ;;  %v2350_v59 = vld [vmem:[%s6237_s6 + $0x38] sm:$0xff]  ;;  %v5816_v46 = vld [vmem:[%s6236_s5 + $0x20] sm:$0xff]  ;;  %s3042_s26 = sadd.s32 2, %s5916_s16  ;;  %s3405_s28 = sadd.s32 3, %s5916_s16 }
 0x22a   : > { %4554 = vmatprep.subr.bf16.mxu0 %v4553_v32  ;;  %v5811_v25 = vld [vmem:[%s6236_s5 + $0x18] sm:$0xff]  ;;  %v2351_v2 = vld [vmem:[%s6237_s6 + $0x40] sm:$0xff]  ;;  %v2352_v3 = vld [vmem:[%s6237_s6 + $0x48] sm:$0xff]  ;;  %s2311_s3 = sadd.s32 1, %s4836_s3  }
 0x22b   : > { %4556 = vmatpush3.bf16.msra.mxu0 %v4553_v32  ;;  %v5831_v60 = vld [vmem:[%s6236_s5 + $0x28] sm:$0xff]  ;;  %v5836_v14 = vld [vmem:[%s6236_s5 + $0x30] sm:$0xff]  ;;  %v2354_v47 = vld [vmem:[%s6237_s6 + $0x58] sm:$0xff]  ;;  %p2308_p0 = scmp.ge.s32.totalorder %s2311_s3, 2  }
 0x22c   : > { %2362 = vperm.xlu0 %4636, %v5763_v61   ;;  %4558 = vmatprep.subr.bf16.mxu0 %v4557_v62  ;;  %v2353_v35 = vld [vmem:[%s6237_s6 + $0x50] sm:$0xff]  ;;  %v5851_v4 = vld [vmem:[%s6236_s5 + $0x38] sm:$0xff]  ;;  %v5856_v31 = vld [vmem:[%s6236_s5 + $0x40] sm:$0xff] }
 0x22d   : > { %2372 = vperm.xlu1 %4637, %v5772_v33   ;;  %v5865_v57 = vld [vmem:[%s6236_s5 + $0x48] sm:$0xff]  ;;  %v5871_v20 = vld [vmem:[%s6236_s5 + $0x50] sm:$0xff]  ;;  %v5881_v36 = vld [vmem:[%s6236_s5 + $0x58] sm:$0xff] }
 0x22e   : > { %v2320_v56 = vld [vmem:[%s5903_s15 + $0x8] sm:$0xff]  ;;  %v2319_v15 = vld [vmem:[%s5903_s15] sm:$0xff]  ;;  %v2322_v1 = vld [vmem:[%s5903_s15 + $0x18] sm:$0xff] }
 0x22f   : > { %4560 = vmatpush3.bf16.msra.mxu0 %v4557_v62  ;;  %v2321_v28 = vld [vmem:[%s5903_s15 + $0x10] sm:$0xff]  ;;  %v2324_v52 = vld [vmem:[%s5903_s15 + $0x28] sm:$0xff]  ;;  %v2323_v7 = vld [vmem:[%s5903_s15 + $0x20] sm:$0xff] }
 0x230   : > { %2377 = vperm.xlu0 %4636, %v5779_v44   ;;  %v2326_v32 = vld [vmem:[%s5903_s15 + $0x38] sm:$0xff] }
 0x231   : > { %2382 = vperm.xlu1 %4637, %v5784_v29  }
 0x232   : > { %4446 = vmatmul.mubr.msk.f32.vlgmr.msra.gmra.mrb[0].mxu0 %vm36_vm1, %v5789_v45 }
 0x233   : > { %4448 = vmatprep.mubr.msk.f32.mxu0 %vm36_vm1, %v5795_v13 }
 0x234   : > { %2387 = vperm.xlu0 %4636, %v2349_v34  }
 0x235   : > { %2392 = vperm.xlu1 %4637, %v2350_v59  }
 0x236   : > { %4449 = vmatmul.mubr.msk.f32.gmra.mrb[2].mxu0 %vm36_vm1, %v5811_v25 }
 0x237   : > { %4451 = vmatprep.mubr.msk.f32.mxu0 %vm36_vm1, %v5816_v46 }
 0x238   : > { %2397 = vperm.xlu0 %4636, %v2351_v2  }
 0x239   : > { %2402 = vperm.xlu1 %4637, %v2352_v3  }
 0x23a   : > { %4452 = vmatmul.mubr.msk.f32.gmra.mrb[4].mxu0 %vm36_vm1, %v5831_v60 }
 0x23b   : > { %4454 = vmatprep.mubr.msk.f32.mxu0 %vm36_vm1, %v5836_v14 }
 0x23c   : > { %2407 = vperm.xlu0 %4636, %v2353_v35  }
 0x23d   : > { %2412 = vperm.xlu1 %4637, %v2354_v47  }
 0x23e   : > { %4455 = vmatmul.mubr.msk.f32.gmra.mrb[6].mxu0 %vm36_vm1, %v5851_v4 }
 0x23f   : > { %4457 = vmatprep.mubr.msk.f32.mxu0 %vm36_vm1, %v5856_v31 }
 0x240   : > { %2720 = vperm.xlu0 %4636, %v5744_v21  }
 0x241   : > { %2725 = vperm.xlu1 %4637, %v5763_v61  }
 0x242   : > { %4458 = vmatmul.mubr.msk.f32.gmra.mrb[8].mxu0 %vm36_vm1, %v5865_v57 }
 0x243   : > { %4460 = vmatprep.mubr.msk.f32.mxu0 %vm36_vm1, %v5871_v20 }
 0x244   : > { %2730 = vperm.xlu0 %4636, %v5751_v23  }
 0x245   : > { %2735 = vperm.xlu1 %4637, %v5772_v33  }
 0x246   : > { %4461 = vmatmul.mubr.msk.f32.gmra.mrb[10].mxu0 %vm36_vm1, %v5881_v36 }
 0x247   : > { %4497 = vmatprep.mubr.msk.f32.mxu0 %vm36_vm1, %v2331_v43 }
 0x248   : > { %2740 = vperm.xlu0 %4636, %v5779_v44  }
 0x249   : > { %2745 = vperm.xlu1 %4637, %v5784_v29  }
 0x24c   : > { %2750 = vperm.xlu0 %4636, %v2349_v34  }
 0x24d   : > { %2755 = vperm.xlu1 %4637, %v2350_v59  }
 0x250   : > { %2760 = vperm.xlu0 %4636, %v2351_v2  }
 0x251   : > { %2765 = vperm.xlu1 %4637, %v2352_v3  }
 0x254   : > { %2770 = vperm.xlu0 %4636, %v2353_v35  }
 0x255   : > { %2775 = vperm.xlu1 %4637, %v2354_v47  }
 0x258   : > { %3083 = vperm.xlu0 %4636, %v5744_v21  }
 0x259   : > { %3088 = vperm.xlu1 %4637, %v5763_v61  }
 0x25c   : > { %3093 = vperm.xlu0 %4636, %v5751_v23  }
 0x25d   : > { %3098 = vperm.xlu1 %4637, %v5772_v33  }
 0x260   : > { %3103 = vperm.xlu0 %4636, %v5779_v44  }
 0x261   : > { %3108 = vperm.xlu1 %4637, %v5784_v29  }
 0x264   : > { %3113 = vperm.xlu0 %4636, %v2349_v34  }
 0x265   : > { %3118 = vperm.xlu1 %4637, %v2350_v59  }
 0x268   : > { %3123 = vperm.xlu0 %4636, %v2351_v2  }
 0x269   : > { %3128 = vperm.xlu1 %4637, %v2352_v3  }
 0x26c   : > { %3133 = vperm.xlu0 %4636, %v2353_v35  }
 0x26d   : > { %3138 = vperm.xlu1 %4637, %v2354_v47  }
 0x270   : > { %3446 = vperm.xlu0 %4636, %v5744_v21  }
 0x271   : > { %3451 = vperm.xlu1 %4637, %v5763_v61  }
 0x274   : > { %3456 = vperm.xlu0 %4636, %v5751_v23  }
 0x275   : > { %3461 = vperm.xlu1 %4637, %v5772_v33  }
 0x278   : > { %3466 = vperm.xlu0 %4636, %v5779_v44   ;;  %v2325_v44 = vld [vmem:[%s5903_s15 + $0x30] sm:$0xff] }
 0x279   : > { %3471 = vperm.xlu1 %4637, %v5784_v29  }
 0x27c   : > { %3476 = vperm.xlu0 %4636, %v2349_v34  }
 0x27d   : > { %3481 = vperm.xlu1 %4637, %v2350_v59  }
 0x280   : > { %3486 = vperm.xlu0 %4636, %v2351_v2  }
 0x281   : > { %3491 = vperm.xlu1 %4637, %v2352_v3  }
 0x284   : > { %3496 = vperm.xlu0 %4636, %v2353_v35  }
 0x285   : > { %3501 = vperm.xlu1 %4637, %v2354_v47  }
 0x2a7   : > { %v2358_v17 = vpop.permute.xlu0 %2357  ;;  %v2368_v12 = vpop.permute.xlu1 %2367 }
 0x2ab   : > { %v2363_v48 = vpop.permute.xlu0 %2362 }
 0x2ac   : > { %v2373_v37 = vpop.permute.xlu1 %2372 }
 0x2af   : > { %v2378_v41 = vpop.permute.xlu0 %2377 }
 0x2b0   : > { %v2383_v51 = vpop.permute.xlu1 %2382 }
 0x2b3   : > { %v2388_v61 = vpop.permute.xlu0 %2387 }
 0x2b4   : > { %v2393_v21 = vpop.permute.xlu1 %2392 }
 0x305   : > { %v4447_v49 = vpop.f32.mrb[0].mxu0 }
 0x306   : > { %v2523_v26 = vadd.f32 %v4447_v49, %v2363_v48  ;;  %v2517_v38 = vpop.f32.mrb[1].mxu0 }
 0x307   : > { %v2518_v0 = vadd.f32 %v2517_v38, %v2358_v17 }
 0x308   : > { %v2577_v27 = vadd.f32 %v2523_v26, %v2320_v56 }
 0x309   : > { %v2576_v50 = vadd.f32 %v2518_v0, %v2319_v15  ;;  %v4450_v19 = vpop.f32.mrb[2].mxu0 }
 0x30a   : > { %v3945_v6 = vmul.f32 -1.442695, %v2577_v27  ;;  %v2533_v16 = vadd.f32 %v4450_v19, %v2373_v37  ;;  %v2527_v39 = vpop.f32.mrb[3].mxu0 }
 0x30b   : > { %v3944_v18 = vmul.f32 -1.442695, %v2576_v50  ;;  %v2528_v30 = vadd.f32 %v2527_v39, %v2368_v12 }
 0x30c   : > { %4638 = vpow2.f32 %v3945_v6  ;;  %v2579_v40 = vadd.f32 %v2533_v16, %v2322_v1  ;;  %v2403_v6 = vpop.permute.xlu1 %2402  ;;  %v2398_v16 = vpop.permute.xlu0 %2397 }
 0x30d   : > { %4640 = vpow2.f32 %v3944_v18  ;;  %v2578_v22 = vadd.f32 %v2528_v30, %v2321_v28  ;;  %v4453_v63 = vpop.f32.mrb[4].mxu0 }
 0x30e   : > { %v3947_v53 = vmul.f32 -1.442695, %v2579_v40  ;;  %v2543_v11 = vadd.f32 %v4453_v63, %v2383_v51  ;;  %v2537_v9 = vpop.f32.mrb[5].mxu0  ;;  %v2328_v40 = vld [vmem:[%s5903_s15 + $0x48] sm:$0xff] }
 0x30f   : > { %v3946_v42 = vmul.f32 -1.442695, %v2578_v22  ;;  %v2538_v24 = vadd.f32 %v2537_v9, %v2378_v41 }
 0x310   : > { %4642 = vpow2.f32 %v3947_v53  ;;  %v2605_v58 = vadd.f32 %v2543_v11, %v2324_v52  ;;  %v2327_v53 = vld [vmem:[%s5903_s15 + $0x40] sm:$0xff]  ;;  %v2413_v9 = vpop.permute.xlu1 %2412 }
 0x311   : > { %4644 = vpow2.f32 %v3946_v42  ;;  %v2604_v23 = vadd.f32 %v2538_v24, %v2323_v7  ;;  %v4456_v43 = vpop.f32.mrb[6].mxu0  ;;  %v2664_v7 = vlaneseq  ;;  %v2408_v24 = vpop.permute.xlu0 %2407 }
 0x312   : > { %v3949_v62 = vmul.f32 -1.442695, %v2605_v58  ;;  %v2553_v33 = vadd.f32 %v4456_v43, %v2393_v21  ;;  %v2547_v29 = vpop.f32.mrb[7].mxu0 }
 0x313   : > { %v3948_v34 = vmul.f32 -1.442695, %v2604_v23  ;;  %v2548_v59 = vadd.f32 %v2547_v29, %v2388_v61  ;;  %v2330_v61 = vld [vmem:[%s5903_s15 + $0x58] sm:$0xff]  ;;  %v2329_v29 = vld [vmem:[%s5903_s15 + $0x50] sm:$0xff] }
 0x314   : > { %4646 = vpow2.f32 %v3949_v62  ;;  %v2607_v2 = vadd.f32 %v2553_v33, %v2326_v32 }
 0x315   : > { %4648 = vpow2.f32 %v3948_v34  ;;  %v2606_v3 = vadd.f32 %v2548_v59, %v2325_v44  ;;  %v4459_v35 = vpop.f32.mrb[8].mxu0  ;;  %v2660_v34 = vld [vmem:[%s6235_s0] sm:$0x1]  ;;  %v2661_v59 = vstv %s5916_s16 }
 0x316   : > { %v4639_v47 = vpop.eup %4638  ;;  %v3951_v17 = vmul.f32 -1.442695, %v2607_v2  ;;  %v2557_v12 = vpop.f32.mrb[9].mxu0  ;;  %v2563_v18 = vadd.f32 %v4459_v35, %v2403_v6  ;;  %v2665_v2 = vshrl.u32 %v2664_v7, 7  ;;  %vm2662_vm4 = vcmp.lt.s32.totalorder %v2661_v59, %v2660_v34  ;;  %v3958_v34 = vld [vmem:[%s5903_s15 + $0x78] sm:$0xff] }
 0x317   : > { %v4641_v48 = vpop.eup %4640  ;;  %v2593_v37 = vadd.f32 1.0, %v4639_v47  ;;  %v3950_v56 = vmul.f32 -1.442695, %v2606_v3  ;;  %v2558_v22 = vadd.f32 %v2557_v12, %v2398_v16  ;;  %v2663_v12 = vsel %vm2662_vm4, 1, %v4842_v10 }
 0x318   : > { %v2592_v49 = vadd.f32 1.0, %v4641_v48  ;;  %4650 = vpow2.f32 %v3951_v17  ;;  %v5924_v17 = vsub.s32 0, %v2665_v2 }
 0x319   : > { %4652 = vrcp.f32 %v2593_v37  ;;  %v4462_v26 = vpop.f32.mrb[10].mxu0 }
 0x31a   : > { %v4643_v15 = vpop.eup %4642  ;;  %4654 = vrcp.f32 %v2592_v49  ;;  %v2567_v38 = vpop.f32.mrb[11].mxu0  ;;  %v2573_v23 = vadd.f32 %v4462_v26, %v2413_v9  ;;  %v2667_v49 = vrot.slane %v2663_v12, %v5924_v17 }
 0x31b   : > { %v4645_v0 = vpop.eup %4644  ;;  %v2595_v27 = vadd.f32 1.0, %v4643_v15  ;;  %4656 = vpow2.f32 %v3950_v56  ;;  %v2568_v62 = vadd.f32 %v2567_v38, %v2408_v24  ;;  %v2721_v24 = vpop.permute.xlu0 %2720 }
 0x31c   : > { %v2594_v50 = vadd.f32 1.0, %v4645_v0  ;;  %vm5931_vm5 = vcmp.eq.s32.totalorder %v2667_v49, 1 }
 0x31d   : > { %4658 = vrcp.f32 %v2595_v27 }
 0x31e   : > { %v4647_v1 = vpop.eup %4646  ;;  %4660 = vrcp.f32 %v2594_v50 }
 0x31f   : > { %v4649_v19 = vpop.eup %4648  ;;  %v2621_v28 = vadd.f32 1.0, %v4647_v1 }
 0x320   : > { %v2620_v51 = vadd.f32 1.0, %v4649_v19 }
 0x321   : > { %4662 = vrcp.f32 %v2621_v28 }
 0x322   : > { %v4651_v39 = vpop.eup %4650  ;;  %4664 = vrcp.f32 %v2620_v51 }
 0x323   : > { %v4653_v30 = vpop.eup %4652  ;;  %v2623_v41 = vadd.f32 1.0, %v4651_v39 }
 0x324   : > { %v4655_v52 = vpop.eup %4654  ;;  %v2633_v63 = vmul.f32 %v4653_v30, %v2563_v18 }
 0x325   : > { %v4657_v11 = vpop.eup %4656  ;;  %v2632_v42 = vmul.f32 %v4655_v52, %v2558_v22  ;;  %4666 = vrcp.f32 %v2623_v41 }
 0x326   : > { %v2622_v58 = vadd.f32 1.0, %v4657_v11  ;;  %v2637_v21 = vadd.f32 %v2633_v63, %v2328_v40 }
 0x327   : > { %v4659_v32 = vpop.eup %4658  ;;  %v2636_v43 = vadd.f32 %v2632_v42, %v2327_v53  ;;  %v2726_v42 = vpop.permute.xlu1 %2725 }
 0x328   : > { %v4661_v33 = vpop.eup %4660  ;;  %4668 = vrcp.f32 %v2622_v58  ;;  %v2635_v44 = vmul.f32 %v4659_v32, %v2573_v23  ;;  %v2731_v32 = vpop.permute.xlu0 %2730 }
 0x329   : > { %4670 = vtanh.f32 %v2637_v21  ;;  %v2634_v3 = vmul.f32 %v4661_v33, %v2568_v62  ;;  %v3956_v21 = vld [vmem:[%s5903_s15 + $0x68] sm:$0xff] }
 0x32a   : > { %4672 = vtanh.f32 %v2636_v43  ;;  %v2639_v35 = vadd.f32 %v2635_v44, %v2330_v61  ;;  %v3955_v61 = vld [vmem:[%s5903_s15 + $0x60] sm:$0xff] }
 0x32b   : > { %v2638_v47 = vadd.f32 %v2634_v3, %v2329_v29  ;;  %v4663_v48 = vpop.eup %4662  ;;  %v2736_v58 = vpop.permute.xlu1 %2735 }
 0x32c   : > { %4674 = vtanh.f32 %v2639_v35  ;;  %v4665_v37 = vpop.eup %4664  ;;  %v2645_v15 = vsub.f32 1.0, %v4663_v48  ;;  %v2653_v1 = vmul.f32 %v4828_v8, %v4663_v48  ;;  %v3957_v35 = vld [vmem:[%s5903_s15 + $0x70] sm:$0xff] }
 0x32d   : > { %4676 = vtanh.f32 %v2638_v47  ;;  %v2644_v0 = vsub.f32 1.0, %v4665_v37  ;;  %v2652_v6 = vmul.f32 %v4832_v5, %v4665_v37 }
 0x32f   : > { %v4667_v56 = vpop.eup %4666  ;;  %v2746_v12 = vpop.permute.xlu1 %2745 }
 0x330   : > { %v2647_v28 = vsub.f32 1.0, %v4667_v56  ;;  %v2655_v41 = vmul.f32 %v4820_v54, %v4667_v56  ;;  %v2741_v56 = vpop.permute.xlu0 %2740 }
 0x332   : > { %v4669_v26 = vpop.eup %4668 }
 0x333   : > { %v4671_v38 = vpop.eup %4670  ;;  %v2646_v18 = vsub.f32 1.0, %v4669_v26  ;;  %v2654_v52 = vmul.f32 %v4824_v55, %v4669_v26 }
 0x334   : > { %v4673_v27 = vpop.eup %4672  ;;  %v2649_v50 = vmul.f32 %v4671_v38, %v2645_v15  ;;  %v3960_v15 = vld [vmem:[%s5903_s15 + $0x88] sm:$0xff] }
 0x335   : > { %v2648_v19 = vmul.f32 %v4673_v27, %v2644_v0 }
 0x336   : > { %v4675_v39 = vpop.eup %4674  ;;  %v5940_v51 = vadd.f32 %v2653_v1, %v2649_v50  ;;  %v3959_v50 = vld [vmem:[%s5903_s15 + $0x80] sm:$0xff] }
 0x337   : > { %v4677_v8 = vpop.eup %4676  ;;  %v5942_v30 = vadd.f32 %v2652_v6, %v2648_v19  ;;  %v2651_v5 = vmul.f32 %v4675_v39, %v2647_v28  ;;  %v2756_v28 = vpop.permute.xlu1 %2755 }
 0x338   : > { %v2670_v40 = vsel %vm5931_vm5, %v5940_v51, 0.0  ;;  %v2650_v22 = vmul.f32 %v4677_v8, %v2646_v18  ;;  %v3962_v18 = vld [vmem:[%s5903_s15 + $0x98] sm:$0xff] }
 0x339   : > { %v2669_v63 = vsel %vm5931_vm5, %v5942_v30, 0.0  ;;  %2676 = vst.msk [vmem:[%s5938_s2 + $0x8] sm:$0xff] %vm439_vm3, %v2670_v40  ;;  %v4561_v53 = vpack.c.bf16 %v5940_v51, %v5942_v30  ;;  %v5956_v11 = vadd.f32 %v2655_v41, %v2651_v5  ;;  %v2751_v5 = vpop.permute.xlu0 %2750 }
 0x33a   : > { %2675 = vst.msk [vmem:[%s5938_s2] sm:$0xff] %vm439_vm3, %v2669_v63  ;;  %v5960_v54 = vadd.f32 %v2654_v52, %v2650_v22  ;;  %v3961_v22 = vld [vmem:[%s5903_s15 + $0x90] sm:$0xff] }
 0x33b   : > { %4562 = vmatprep.subr.bf16.mxu1 %v4561_v53  ;;  %v2672_v55 = vsel %vm5931_vm5, %v5956_v11, 0.0 }
 0x33c   : > { %4564 = vmatpush3.bf16.msra.mxu1 %v4561_v53  ;;  %v2671_v7 = vsel %vm5931_vm5, %v5960_v54, 0.0  ;;  %2678 = vst.msk [vmem:[%s5938_s2 + $0x18] sm:$0xff] %vm439_vm3, %v2672_v55  ;;  %v4565_v9 = vpack.c.bf16 %v5956_v11, %v5960_v54 }
 0x33d   : > { %2677 = vst.msk [vmem:[%s5938_s2 + $0x10] sm:$0xff] %vm439_vm3, %v2671_v7 }
 0x33e   : > { %4566 = vmatprep.subr.bf16.mxu1 %v4565_v9 }
 0x340   : > { %4568 = vmatpush3.bf16.msra.mxu1 %v4565_v9 }
 0x343   : > { %4472 = vmatmul.mubr.msk.f32.vlgmr.msra.gmra.mrb[0].mxu1 %vm36_vm1, %v5789_v45 }
 0x344   : > { %4474 = vmatprep.mubr.msk.f32.mxu1 %vm36_vm1, %v5795_v13 }
 0x347   : > { %4475 = vmatmul.mubr.msk.f32.gmra.mrb[2].mxu1 %vm36_vm1, %v5811_v25 }
 0x348   : > { %4477 = vmatprep.mubr.msk.f32.mxu1 %vm36_vm1, %v5816_v46 }
 0x34b   : > { %4478 = vmatmul.mubr.msk.f32.gmra.mrb[4].mxu1 %vm36_vm1, %v5831_v60 }
 0x34c   : > { %4480 = vmatprep.mubr.msk.f32.mxu1 %vm36_vm1, %v5836_v14 }
 0x34f   : > { %4481 = vmatmul.mubr.msk.f32.gmra.mrb[6].mxu1 %vm36_vm1, %v5851_v4 }
 0x350   : > { %4483 = vmatprep.mubr.msk.f32.mxu1 %vm36_vm1, %v5856_v31 }
 0x353   : > { %4484 = vmatmul.mubr.msk.f32.gmra.mrb[8].mxu1 %vm36_vm1, %v5865_v57 }
 0x354   : > { %4486 = vmatprep.mubr.msk.f32.mxu1 %vm36_vm1, %v5871_v20 }
 0x357   : > { %4487 = vmatmul.mubr.msk.f32.gmra.mrb[10].mxu1 %vm36_vm1, %v5881_v36 }
 0x416   : > { %v4473_v23 = vpop.f32.mrb[0].mxu1 }
 0x417   : > { %v2886_v43 = vadd.f32 %v4473_v23, %v2726_v42  ;;  %v2880_v62 = vpop.f32.mrb[1].mxu1 }
 0x418   : > { %v2881_v33 = vadd.f32 %v2880_v62, %v2721_v24 }
 0x419   : > { %v2940_v44 = vadd.f32 %v3956_v21, %v2886_v43 }
 0x41a   : > { %v2939_v29 = vadd.f32 %v3955_v61, %v2881_v33  ;;  %v4476_v59 = vpop.f32.mrb[2].mxu1 }
 0x41b   : > { %v3980_v2 = vmul.f32 -1.442695, %v2940_v44  ;;  %v2896_v3 = vadd.f32 %v4476_v59, %v2736_v58  ;;  %v2890_v47 = vpop.f32.mrb[3].mxu1 }
 0x41c   : > { %v3979_v48 = vmul.f32 -1.442695, %v2939_v29  ;;  %v2891_v37 = vadd.f32 %v2890_v47, %v2731_v32 }
 0x41d   : > { %4678 = vpow2.f32 %v3980_v2  ;;  %v2942_v49 = vadd.f32 %v3958_v34, %v2896_v3  ;;  %v2766_v3 = vpop.permute.xlu1 %2765 }
 0x41e   : > { %4680 = vpow2.f32 %v3979_v48  ;;  %v2941_v26 = vadd.f32 %v3957_v35, %v2891_v37  ;;  %v4479_v38 = vpop.f32.mrb[4].mxu1  ;;  %v2761_v35 = vpop.permute.xlu0 %2760 }
 0x41f   : > { %v3982_v0 = vmul.f32 -1.442695, %v2942_v49  ;;  %v2906_v27 = vadd.f32 %v4479_v38, %v2746_v12  ;;  %v2900_v1 = vpop.f32.mrb[5].mxu1 }
 0x420   : > { %v3981_v19 = vmul.f32 -1.442695, %v2941_v26  ;;  %v2901_v6 = vadd.f32 %v2900_v1, %v2741_v56  ;;  %v3964_v26 = vld [vmem:[%s5903_s15 + $0xa8] sm:$0xff] }
 0x421   : > { %4682 = vpow2.f32 %v3982_v0  ;;  %v2968_v16 = vadd.f32 %v3960_v15, %v2906_v27  ;;  %v3963_v27 = vld [vmem:[%s5903_s15 + $0xa0] sm:$0xff]  ;;  %v2776_v1 = vpop.permute.xlu1 %2775 }
 0x422   : > { %4684 = vpow2.f32 %v3981_v19  ;;  %v2967_v39 = vadd.f32 %v3959_v50, %v2901_v6  ;;  %v4482_v8 = vpop.f32.mrb[6].mxu1  ;;  %v2771_v6 = vpop.permute.xlu0 %2770 }
 0x423   : > { %v3984_v41 = vmul.f32 -1.442695, %v2968_v16  ;;  %v2916_v40 = vadd.f32 %v4482_v8, %v2756_v28  ;;  %v2910_v52 = vpop.f32.mrb[7].mxu1 }
 0x424   : > { %v3983_v63 = vmul.f32 -1.442695, %v2967_v39  ;;  %v2911_v53 = vadd.f32 %v2910_v52, %v2751_v5  ;;  %v3966_v5 = vld [vmem:[%s5903_s15 + $0xb8] sm:$0xff]  ;;  %v3024_v52 = vstv %s2679_s21 }
 0x425   : > { %4686 = vpow2.f32 %v3984_v41  ;;  %v2970_v55 = vadd.f32 %v3962_v18, %v2916_v40 }
 0x426   : > { %4688 = vpow2.f32 %v3983_v63  ;;  %v2969_v7 = vadd.f32 %v3961_v22, %v2911_v53  ;;  %v4485_v9 = vpop.f32.mrb[8].mxu1  ;;  %v3023_v22 = vld [vmem:[%s6235_s0] sm:$0x1]  ;;  %v3965_v53 = vld [vmem:[%s5903_s15 + $0xb0] sm:$0xff] }
 0x427   : > { %v4679_v42 = vpop.eup %4678  ;;  %v3986_v24 = vmul.f32 -1.442695, %v2970_v55  ;;  %v2920_v58 = vpop.f32.mrb[9].mxu1  ;;  %v2926_v37 = vadd.f32 %v4485_v9, %v2766_v3  ;;  %vm3025_vm6 = vcmp.lt.s32.totalorder %v3024_v52, %v3023_v22 }
 0x428   : > { %v4681_v21 = vpop.eup %4680  ;;  %v2956_v23 = vadd.f32 1.0, %v4679_v42  ;;  %v3985_v32 = vmul.f32 -1.442695, %v2969_v7  ;;  %v2921_v15 = vadd.f32 %v2920_v58, %v2761_v35  ;;  %v3026_v42 = vsel %vm3025_vm6, 1, %v4842_v10 }
 0x429   : > { %v2955_v43 = vadd.f32 1.0, %v4681_v21  ;;  %4690 = vpow2.f32 %v3986_v24 }
 0x42a   : > { %4692 = vrcp.f32 %v2956_v23  ;;  %v4488_v61 = vpop.f32.mrb[10].mxu1  ;;  %v3030_v23 = vrot.slane %v3026_v42, %v5924_v17  ;;  %v3999_v42 = vld [vmem:[%s5903_s15 + $0xe0] sm:$0xff] }
 0x42b   : > { %v4683_v62 = vpop.eup %4682  ;;  %4694 = vrcp.f32 %v2955_v43  ;;  %v2930_v33 = vpop.f32.mrb[11].mxu1  ;;  %v2936_v39 = vadd.f32 %v4488_v61, %v2776_v1 }
 0x42c   : > { %v4685_v44 = vpop.eup %4684  ;;  %v2958_v29 = vadd.f32 1.0, %v4683_v62  ;;  %4696 = vpow2.f32 %v3985_v32  ;;  %v2931_v41 = vadd.f32 %v2930_v33, %v2771_v6  ;;  %vm6016_vm7 = vcmp.eq.s32.totalorder %v3030_v23, 1  ;;  %v3998_v6 = vld [vmem:[%s5903_s15 + $0xd8] sm:$0xff] }
 0x42d   : > { %v2957_v34 = vadd.f32 1.0, %v4685_v44 }
 0x42e   : > { %4698 = vrcp.f32 %v2958_v29 }
 0x42f   : > { %v4687_v59 = vpop.eup %4686  ;;  %4700 = vrcp.f32 %v2957_v34 }
 0x430   : > { %v4689_v2 = vpop.eup %4688  ;;  %v2984_v47 = vadd.f32 1.0, %v4687_v59 }
 0x431   : > { %v2983_v48 = vadd.f32 1.0, %v4689_v2 }
 0x432   : > { %4702 = vrcp.f32 %v2984_v47 }
 0x433   : > { %v4691_v12 = vpop.eup %4690  ;;  %4704 = vrcp.f32 %v2983_v48 }
 0x434   : > { %v4693_v56 = vpop.eup %4692  ;;  %v2986_v49 = vadd.f32 1.0, %v4691_v12 }
 0x435   : > { %v4695_v38 = vpop.eup %4694  ;;  %v2996_v0 = vmul.f32 %v4693_v56, %v2926_v37 }
 0x436   : > { %v4697_v50 = vpop.eup %4696  ;;  %v2995_v19 = vmul.f32 %v4695_v38, %v2921_v15  ;;  %4706 = vrcp.f32 %v2986_v49 }
 0x437   : > { %v2985_v16 = vadd.f32 1.0, %v4697_v50  ;;  %v3000_v28 = vadd.f32 %v3964_v26, %v2996_v0 }
 0x438   : > { %v4699_v18 = vpop.eup %4698  ;;  %v2999_v8 = vadd.f32 %v3963_v27, %v2995_v19 }
 0x439   : > { %v4701_v40 = vpop.eup %4700  ;;  %4708 = vrcp.f32 %v2985_v16  ;;  %v2998_v63 = vmul.f32 %v4699_v18, %v2936_v39  ;;  %v3997_v18 = vld [vmem:[%s5903_s15 + $0xd0] sm:$0xff] }
 0x43a   : > { %4710 = vtanh.f32 %v3000_v28  ;;  %v2997_v55 = vmul.f32 %v4701_v40, %v2931_v41 }
 0x43b   : > { %4712 = vtanh.f32 %v2999_v8  ;;  %v3002_v7 = vadd.f32 %v3966_v5, %v2998_v63 }
 0x43c   : > { %v3001_v9 = vadd.f32 %v3965_v53, %v2997_v55  ;;  %v4703_v24 = vpop.eup %4702  ;;  %v4000_v53 = vld [vmem:[%s5903_s15 + $0xe8] sm:$0xff] }
 0x43d   : > { %4714 = vtanh.f32 %v3002_v7  ;;  %v4705_v58 = vpop.eup %4704  ;;  %v3008_v43 = vsub.f32 1.0, %v4703_v24  ;;  %v3016_v29 = vmul.f32 %v4703_v24, %v5940_v51 }
 0x43e   : > { %4716 = vtanh.f32 %v3001_v9  ;;  %v3007_v62 = vsub.f32 1.0, %v4705_v58  ;;  %v3015_v59 = vmul.f32 %v4705_v58, %v5942_v30 }
 0x440   : > { %v4707_v21 = vpop.eup %4706 }
 0x441   : > { %v3010_v3 = vsub.f32 1.0, %v4707_v21  ;;  %v3018_v51 = vmul.f32 %v4707_v21, %v5956_v11 }
 0x443   : > { %v4709_v32 = vpop.eup %4708 }
 0x444   : > { %v4711_v61 = vpop.eup %4710  ;;  %v3009_v12 = vsub.f32 1.0, %v4709_v32  ;;  %v3017_v26 = vmul.f32 %v4709_v32, %v5960_v54 }
 0x445   : > { %v4713_v33 = vpop.eup %4712  ;;  %v3012_v44 = vmul.f32 %v4711_v61, %v3008_v43  ;;  %v4002_v61 = vld [vmem:[%s5903_s15 + $0xf8] sm:$0xff] }
 0x446   : > { %v3011_v34 = vmul.f32 %v4713_v33, %v3007_v62 }
 0x447   : > { %v4715_v35 = vpop.eup %4714  ;;  %v6020_v47 = vadd.f32 %v3016_v29, %v3012_v44 }
 0x448   : > { %v4717_v48 = vpop.eup %4716  ;;  %v6022_v37 = vadd.f32 %v3015_v59, %v3011_v34  ;;  %v3014_v56 = vmul.f32 %v4715_v35, %v3010_v3  ;;  %v4001_v34 = vld [vmem:[%s5903_s15 + $0xf0] sm:$0xff] }
 0x449   : > { %v3033_v30 = vsel %vm6016_vm7, %v6020_v47, 0.0  ;;  %v3013_v49 = vmul.f32 %v4717_v48, %v3009_v12 }
 0x44a   : > { %v3032_v15 = vsel %vm6016_vm7, %v6022_v37, 0.0  ;;  %3990 = vst.msk [vmem:[%s5938_s2 + $0x28] sm:$0xff] %vm439_vm3, %v3033_v30  ;;  %v4569_v38 = vpack.c.bf16 %v6020_v47, %v6022_v37  ;;  %v6036_v0 = vadd.f32 %v3018_v51, %v3014_v56 }
 0x44b   : > { %3989 = vst.msk [vmem:[%s5938_s2 + $0x20] sm:$0xff] %vm439_vm3, %v3032_v15  ;;  %v6040_v11 = vadd.f32 %v3017_v26, %v3013_v49 }
 0x44c   : > { %4570 = vmatprep.subr.bf16.mxu0 %v4569_v38  ;;  %v3035_v54 = vsel %vm6016_vm7, %v6036_v0, 0.0 }
 0x44d   : > { %4572 = vmatpush3.bf16.msra.mxu0 %v4569_v38  ;;  %v3034_v27 = vsel %vm6016_vm7, %v6040_v11, 0.0  ;;  %3992 = vst.msk [vmem:[%s5938_s2 + $0x38] sm:$0xff] %vm439_vm3, %v3035_v54  ;;  %v4573_v50 = vpack.c.bf16 %v6036_v0, %v6040_v11 }
 0x44e   : > { %3991 = vst.msk [vmem:[%s5938_s2 + $0x30] sm:$0xff] %vm439_vm3, %v3034_v27 }
 0x44f   : > { %4574 = vmatprep.subr.bf16.mxu0 %v4573_v50 }
 0x451   : > { %4576 = vmatpush3.bf16.msra.mxu0 %v4573_v50 }
 0x454   : > { %4498 = vmatmul.mubr.msk.f32.vlgmr.msra.gmra.mrb[12].mxu0 %vm36_vm1, %v5789_v45  ;;  %v3420_v45 = vld [vmem:[%s6236_s5] sm:$0xff] }
 0x455   : > { %4500 = vmatprep.mubr.msk.f32.mxu0 %vm36_vm1, %v5795_v13  ;;  %4523 = vmatprep.mubr.msk.f32.mxu1 %vm36_vm1, %v3420_v45  ;;  %v3089_v13 = vpop.permute.xlu1 %3088 }
 0x458   : > { %4501 = vmatmul.mubr.msk.f32.gmra.mrb[14].mxu0 %vm36_vm1, %v5811_v25  ;;  %v3084_v25 = vpop.permute.xlu0 %3083 }
 0x459   : > { %4503 = vmatprep.mubr.msk.f32.mxu0 %vm36_vm1, %v5816_v46  ;;  %v3099_v46 = vpop.permute.xlu1 %3098 }
 0x45c   : > { %4504 = vmatmul.mubr.msk.f32.gmra.mrb[16].mxu0 %vm36_vm1, %v5831_v60  ;;  %v3996_v60 = vld [vmem:[%s5903_s15 + $0xc8] sm:$0xff] }
 0x45d   : > { %4506 = vmatprep.mubr.msk.f32.mxu0 %vm36_vm1, %v5836_v14  ;;  %v3109_v5 = vpop.permute.xlu1 %3108 }
 0x460   : > { %4507 = vmatmul.mubr.msk.f32.gmra.mrb[18].mxu0 %vm36_vm1, %v5851_v4  ;;  %v3094_v4 = vpop.permute.xlu0 %3093 }
 0x461   : > { %4509 = vmatprep.mubr.msk.f32.mxu0 %vm36_vm1, %v5856_v31  ;;  %v3119_v32 = vpop.permute.xlu1 %3118 }
 0x464   : > { %4510 = vmatmul.mubr.msk.f32.gmra.mrb[20].mxu0 %vm36_vm1, %v5865_v57  ;;  %v3995_v57 = vld [vmem:[%s5903_s15 + $0xc0] sm:$0xff]  ;;  %v3104_v22 = vpop.permute.xlu0 %3103 }
 0x465   : > { %4512 = vmatprep.mubr.msk.f32.mxu0 %vm36_vm1, %v5871_v20 }
 0x468   : > { %4513 = vmatmul.mubr.msk.f32.gmra.mrb[22].mxu0 %vm36_vm1, %v5881_v36  ;;  %v3114_v33 = vpop.permute.xlu0 %3113 }
 0x527   : > { %v4499_v14 = vpop.f32.mrb[12].mxu0 }
 0x528   : > { %v3249_v31 = vadd.f32 %v4499_v14, %v3089_v13  ;;  %v3243_v20 = vpop.f32.mrb[13].mxu0  ;;  %v3129_v14 = vpop.permute.xlu1 %3128 }
 0x529   : > { %v3244_v1 = vadd.f32 %v3243_v20, %v3084_v25 }
 0x52a   : > { %v3303_v19 = vadd.f32 %v3996_v60, %v3249_v31 }
 0x52b   : > { %v3302_v36 = vadd.f32 %v3995_v57, %v3244_v1  ;;  %v4502_v16 = vpop.f32.mrb[14].mxu0 }
 0x52c   : > { %v4020_v28 = vmul.f32 -1.442695, %v3303_v19  ;;  %v3259_v39 = vadd.f32 %v4502_v16, %v3099_v46  ;;  %v3253_v8 = vpop.f32.mrb[15].mxu0 }
 0x52d   : > { %v4019_v41 = vmul.f32 -1.442695, %v3302_v36  ;;  %v3254_v40 = vadd.f32 %v3253_v8, %v3094_v4  ;;  %v3124_v4 = vpop.permute.xlu0 %3123 }
 0x52e   : > { %4718 = vpow2.f32 %v4020_v28  ;;  %v3305_v52 = vadd.f32 %v3998_v6, %v3259_v39  ;;  %v4004_v6 = vld [vmem:[%s5903_s15 + $0x108] sm:$0xff] }
 0x52f   : > { %4720 = vpow2.f32 %v4019_v41  ;;  %v3304_v63 = vadd.f32 %v3997_v18, %v3254_v40  ;;  %v4505_v55 = vpop.f32.mrb[16].mxu0  ;;  %v4003_v18 = vld [vmem:[%s5903_s15 + $0x100] sm:$0xff] }
 0x530   : > { %v4022_v7 = vmul.f32 -1.442695, %v3305_v52  ;;  %v3269_v9 = vadd.f32 %v4505_v55, %v3109_v5  ;;  %v3263_v24 = vpop.f32.mrb[17].mxu0  ;;  %v3139_v5 = vpop.permute.xlu1 %3138 }
 0x531   : > { %v4021_v58 = vmul.f32 -1.442695, %v3304_v63  ;;  %v3264_v21 = vadd.f32 %v3263_v24, %v3104_v22  ;;  %v3134_v40 = vpop.permute.xlu0 %3133  ;;  %v3386_v24 = vld [vmem:[%s6235_s0] sm:$0x1] }
 0x532   : > { %4722 = vpow2.f32 %v4022_v7  ;;  %v3331_v23 = vadd.f32 %v4000_v53, %v3269_v9  ;;  %v4006_v7 = vld [vmem:[%s5903_s15 + $0x118] sm:$0xff] }
 0x533   : > { %4724 = vpow2.f32 %v4021_v58  ;;  %v3330_v43 = vadd.f32 %v3999_v42, %v3264_v21  ;;  %v4508_v62 = vpop.f32.mrb[18].mxu0  ;;  %v3387_v58 = vstv %s3042_s26 }
 0x534   : > { %v4024_v44 = vmul.f32 -1.442695, %v3331_v23  ;;  %v3279_v29 = vadd.f32 %v4508_v62, %v3119_v32  ;;  %v3273_v59 = vpop.f32.mrb[19].mxu0  ;;  %v4005_v23 = vld [vmem:[%s5903_s15 + $0x110] sm:$0xff]  ;;  %vm3388_vm8 = vcmp.lt.s32.totalorder %v3387_v58, %v3386_v24  ;;  %v4038_v58 = vld [vmem:[%s5903_s15 + $0x138] sm:$0xff] }
 0x535   : > { %v4023_v2 = vmul.f32 -1.442695, %v3330_v43  ;;  %v3274_v3 = vadd.f32 %v3273_v59, %v3114_v33  ;;  %v3389_v62 = vsel %vm3388_vm8, 1, %v4842_v10 }
 0x536   : > { %4726 = vpow2.f32 %v4024_v44  ;;  %v3333_v35 = vadd.f32 %v4002_v61, %v3279_v29 }
 0x537   : > { %4728 = vpow2.f32 %v4023_v2  ;;  %v3332_v12 = vadd.f32 %v4001_v34, %v3274_v3  ;;  %v4511_v48 = vpop.f32.mrb[20].mxu0  ;;  %v3393_v34 = vrot.slane %v3389_v62, %v5924_v17 }
 0x538   : > { %v4719_v56 = vpop.eup %4718  ;;  %v4026_v51 = vmul.f32 -1.442695, %v3333_v35  ;;  %v3283_v30 = vpop.f32.mrb[21].mxu0  ;;  %v3289_v1 = vadd.f32 %v4511_v48, %v3129_v14 }
 0x539   : > { %v4721_v49 = vpop.eup %4720  ;;  %v3319_v26 = vadd.f32 1.0, %v4719_v56  ;;  %v4025_v15 = vmul.f32 -1.442695, %v3332_v12  ;;  %v3284_v16 = vadd.f32 %v3283_v30, %v3124_v4  ;;  %vm6100_vm9 = vcmp.eq.s32.totalorder %v3393_v34, 1 }
 0x53a   : > { %v3318_v38 = vadd.f32 1.0, %v4721_v49  ;;  %4730 = vpow2.f32 %v4026_v51 }
 0x53b   : > { %4732 = vrcp.f32 %v3319_v26  ;;  %v4514_v54 = vpop.f32.mrb[22].mxu0 }
 0x53c   : > { %v4723_v27 = vpop.eup %4722  ;;  %4734 = vrcp.f32 %v3318_v38  ;;  %v3293_v50 = vpop.f32.mrb[23].mxu0  ;;  %v3299_v63 = vadd.f32 %v4514_v54, %v3139_v5 }
 0x53d   : > { %v4725_v45 = vpop.eup %4724  ;;  %v3321_v13 = vadd.f32 1.0, %v4723_v27  ;;  %4736 = vpow2.f32 %v4025_v15  ;;  %v3294_v9 = vadd.f32 %v3293_v50, %v3134_v40  ;;  %v3452_v5 = vpop.permute.xlu1 %3451 }
 0x53e   : > { %v3320_v25 = vadd.f32 1.0, %v4725_v45 }
 0x53f   : > { %4738 = vrcp.f32 %v3321_v13 }
 0x540   : > { %v4727_v46 = vpop.eup %4726  ;;  %4740 = vrcp.f32 %v3320_v25 }
 0x541   : > { %v4729_v60 = vpop.eup %4728  ;;  %v3347_v31 = vadd.f32 1.0, %v4727_v46  ;;  %v3462_v40 = vpop.permute.xlu1 %3461 }
 0x542   : > { %v3346_v20 = vadd.f32 1.0, %v4729_v60 }
 0x543   : > { %4742 = vrcp.f32 %v3347_v31 }
 0x544   : > { %v4731_v57 = vpop.eup %4730  ;;  %4744 = vrcp.f32 %v3346_v20  ;;  %v3422_v20 = vld [vmem:[%s6236_s5 + $0x10] sm:$0xff] }
 0x545   : > { %v4733_v19 = vpop.eup %4732  ;;  %v3349_v36 = vadd.f32 1.0, %v4731_v57  ;;  %v3421_v57 = vld [vmem:[%s6236_s5 + $0x8] sm:$0xff]  ;;  %v3472_v62 = vpop.permute.xlu1 %3471 }
 0x546   : > { %v4735_v28 = vpop.eup %4734  ;;  %v3359_v39 = vmul.f32 %v4733_v19, %v3289_v1  ;;  %v3423_v1 = vld [vmem:[%s6236_s5 + $0x18] sm:$0xff]  ;;  %v3424_v19 = vld [vmem:[%s6236_s5 + $0x20] sm:$0xff] }
 0x547   : > { %v4737_v8 = vpop.eup %4736  ;;  %v3358_v41 = vmul.f32 %v4735_v28, %v3284_v16  ;;  %4746 = vrcp.f32 %v3349_v36  ;;  %v3425_v36 = vld [vmem:[%s6236_s5 + $0x28] sm:$0xff]  ;;  %v3427_v16 = vld [vmem:[%s6236_s5 + $0x38] sm:$0xff]  ;;  %v3428_v28 = vld [vmem:[%s6236_s5 + $0x40] sm:$0xff] }
 0x548   : > { %v3348_v22 = vadd.f32 1.0, %v4737_v8  ;;  %v3363_v52 = vadd.f32 %v4004_v6, %v3359_v39  ;;  %v3426_v6 = vld [vmem:[%s6236_s5 + $0x30] sm:$0xff]  ;;  %v3429_v39 = vld [vmem:[%s6236_s5 + $0x48] sm:$0xff]  ;;  %v3431_v8 = vld [vmem:[%s6236_s5 + $0x58] sm:$0xff] }
 0x549   : > { %v4739_v53 = vpop.eup %4738  ;;  %v3362_v55 = vadd.f32 %v4003_v18, %v3358_v41  ;;  %v3430_v18 = vld [vmem:[%s6236_s5 + $0x50] sm:$0xff]  ;;  %v3447_v41 = vpop.permute.xlu0 %3446 }
 0x54a   : > { %v4741_v42 = vpop.eup %4740  ;;  %4748 = vrcp.f32 %v3348_v22  ;;  %v3361_v21 = vmul.f32 %v4739_v53, %v3299_v63  ;;  %v4036_v22 = vld [vmem:[%s5903_s15 + $0x128] sm:$0xff] }
 0x54b   : > { %4750 = vtanh.f32 %v3363_v52  ;;  %v3360_v32 = vmul.f32 %v4741_v42, %v3294_v9 }
 0x54c   : > { %4752 = vtanh.f32 %v3362_v55  ;;  %v3365_v43 = vadd.f32 %v4006_v7, %v3361_v21  ;;  %v4035_v55 = vld [vmem:[%s5903_s15 + $0x120] sm:$0xff] }
 0x54d   : > { %v3364_v61 = vadd.f32 %v4005_v23, %v3360_v32  ;;  %v4743_v33 = vpop.eup %4742  ;;  %v3457_v63 = vpop.permute.xlu0 %3456 }
 0x54e   : > { %4754 = vtanh.f32 %v3365_v43  ;;  %v4745_v44 = vpop.eup %4744  ;;  %v3371_v2 = vsub.f32 1.0, %v4743_v33  ;;  %v3379_v56 = vmul.f32 %v4743_v33, %v6020_v47  ;;  %v4037_v43 = vld [vmem:[%s5903_s15 + $0x130] sm:$0xff] }
 0x54f   : > { %4756 = vtanh.f32 %v3364_v61  ;;  %v3370_v35 = vsub.f32 1.0, %v4745_v44  ;;  %v3378_v30 = vmul.f32 %v4745_v44, %v6022_v37 }
 0x551   : > { %v4747_v29 = vpop.eup %4746 }
 0x552   : > { %v3373_v26 = vsub.f32 1.0, %v4747_v29  ;;  %v3381_v47 = vmul.f32 %v4747_v29, %v6036_v0  ;;  %v3467_v29 = vpop.permute.xlu0 %3466 }
 0x554   : > { %v4749_v59 = vpop.eup %4748 }
 0x555   : > { %v4751_v3 = vpop.eup %4750  ;;  %v3372_v54 = vsub.f32 1.0, %v4749_v59  ;;  %v3380_v25 = vmul.f32 %v4749_v59, %v6040_v11 }
 0x556   : > { %v4753_v12 = vpop.eup %4752  ;;  %v3375_v48 = vmul.f32 %v4751_v3, %v3371_v2  ;;  %v4040_v2 = vld [vmem:[%s5903_s15 + $0x148] sm:$0xff] }
 0x557   : > { %v3374_v51 = vmul.f32 %v4753_v12, %v3370_v35 }
 0x558   : > { %v4755_v15 = vpop.eup %4754  ;;  %v6104_v38 = vadd.f32 %v3379_v56, %v3375_v48  ;;  %v4039_v48 = vld [vmem:[%s5903_s15 + $0x140] sm:$0xff] }
 0x559   : > { %v4757_v27 = vpop.eup %4756  ;;  %v6106_v50 = vadd.f32 %v3378_v30, %v3374_v51  ;;  %v3377_v45 = vmul.f32 %v4755_v15, %v3373_v26  ;;  %v3482_v26 = vpop.permute.xlu1 %3481 }
 0x55a   : > { %v3396_v37 = vsel %vm6100_vm9, %v6104_v38, 0.0  ;;  %v3376_v13 = vmul.f32 %v4757_v27, %v3372_v54  ;;  %v4042_v54 = vld [vmem:[%s5903_s15 + $0x158] sm:$0xff] }
 0x55b   : > { %v3395_v46 = vsel %vm6100_vm9, %v6106_v50, 0.0  ;;  %4030 = vst.msk [vmem:[%s5938_s2 + $0x48] sm:$0xff] %vm439_vm3, %v3396_v37  ;;  %v4577_v60 = vpack.c.bf16 %v6104_v38, %v6106_v50  ;;  %v6120_v14 = vadd.f32 %v3381_v47, %v3377_v45  ;;  %v3477_v45 = vpop.permute.xlu0 %3476 }
 0x55c   : > { %4029 = vst.msk [vmem:[%s5938_s2 + $0x40] sm:$0xff] %vm439_vm3, %v3395_v46  ;;  %v6124_v0 = vadd.f32 %v3380_v25, %v3376_v13  ;;  %v4041_v13 = vld [vmem:[%s5903_s15 + $0x150] sm:$0xff] }
 0x55d   : > { %4578 = vmatprep.subr.bf16.mxu1 %v4577_v60  ;;  %v3398_v11 = vsel %vm6100_vm9, %v6120_v14, 0.0 }
 0x55e   : > { %4580 = vmatpush3.bf16.msra.mxu1 %v4577_v60  ;;  %v3397_v4 = vsel %vm6100_vm9, %v6124_v0, 0.0  ;;  %4032 = vst.msk [vmem:[%s5938_s2 + $0x58] sm:$0xff] %vm439_vm3, %v3398_v11  ;;  %v4581_v31 = vpack.c.bf16 %v6120_v14, %v6124_v0 }
 0x55f   : > { %4031 = vst.msk [vmem:[%s5938_s2 + $0x50] sm:$0xff] %vm439_vm3, %v3397_v4 }
 0x560   : > { %4582 = vmatprep.subr.bf16.mxu1 %v4581_v31 }
 0x562   : > { %4584 = vmatpush3.bf16.msra.mxu1 %v4581_v31 }
 0x565   : > { %4524 = vmatmul.mubr.msk.f32.vlgmr.msra.gmra.mrb[12].mxu1 %vm36_vm1, %v3421_v57 }
 0x566   : > { %4526 = vmatprep.mubr.msk.f32.mxu1 %vm36_vm1, %v3422_v20 }
 0x569   : > { %4527 = vmatmul.mubr.msk.f32.gmra.mrb[14].mxu1 %vm36_vm1, %v3423_v1 }
 0x56a   : > { %4529 = vmatprep.mubr.msk.f32.mxu1 %vm36_vm1, %v3424_v19 }
 0x56d   : > { %4530 = vmatmul.mubr.msk.f32.gmra.mrb[16].mxu1 %vm36_vm1, %v3425_v36 }
 0x56e   : > { %4532 = vmatprep.mubr.msk.f32.mxu1 %vm36_vm1, %v3426_v6 }
 0x571   : > { %4533 = vmatmul.mubr.msk.f32.gmra.mrb[18].mxu1 %vm36_vm1, %v3427_v16 }
 0x572   : > { %4535 = vmatprep.mubr.msk.f32.mxu1 %vm36_vm1, %v3428_v28 }
 0x575   : > { %4536 = vmatmul.mubr.msk.f32.gmra.mrb[20].mxu1 %vm36_vm1, %v3429_v39 }
 0x576   : > { %4538 = vmatprep.mubr.msk.f32.mxu1 %vm36_vm1, %v3430_v18 }
 0x579   : > { %4539 = vmatmul.mubr.msk.f32.gmra.mrb[22].mxu1 %vm36_vm1, %v3431_v8 }
 0x638   : > { %v4525_v52 = vpop.f32.mrb[12].mxu1 }
 0x639   : > { %v3612_v53 = vadd.f32 %v4525_v52, %v3452_v5  ;;  %v3606_v7 = vpop.f32.mrb[13].mxu1  ;;  %v3492_v52 = vpop.permute.xlu1 %3491 }
 0x63a   : > { %v3607_v9 = vadd.f32 %v3606_v7, %v3447_v41 }
 0x63b   : > { %v3666_v42 = vadd.f32 %v4036_v22, %v3612_v53 }
 0x63c   : > { %v3665_v24 = vadd.f32 %v4035_v55, %v3607_v9  ;;  %v4528_v21 = vpop.f32.mrb[14].mxu1 }
 0x63d   : > { %v4060_v23 = vmul.f32 -1.442695, %v3666_v42  ;;  %v3622_v32 = vadd.f32 %v4528_v21, %v3462_v40  ;;  %v3616_v61 = vpop.f32.mrb[15].mxu1 }
 0x63e   : > { %v4059_v33 = vmul.f32 -1.442695, %v3665_v24  ;;  %v3617_v44 = vadd.f32 %v3616_v61, %v3457_v63  ;;  %v3487_v63 = vpop.permute.xlu0 %3486 }
 0x63f   : > { %4758 = vpow2.f32 %v4060_v23  ;;  %v3668_v34 = vadd.f32 %v4038_v58, %v3622_v32  ;;  %v4044_v58 = vld [vmem:[%s5903_s15 + $0x168] sm:$0xff] }
 0x640   : > { %4760 = vpow2.f32 %v4059_v33  ;;  %v3667_v59 = vadd.f32 %v4037_v43, %v3617_v44  ;;  %v4531_v3 = vpop.f32.mrb[16].mxu1  ;;  %v4043_v43 = vld [vmem:[%s5903_s15 + $0x160] sm:$0xff] }
 0x641   : > { %v4062_v35 = vmul.f32 -1.442695, %v3668_v34  ;;  %v3632_v12 = vadd.f32 %v4531_v3, %v3472_v62  ;;  %v3626_v56 = vpop.f32.mrb[17].mxu1  ;;  %v3502_v62 = vpop.permute.xlu1 %3501 }
 0x642   : > { %v4061_v51 = vmul.f32 -1.442695, %v3667_v59  ;;  %v3627_v30 = vadd.f32 %v3626_v56, %v3467_v29  ;;  %v3497_v44 = vpop.permute.xlu0 %3496  ;;  %v3749_v56 = vld [vmem:[%s6235_s0] sm:$0x1] }
 0x643   : > { %4762 = vpow2.f32 %v4062_v35  ;;  %v3694_v49 = vadd.f32 %v4040_v2, %v3632_v12  ;;  %v4046_v35 = vld [vmem:[%s5903_s15 + $0x178] sm:$0xff] }
 0x644   : > { %4764 = vpow2.f32 %v4061_v51  ;;  %v3693_v15 = vadd.f32 %v4039_v48, %v3627_v30  ;;  %v4534_v27 = vpop.f32.mrb[18].mxu1  ;;  %v3750_v51 = vstv %s3405_s28 }
 0x645   : > { %v4064_v47 = vmul.f32 -1.442695, %v3694_v49  ;;  %v3642_v37 = vadd.f32 %v4534_v27, %v3482_v26  ;;  %v3636_v25 = vpop.f32.mrb[19].mxu1  ;;  %v4045_v49 = vld [vmem:[%s5903_s15 + $0x170] sm:$0xff]  ;;  %vm3751_vm10 = vcmp.lt.s32.totalorder %v3750_v51, %v3749_v56 }
 0x646   : > { %v4063_v46 = vmul.f32 -1.442695, %v3693_v15  ;;  %v3637_v60 = vadd.f32 %v3636_v25, %v3477_v45  ;;  %v3752_v27 = vsel %vm3751_vm10, 1, %v4842_v10 }
 0x647   : > { %4766 = vpow2.f32 %v4064_v47  ;;  %v3696_v11 = vadd.f32 %v4042_v54, %v3642_v37 }
 0x648   : > { %4768 = vpow2.f32 %v4063_v46  ;;  %v3695_v4 = vadd.f32 %v4041_v13, %v3637_v60  ;;  %v4537_v31 = vpop.f32.mrb[20].mxu1  ;;  %v3756_v13 = vrot.slane %v3752_v27, %v5924_v17 }
 0x649   : > { %v4759_v57 = vpop.eup %4758  ;;  %v4066_v20 = vmul.f32 -1.442695, %v3696_v11  ;;  %v3646_v1 = vpop.f32.mrb[21].mxu1  ;;  %v3652_v9 = vadd.f32 %v4537_v31, %v3492_v52 }
 0x64a   : > { %v4761_v19 = vpop.eup %4760  ;;  %v3682_v36 = vadd.f32 1.0, %v4759_v57  ;;  %v4065_v6 = vmul.f32 -1.442695, %v3695_v4  ;;  %v3647_v21 = vadd.f32 %v3646_v1, %v3487_v63  ;;  %vm6201_vm11 = vcmp.eq.s32.totalorder %v3756_v13, 1 }
 0x64b   : > { %v3681_v16 = vadd.f32 1.0, %v4761_v19  ;;  %4770 = vpow2.f32 %v4066_v20 }
 0x64c   : > { %4772 = vrcp.f32 %v3682_v36  ;;  %v4540_v28 = vpop.f32.mrb[22].mxu1 }
 0x64d   : > { %v4763_v39 = vpop.eup %4762  ;;  %4774 = vrcp.f32 %v3681_v16  ;;  %v3656_v18 = vpop.f32.mrb[23].mxu1  ;;  %v3662_v59 = vadd.f32 %v4540_v28, %v3502_v62 }
 0x64e   : > { %v4765_v8 = vpop.eup %4764  ;;  %v3684_v5 = vadd.f32 1.0, %v4763_v39  ;;  %4776 = vpow2.f32 %v4065_v6  ;;  %v3657_v12 = vadd.f32 %v3656_v18, %v3497_v44 }
 0x64f   : > { %v3683_v41 = vadd.f32 1.0, %v4765_v8 }
 0x650   : > { %4778 = vrcp.f32 %v3684_v5 }
 0x651   : > { %v4767_v40 = vpop.eup %4766  ;;  %4780 = vrcp.f32 %v3683_v41 }
 0x652   : > { %v4769_v22 = vpop.eup %4768  ;;  %v3710_v53 = vadd.f32 1.0, %v4767_v40 }
 0x653   : > { %v3709_v7 = vadd.f32 1.0, %v4769_v22 }
 0x654   : > { %4782 = vrcp.f32 %v3710_v53 }
 0x655   : > { %v4771_v55 = vpop.eup %4770  ;;  %4784 = vrcp.f32 %v3709_v7 }
 0x656   : > { %v4773_v42 = vpop.eup %4772  ;;  %v3712_v24 = vadd.f32 1.0, %v4771_v55 }
 0x657   : > { %v4775_v23 = vpop.eup %4774  ;;  %v3722_v32 = vmul.f32 %v4773_v42, %v3652_v9 }
 0x658   : > { %v4777_v61 = vpop.eup %4776  ;;  %v3721_v33 = vmul.f32 %v4775_v23, %v3647_v21  ;;  %4786 = vrcp.f32 %v3712_v24 }
 0x659   : > { %v3711_v29 = vadd.f32 1.0, %v4777_v61  ;;  %v3726_v34 = vadd.f32 %v4044_v58, %v3722_v32 }
 0x65a   : > { %v4779_v2 = vpop.eup %4778  ;;  %v3725_v3 = vadd.f32 %v4043_v43, %v3721_v33 }
 0x65b   : > { %v4781_v48 = vpop.eup %4780  ;;  %4788 = vrcp.f32 %v3711_v29  ;;  %v3724_v30 = vmul.f32 %v4779_v2, %v3662_v59 }
 0x65c   : > { %4790 = vtanh.f32 %v3726_v34  ;;  %v3723_v26 = vmul.f32 %v4781_v48, %v3657_v12 }
 0x65d   : > { %4792 = vtanh.f32 %v3725_v3  ;;  %v3728_v15 = vadd.f32 %v4046_v35, %v3724_v30 }
 0x65e   : > { %v3727_v54 = vadd.f32 %v4045_v49, %v3723_v26  ;;  %v4783_v45 = vpop.eup %4782 }
 0x65f   : > { %4794 = vtanh.f32 %v3728_v15  ;;  %v4785_v47 = vpop.eup %4784  ;;  %v3734_v46 = vsub.f32 1.0, %v4783_v45  ;;  %v3742_v31 = vmul.f32 %v4783_v45, %v6104_v38 }
 0x660   : > { %4796 = vtanh.f32 %v3727_v54  ;;  %v3733_v11 = vsub.f32 1.0, %v4785_v47  ;;  %v3741_v10 = vmul.f32 %v4785_v47, %v6106_v50 }
 0x662   : > { %v4787_v37 = vpop.eup %4786 }
 0x663   : > { %v3736_v1 = vsub.f32 1.0, %v4787_v37  ;;  %v3744_v16 = vmul.f32 %v4787_v37, %v6120_v14 }
 0x665   : > { %v4789_v25 = vpop.eup %4788 }
 0x666   : > { %v4791_v60 = vpop.eup %4790  ;;  %v3735_v17 = vsub.f32 1.0, %v4789_v25  ;;  %v3743_v28 = vmul.f32 %v4789_v25, %v6124_v0 }
 0x667   : > { %v4793_v4 = vpop.eup %4792  ;;  %v3738_v57 = vmul.f32 %v4791_v60, %v3734_v46 }
 0x668   : > { %v3737_v19 = vmul.f32 %v4793_v4, %v3733_v11 }
 0x669   : > { %v4795_v36 = vpop.eup %4794  ;;  %v3746_v8 = vadd.f32 %v3742_v31, %v3738_v57  }
 0x66a   : > { %v4797_v6 = vpop.eup %4796  ;;  %v3745_v5 = vadd.f32 %v3741_v10, %v3737_v19   ;;  %v3740_v38 = vmul.f32 %v4795_v36, %v3736_v1  ;;  %2310 = sbr.rel (!%p2308_p0) target bundleno = 550 (0x226), region = 71 }
 0x66b   : > { %v3759_v39 = vsel %vm6201_vm11, %v3746_v8, 0.0  ;;  %v3739_v18 = vmul.f32 %v4797_v6, %v3735_v17 }
 0x66c   : > { %4070 = vst.msk [vmem:[%s5938_s2 + $0x68] sm:$0xff] %vm439_vm3, %v3759_v39  ;;  %v3758_v50 = vsel %vm6201_vm11, %v3745_v5, 0.0  ;;  %v3748_v54 = vadd.f32 %v3744_v16, %v3740_v38  }
 0x66d   : > { %4069 = vst.msk [vmem:[%s5938_s2 + $0x60] sm:$0xff] %vm439_vm3, %v3758_v50  ;;  %v3747_v55 = vadd.f32 %v3743_v28, %v3739_v18  }
 0x66e   : > { %v3761_v14 = vsel %vm6201_vm11, %v3748_v54, 0.0 }
 0x66f   : > { %4072 = vst.msk [vmem:[%s5938_s2 + $0x78] sm:$0xff] %vm439_vm3, %v3761_v14  ;;  %v3760_v0 = vsel %vm6201_vm11, %v3747_v55, 0.0 }
 0x670   : > { %4071 = vst.msk [vmem:[%s5938_s2 + $0x70] sm:$0xff] %vm439_vm3, %v3760_v0 }

</bundles_post_ra>
